<compile_context>
chip_gen: v7x
topology: tpu7x:2x2x1
jax: 0.10.0
libtpu: 0.0.40
codegen_flags: <defaults>
</compile_context>

<pallas_src>
import functools

import numpy as np
import jax
import jax.numpy as jnp
from jax.experimental import pallas as pl
from jax.experimental.pallas import tpu as pltpu

# ----- MelSpec default hyper-parameters --------------------------------------
SAMPLE_RATE = 8000
N_FFT = 1024                    # window_length
HOP = 256
N_CHUNKS = N_FFT // HOP         # 4 hop-blocks per frame
F_MIN = 300.0
F_MAX = 4000.0
N_MELS = 256
EPS_ADD = 1e-8                  # naf_mode=False -> + 1e-8
NORM_EPS = 1e-12                # F.normalize eps

N_FREQS = N_FFT // 2 + 1        # 513 onesided bins
F_CROP = 512                    # bin 512 (Nyquist) has zero mel weight (f_max == sr/2)

TM_MAX = 512                    # max frames per tile (multiple of 128)
HALO = 8                        # halo hop-blocks (>= N_CHUNKS-1, multiple of 8)


def _round_up(a, m):
    return ((a + m - 1) // m) * m


# ----- constant tables (deterministic, built in-script) -----------------------
def _hann_window(n):
    k = np.arange(n, dtype=np.float64)
    return 0.5 - 0.5 * np.cos(2.0 * np.pi * k / n)      # periodic hann


def _dft_weight():
    """Fused windowed [cos | -sin] DFT basis, cropped to F_CROP bins: (1024, 1024)."""
    win = _hann_window(N_FFT)
    k = np.arange(N_FFT, dtype=np.float64)[:, None]
    f = np.arange(F_CROP, dtype=np.float64)[None, :]
    ang = 2.0 * np.pi * k * f / N_FFT
    cos_w = np.cos(ang) * win[:, None]
    sin_w = -np.sin(ang) * win[:, None]
    w = np.concatenate([cos_w, sin_w], axis=1).astype(np.float32)
    return jnp.asarray(w).astype(jnp.bfloat16)


def _mel_filterbank():
    """torchaudio melscale_fbanks, htk scale, norm=None; cropped to F_CROP rows.

    NOTE: the F_CROP=512 crop is only valid while f_max == sample_rate/2 and
    n_fft == 1024 (row 512 / Nyquist carries zero mel weight).
    """
    def hz_to_mel(f):
        return 2595.0 * np.log10(1.0 + f / 700.0)

    def mel_to_hz(m):
        return 700.0 * (10.0 ** (m / 2595.0) - 1.0)

    all_freqs = np.linspace(0.0, SAMPLE_RATE / 2, N_FREQS)
    m_pts = np.linspace(hz_to_mel(F_MIN), hz_to_mel(F_MAX), N_MELS + 2)
    f_pts = mel_to_hz(m_pts)
    f_diff = f_pts[1:] - f_pts[:-1]
    slopes = f_pts[None, :] - all_freqs[:, None]          # (n_freqs, n_mels+2)
    down = -slopes[:, :-2] / f_diff[:-1]
    up = slopes[:, 2:] / f_diff[1:]
    fb = np.maximum(0.0, np.minimum(down, up)).astype(np.float32)  # (513, 256)
    return jnp.asarray(fb[:F_CROP, :]).astype(jnp.bfloat16)        # row 512 is all-zero


W_DFT = _dft_weight()          # (N_FFT, 2*F_CROP) bf16 ~ 2 MB
MEL_FB = _mel_filterbank()     # (F_CROP, N_MELS)  bf16 ~ 256 KB


# ----- Pallas kernel -----------------------------------------------------------
def melspec_kernel(xa_ref, xh_ref, w_ref, fb_ref, o_ref, frames_ref, *,
                   transpose_out):
    # xa: (tm, HOP) hop-blocks of this tile;  xh: (HALO, HOP) halo (next blocks)
    # frames_ref: (tm, N_FFT) f32 scratch; frame j = hop-blocks j, j+1, j+2, j+3.
    tm = xa_ref.shape[0]

    frames_ref[:, 0:HOP] = xa_ref[...]
    for c in range(1, N_CHUNKS):
        lo, hi = c * HOP, (c + 1) * HOP
        frames_ref[0:tm - c, lo:hi] = xa_ref[c:tm, :]      # shifted main copy
        frames_ref[tm - c:tm, lo:hi] = xh_ref[0:c, :]      # tail from halo

    # One MXU pass: windowed [cos | -sin] DFT with K accumulated inside the MXU
    # (no f32 partial products / explicit accumulator in VMEM).
    stft = jnp.dot(frames_ref[...].astype(jnp.bfloat16), w_ref[...],
                   preferred_element_type=jnp.float32)     # (tm, 2*F_CROP) f32

    re = stft[:, :F_CROP]
    im = stft[:, F_CROP:]
    power = re * re + im * im                              # |STFT|^2 (power=2)
    mel = jnp.dot(power.astype(jnp.bfloat16), fb_ref[...],
                  preferred_element_type=jnp.float32)      # (tm, N_MELS)
    logmel = jnp.log(mel + EPS_ADD)                        # mel_log='log'

    if transpose_out:
        o_ref[...] = jnp.transpose(logmel)                 # (N_MELS, tm), XLU
    else:
        o_ref[...] = logmel                                # (tm, N_MELS)


# ----- wrapper -----------------------------------------------------------------
def mel_spec(x, tm_max=TM_MAX):
    """x: (B, T) float32 waveform -> (B, N_MELS, n_frames) float32 log-mel."""
    B, T = x.shape
    x = x.astype(jnp.float32)

    pad = N_FFT // 2
    assert T > pad, "reflect padding (center=True) needs T > n_fft // 2"

    # 1) F.normalize(x, p=2, dim=-1): cheap JAX reduction fused into the pad pass.
    nrm = jnp.sqrt(jnp.sum(x * x, axis=-1, keepdims=True))
    x = x / jnp.maximum(nrm, NORM_EPS)

    # 2) frame bookkeeping: adaptive tile so short clips don't pad to TM_MAX.
    n_frames = 1 + T // HOP
    tm = min(tm_max, _round_up(n_frames, 8))
    assert tm % 8 == 0 and HALO % 8 == 0 and HALO >= N_CHUNKS - 1
    n_tiles = pl.cdiv(n_frames, tm)
    n_rows = n_tiles * tm + HALO                    # hop-blocks incl. halo for last tile
    halo_block = tm // HALO                         # halo offset in 8-row block units

    # 3) center=True reflect pad + tail zero pad fused into ONE concatenation,
    #    then reshape into hop-blocks (no overlapping frame gather in HBM).
    left = x[:, 1:pad + 1][:, ::-1]
    right = x[:, T - pad - 1:T - 1][:, ::-1]
    tail = n_rows * HOP - (T + 2 * pad)
    xp = jnp.concatenate(
        [left, x, right, jnp.zeros((B, tail), jnp.float32)], axis=1)
    xb = xp.reshape(B, n_rows, HOP)                 # frame j = rows j..j+3

    # 4) output layout: write transposed (lane-dense, aligned XLU transpose) for
    #    long clips; tiny clips keep the trivially cheap JAX-side transpose.
    transpose_out = (tm % 128 == 0)
    n_pad_frames = n_tiles * tm
    if transpose_out:
        out_shape = jax.ShapeDtypeStruct((B, N_MELS, n_pad_frames), jnp.float32)
        out_spec = pl.BlockSpec((None, N_MELS, tm), lambda b, t: (b, 0, t))
    else:
        out_shape = jax.ShapeDtypeStruct((B, n_pad_frames, N_MELS), jnp.float32)
        out_spec = pl.BlockSpec((None, tm, N_MELS), lambda b, t: (b, t, 0))

    m_total = B * n_pad_frames
    flops = 2 * m_total * N_FFT * (2 * F_CROP) + 2 * m_total * F_CROP * N_MELS
    bytes_accessed = (xb.size * 4 + W_DFT.size * 2 + MEL_FB.size * 2
                      + m_total * N_MELS * 4)

    out = pl.pallas_call(
        functools.partial(melspec_kernel, transpose_out=transpose_out),
        out_shape=out_shape,
        grid=(B, n_tiles),
        in_specs=[
            # tm hop-blocks of this tile
            pl.BlockSpec((None, tm, HOP), lambda b, t: (b, t, 0)),
            # 8-row halo = first hop-blocks of the next tile (same array, tiny DMA)
            pl.BlockSpec((None, HALO, HOP),
                         lambda b, t, hb=halo_block: (b, (t + 1) * hb, 0)),
            # resident fused DFT basis and mel filterbank (block index never changes)
            pl.BlockSpec((N_FFT, 2 * F_CROP), lambda b, t: (0, 0)),
            pl.BlockSpec((F_CROP, N_MELS), lambda b, t: (0, 0)),
        ],
        out_specs=out_spec,
        scratch_shapes=[pltpu.VMEM((tm, N_FFT), jnp.float32)],
        compiler_params=pltpu.CompilerParams(
            dimension_semantics=("parallel", "parallel"),
            vmem_limit_bytes=48 * 1024 * 1024,
        ),
        cost_estimate=pl.CostEstimate(
            flops=int(flops),
            transcendentals=int(m_total * N_MELS),
            bytes_accessed=int(bytes_accessed),
        ),
    )(xb, xb, W_DFT, MEL_FB)

    # spec_norm='l2' -> no max subtraction.
    if transpose_out:
        return out[:, :, :n_frames]                       # already (B, n_mels, frames)
    return jnp.transpose(out[:, :n_frames, :], (0, 2, 1))  # (B, n_mels, frames)


if __name__ == "__main__":
    key = jax.random.PRNGKey(0)
    k1, k2 = jax.random.split(key)

    # Small clip: batch=2, 4096 samples (~0.5 s at 8 kHz) -> 17 frames,
    # adaptive tm=24 (single tile, non-transposed store path).
    x1 = jax.random.normal(k1, (2, 4096), dtype=jnp.float32)
    y1 = mel_spec(x1)
    jax.block_until_ready(y1)
    assert y1.shape == (2, N_MELS, 1 + 4096 // HOP), y1.shape
    assert bool(jnp.all(jnp.isfinite(y1)))

    # Longer clip: batch=1, 163840 samples (~20 s) -> 641 frames,
    # tm=512, 2 tiles, exercises the halo across tiles and the in-kernel
    # transposed (lane-dense) output path.
    x2 = jax.random.normal(k2, (1, 163840), dtype=jnp.float32)
    y2 = mel_spec(x2)
    jax.block_until_ready(y2)
    assert y2.shape == (1, N_MELS, 1 + 163840 // HOP), y2.shape
    assert bool(jnp.all(jnp.isfinite(y2)))

    print("KERNEL_OK")
</pallas_src>

<mosaic_0001>
module attributes {stable_mosaic.version = 11 : i64} {
  func.func @melspec_kernel(%arg0: i32, %arg1: i32, %arg2: memref<1x24x256xf32, #tpu.memory_space<vmem>>, %arg3: memref<1x8x256xf32, #tpu.memory_space<vmem>>, %arg4: memref<1024x1024xbf16, #tpu.memory_space<vmem>>, %arg5: memref<512x256xbf16, #tpu.memory_space<vmem>>, %arg6: memref<1x24x256xf32, #tpu.memory_space<vmem>>, %arg7: memref<24x1024xf32, #tpu.memory_space<vmem>>) attributes {dimension_semantics = [#tpu.dimension_semantics<parallel>, #tpu.dimension_semantics<parallel>], iteration_bounds = array<i64: 2, 1>, scalar_prefetch = 0 : i64, scratch_operands = 1 : i64, tpu.core_type = #tpu.core_type<tc>, window_params = [{transform_indices = @transform_0, window_bounds = array<i64: 1, 24, 256>}, {transform_indices = @transform_1, window_bounds = array<i64: 1, 8, 256>}, {pipeline_mode = #tpu.pipeline_mode<synchronous>, transform_indices = @transform_2, window_bounds = array<i64: 1024, 1024>}, {pipeline_mode = #tpu.pipeline_mode<synchronous>, transform_indices = @transform_3, window_bounds = array<i64: 512, 256>}, {transform_indices = @transform_4, window_bounds = array<i64: 1, 24, 256>}]} {
    %c0 = arith.constant 0 : index
    %c0_0 = arith.constant 0 : index
    %c0_1 = arith.constant 0 : index
    %0 = vector.load %arg2[%c0, %c0_0, %c0_1] : memref<1x24x256xf32, #tpu.memory_space<vmem>>, vector<1x24x256xf32>
    %1 = vector.shape_cast %0 : vector<1x24x256xf32> to vector<24x256xf32>
    %c0_2 = arith.constant 0 : index
    %c0_3 = arith.constant 0 : index
    %2 = vector.load %arg7[%c0_2, %c0_3] : memref<24x1024xf32, #tpu.memory_space<vmem>>, vector<24x256xf32>
    tpu.vector_store %arg7[%c0_2, %c0_3], %1 {strides = array<i32>} : memref<24x1024xf32, #tpu.memory_space<vmem>>, vector<24x256xf32>,
    %c0_4 = arith.constant 0 : index
    %c1 = arith.constant 1 : index
    %c0_5 = arith.constant 0 : index
    %3 = vector.load %arg2[%c0_4, %c1, %c0_5] : memref<1x24x256xf32, #tpu.memory_space<vmem>>, vector<1x23x256xf32>
    %4 = vector.shape_cast %3 : vector<1x23x256xf32> to vector<23x256xf32>
    %c0_6 = arith.constant 0 : index
    %c256 = arith.constant 256 : index
    %5 = vector.load %arg7[%c0_6, %c256] : memref<24x1024xf32, #tpu.memory_space<vmem>>, vector<23x256xf32>
    tpu.vector_store %arg7[%c0_6, %c256], %4 {strides = array<i32>} : memref<24x1024xf32, #tpu.memory_space<vmem>>, vector<23x256xf32>,
    %c0_7 = arith.constant 0 : index
    %c0_8 = arith.constant 0 : index
    %c0_9 = arith.constant 0 : index
    %6 = vector.load %arg3[%c0_7, %c0_8, %c0_9] : memref<1x8x256xf32, #tpu.memory_space<vmem>>, vector<1x1x256xf32>
    %7 = vector.shape_cast %6 : vector<1x1x256xf32> to vector<1x256xf32>
    %c23 = arith.constant 23 : index
    %c256_10 = arith.constant 256 : index
    %8 = vector.load %arg7[%c23, %c256_10] : memref<24x1024xf32, #tpu.memory_space<vmem>>, vector<1x256xf32>
    tpu.vector_store %arg7[%c23, %c256_10], %7 {strides = array<i32>} : memref<24x1024xf32, #tpu.memory_space<vmem>>, vector<1x256xf32>,
    %c0_11 = arith.constant 0 : index
    %c2 = arith.constant 2 : index
    %c0_12 = arith.constant 0 : index
    %9 = vector.load %arg2[%c0_11, %c2, %c0_12] : memref<1x24x256xf32, #tpu.memory_space<vmem>>, vector<1x22x256xf32>
    %10 = vector.shape_cast %9 : vector<1x22x256xf32> to vector<22x256xf32>
    %c0_13 = arith.constant 0 : index
    %c512 = arith.constant 512 : index
    %11 = vector.load %arg7[%c0_13, %c512] : memref<24x1024xf32, #tpu.memory_space<vmem>>, vector<22x256xf32>
    tpu.vector_store %arg7[%c0_13, %c512], %10 {strides = array<i32>} : memref<24x1024xf32, #tpu.memory_space<vmem>>, vector<22x256xf32>,
    %c0_14 = arith.constant 0 : index
    %c0_15 = arith.constant 0 : index
    %c0_16 = arith.constant 0 : index
    %12 = vector.load %arg3[%c0_14, %c0_15, %c0_16] : memref<1x8x256xf32, #tpu.memory_space<vmem>>, vector<1x2x256xf32>
    %13 = vector.shape_cast %12 : vector<1x2x256xf32> to vector<2x256xf32>
    %c22 = arith.constant 22 : index
    %c512_17 = arith.constant 512 : index
    %14 = vector.load %arg7[%c22, %c512_17] : memref<24x1024xf32, #tpu.memory_space<vmem>>, vector<2x256xf32>
    tpu.vector_store %arg7[%c22, %c512_17], %13 {strides = array<i32>} : memref<24x1024xf32, #tpu.memory_space<vmem>>, vector<2x256xf32>,
    %c0_18 = arith.constant 0 : index
    %c3 = arith.constant 3 : index
    %c0_19 = arith.constant 0 : index
    %15 = vector.load %arg2[%c0_18, %c3, %c0_19] : memref<1x24x256xf32, #tpu.memory_space<vmem>>, vector<1x21x256xf32>
    %16 = vector.shape_cast %15 : vector<1x21x256xf32> to vector<21x256xf32>
    %c0_20 = arith.constant 0 : index
    %c768 = arith.constant 768 : index
    %17 = vector.load %arg7[%c0_20, %c768] : memref<24x1024xf32, #tpu.memory_space<vmem>>, vector<21x256xf32>
    tpu.vector_store %arg7[%c0_20, %c768], %16 {strides = array<i32>} : memref<24x1024xf32, #tpu.memory_space<vmem>>, vector<21x256xf32>,
    %c0_21 = arith.constant 0 : index
    %c0_22 = arith.constant 0 : index
    %c0_23 = arith.constant 0 : index
    %18 = vector.load %arg3[%c0_21, %c0_22, %c0_23] : memref<1x8x256xf32, #tpu.memory_space<vmem>>, vector<1x3x256xf32>
    %19 = vector.shape_cast %18 : vector<1x3x256xf32> to vector<3x256xf32>
    %c21 = arith.constant 21 : index
    %c768_24 = arith.constant 768 : index
    %20 = vector.load %arg7[%c21, %c768_24] : memref<24x1024xf32, #tpu.memory_space<vmem>>, vector<3x256xf32>
    tpu.vector_store %arg7[%c21, %c768_24], %19 {strides = array<i32>} : memref<24x1024xf32, #tpu.memory_space<vmem>>, vector<3x256xf32>,
    %c0_25 = arith.constant 0 : index
    %c0_26 = arith.constant 0 : index
    %21 = vector.load %arg7[%c0_25, %c0_26] : memref<24x1024xf32, #tpu.memory_space<vmem>>, vector<24x1024xf32>
    %22 = arith.truncf %21 : vector<24x1024xf32> to vector<24x1024xbf16>
    %c0_27 = arith.constant 0 : index
    %c0_28 = arith.constant 0 : index
    %23 = vector.load %arg4[%c0_27, %c0_28] : memref<1024x1024xbf16, #tpu.memory_space<vmem>>, vector<1024x1024xbf16>
    %cst = arith.constant dense<0.000000e+00> : vector<24x1024xf32>
    %24 = tpu.matmul %22, %23, %cst {dimension_numbers = #tpu.dot_dimension_numbers<[1], [0], [0], [1], [0, 0, 1, 1], [], []>} : vector<24x1024xbf16>, vector<1024x1024xbf16>, vector<24x1024xf32> -> vector<24x1024xf32>
    %25 = vector.extract_strided_slice %24 {offsets = [0, 0], sizes = [24, 512], strides = [1, 1]} : vector<24x1024xf32> to vector<24x512xf32>
    %26 = vector.extract_strided_slice %24 {offsets = [0, 512], sizes = [24, 512], strides = [1, 1]} : vector<24x1024xf32> to vector<24x512xf32>
    %27 = arith.mulf %25, %25 : vector<24x512xf32>
    %28 = arith.mulf %26, %26 : vector<24x512xf32>
    %29 = arith.addf %27, %28 : vector<24x512xf32>
    %30 = arith.truncf %29 : vector<24x512xf32> to vector<24x512xbf16>
    %c0_29 = arith.constant 0 : index
    %c0_30 = arith.constant 0 : index
    %31 = vector.load %arg5[%c0_29, %c0_30] : memref<512x256xbf16, #tpu.memory_space<vmem>>, vector<512x256xbf16>
    %cst_31 = arith.constant dense<0.000000e+00> : vector<24x256xf32>
    %32 = tpu.matmul %30, %31, %cst_31 {dimension_numbers = #tpu.dot_dimension_numbers<[1], [0], [0], [1], [0, 0, 1, 1], [], []>} : vector<24x512xbf16>, vector<512x256xbf16>, vector<24x256xf32> -> vector<24x256xf32>
    %cst_32 = arith.constant 9.99999993E-9 : f32
    %33 = vector.broadcast %cst_32 : f32 to vector<24x256xf32>
    %34 = arith.addf %32, %33 : vector<24x256xf32>
    %35 = math.log %34 : vector<24x256xf32>
    %c0_33 = arith.constant 0 : index
    %c0_34 = arith.constant 0 : index
    %c0_35 = arith.constant 0 : index
    %36 = vector.load %arg6[%c0_33, %c0_34, %c0_35] : memref<1x24x256xf32, #tpu.memory_space<vmem>>, vector<1x24x256xf32>
    %37 = vector.shape_cast %36 : vector<1x24x256xf32> to vector<24x256xf32>
    %38 = vector.shape_cast %35 : vector<24x256xf32> to vector<1x24x256xf32>
    tpu.vector_store %arg6[%c0_33, %c0_34, %c0_35], %38 {strides = array<i32>} : memref<1x24x256xf32, #tpu.memory_space<vmem>>, vector<1x24x256xf32>,
    return
  }
  func.func @transform_0(%arg0: i32, %arg1: i32) -> (i32, i32, i32) {
    %c0_i32 = arith.constant 0 : i32
    %c0_i32_0 = arith.constant 0 : i32
    return %arg0, %arg1, %c0_i32 : i32, i32, i32
  }
  func.func @transform_1(%arg0: i32, %arg1: i32) -> (i32, i32, i32) {
    %c1_i32 = arith.constant 1 : i32
    %0 = arith.addi %arg1, %c1_i32 : i32
    %c3_i32 = arith.constant 3 : i32
    %1 = arith.muli %0, %c3_i32 : i32
    %c0_i32 = arith.constant 0 : i32
    %c0_i32_0 = arith.constant 0 : i32
    return %arg0, %1, %c0_i32 : i32, i32, i32
  }
  func.func @transform_2(%arg0: i32, %arg1: i32) -> (i32, i32) {
    %c0_i32 = arith.constant 0 : i32
    %c0_i32_0 = arith.constant 0 : i32
    %c0_i32_1 = arith.constant 0 : i32
    return %c0_i32, %c0_i32_0 : i32, i32
  }
  func.func @transform_3(%arg0: i32, %arg1: i32) -> (i32, i32) {
    %c0_i32 = arith.constant 0 : i32
    %c0_i32_0 = arith.constant 0 : i32
    %c0_i32_1 = arith.constant 0 : i32
    return %c0_i32, %c0_i32_0 : i32, i32
  }
  func.func @transform_4(%arg0: i32, %arg1: i32) -> (i32, i32, i32) {
    %c0_i32 = arith.constant 0 : i32
    %c0_i32_0 = arith.constant 0 : i32
    return %arg0, %arg1, %c0_i32 : i32, i32, i32
  }
}

</mosaic_0001>

<bundles_post_ra>
// kernel: tpu_custom_call.1
= control target key start
LH: loop header
LB: loop body
LE: loop exit
PB: predicated region body
PF: predicated region fallthrough
CT: control target
= control target key end

     0   :  { %s6814_s0 = inlined_call_operand.hbm [shape: f32[2,32,256], index: 0, kind: input, shape index: {}]   ;;  %s6815_s1 = inlined_call_operand.hbm [shape: f32[2,32,256], index: 1, kind: input, shape index: {}]   ;;  %s6816_s2 = inlined_call_operand.hbm [shape: bf16[1024,1024], index: 2, kind: input, shape index: {}]   ;;  %s6817_s3 = inlined_call_operand.hbm [shape: bf16[512,256], index: 3, kind: input, shape index: {}]   ;;  %s6818_s4 = inlined_call_operand.hbm [shape: f32[2,24,256], index: 4, kind: output, shape index: {}]  }
   0x1   :  { %6824 = sst [smem:[#allocation19_spill]] %s6814_s0 }
   0x2   :  { %6825 = sst [smem:[#allocation20_spill]] %s6816_s2 }
   0x3   :  { %6826 = sst [smem:[#allocation21_spill]] %s6817_s3 }
   0x4   :  { %9 = vsyncpa [#allocation4], 0 }
   0x5   :  { %11 = vsyncpa [#allocation4 + $0x1], 0 }
   0x6   :  { %12 = vsyncpa [#allocation7], 0 }
   0x7   :  { %14 = vsyncpa [#allocation7 + $0x1], 0 }
   0x8   :  { %15 = vsyncpa [#allocation10], 0 }
   0x9   :  { %16 = vsyncpa [#allocation5], 0 }
   0xa   :  { %18 = vsyncpa [#allocation5 + $0x1], 0  ;;  %s6261_s15 = smov 0   ;;  %s6263_s16 = smov 0  }
   0xb   :  { %s6265_s17 = smov 0   ;;  %s6267_s18 = smov 0  }
   0xc   :  { %s6269_s19 = smov 0   ;;  %s6271_s20 = smov 0  }
   0xd LB: > { %s6292_s21 = sadd.s32 4294967295, %s6221_s20   ;;  %s5100_s22 = sadd.s32 4294967294, %s6221_s20   ;;  %s6221_s20 = sphi %s6271_s20, %s24_s20   ;;  %s6217_s19 = sphi %s6269_s19, %s6854_s19   ;;  %s6213_s18 = sphi %s6267_s18, %s6853_s18   ;;  %s6209_s17 = sphi %s6265_s17, %s6852_s17   ;;  %s6205_s16 = sphi %s6263_s16, %s6851_s16   ;;  %s6201_s15 = sphi %s6261_s15, %s6850_s15  }
   0xe   : > { %p58_p0 = scmp.ne.s32.totalorder %s6205_s16, %s6201_s15  ;;  %p6819_p1 = scmp.eq.s32.totalorder %s6292_s21, 0 }
   0xf   : > { %p164_p3 = scmp.eq.s32.totalorder %s5100_s22, 1  ;;  %p5101_p5 = scmp.ge.s32.totalorder %s6221_s20, 1 }
  0x10   : > { %p6301_p4 = por %p6819_p1, %p58_p0  ;;  %p171_p7 = scmp.lt.s32.totalorder %s6221_s20, 3 }
  0x11   : > { %p6306_p6 = por %p164_p3, %p58_p0  ;;  %s6223_s26 = smov [#allocation8]  }
  0x12   : > { %s6827_s23 = scalar_select %p6301_p4, 1, 0 }
  0x13   : > { %s6828_s24 = scalar_select %p6306_p6, 1, 0 }
  0x14   : > { %p6311_p8 = pnand %p5101_p5, %p171_p7  ;;  %s183_s27 = sshll.u32 %s6223_s26, 4  ;;  %s6315_s27 = int_to_ptr.vmem [resolvable:$true] %s183_s27 }
  0x15   : > { %s6224_s29 = smov [#allocation9]   ;;  %s6831_s2 = sld [smem:[#allocation20_spill]] }
  0x16   : > { %s6829_s25 = scalar_select %p6311_p8, 1, 0 }
  0x17   : > { %p5820_p9 = pneg %p6311_p8  ;;  %s196_s30 = sshll.u32 %s6224_s29, 4  ;;  %s6326_s30 = int_to_ptr.vmem [resolvable:$true] %s196_s30 }
  0x19   : > { %p6322_p11 = pnand %p5820_p9, %p6819_p1 }
  0x1b   : > { %s6010_s7 = scalar_lea.hbm %s6831_s2, 65536  ;;  %p6012_p13 = pneg %p6322_p11 }
  0x1c   : > { %p6011_p12 = scmp.ne.s32.totalorder %s6831_s2, %s6010_s7  ;;  %p6017_p5 = scmp.lt.u32.totalorder %s6010_s7, %s6831_s2 }
  0x1e   : > { %p6013_p0 = pnand %p6012_p13, %p6011_p12 }
  0x20   : > { %p6014_p3 = pneg %p6013_p0 }
  0x22   : > { %p6019_p7 = pnand %p6017_p5, %p6014_p3 }
  0x24   : > { %6022 = shalt.err (!%p6019_p7)
}
  0x25   : > { %s6023_s12 = scalar_lea.vmem %s6315_s27, 65536  ;;  %p6031_p2 = scmp.lt.s32.totalorder %s6315_s27, %s6315_s27 }
  0x26   : > { %p6024_p9 = scmp.ne.s32.totalorder %s6315_s27, %s6023_s12  ;;  %p6032_p12 = scmp.lt.s32.totalorder %s6023_s12, %s6023_s12 }
  0x28   : > { %p6026_p10 = pnand %p6024_p9, %p6012_p13  ;;  %p6033_p0 = por %p6032_p12, %p6031_p2 }
  0x2a   : > { %p6027_p1 = pneg %p6026_p10 }
  0x2c   : > { %p6034_p6 = pnand %p6033_p0, %p6027_p1 }
  0x2e   : > { %6037 = shalt.err (!%p6034_p6)
}
  0x2f   : > { %s6225_s13 = smov 512   ;;  %s6226_s14 = smov 32  }
  0x30   : > { %5823 = dma.hbm_to_vmem [thread:$0]  (!%p6322_p11), %s6831_s2, 65536, %s6315_s27, [#allocation7], %s6225_s13, %s6225_s13, %s6226_s14  }
  0x31   : > { %s6832_s3 = sld [smem:[#allocation21_spill]] }
  0x37   : > { %s6038_s6 = scalar_lea.hbm %s6832_s3, 8192 }
  0x38   : > { %p6039_p2 = scmp.ne.s32.totalorder %s6832_s3, %s6038_s6  ;;  %p6045_p10 = scmp.lt.u32.totalorder %s6038_s6, %s6832_s3 }
  0x3a   : > { %p6041_p1 = pnand %p6039_p2, %p6012_p13 }
  0x3c   : > { %p6042_p6 = pneg %p6041_p1 }
  0x3e   : > { %p6047_p3 = pnand %p6045_p10, %p6042_p6 }
  0x40   : > { %6050 = shalt.err (!%p6047_p3)
}
  0x41   : > { %s6051_s27 = scalar_lea.vmem %s6326_s30, 8192  ;;  %p6059_p12 = scmp.lt.s32.totalorder %s6326_s30, %s6326_s30 }
  0x42   : > { %p6052_p5 = scmp.ne.s32.totalorder %s6326_s30, %s6051_s27  ;;  %p6060_p0 = scmp.lt.s32.totalorder %s6051_s27, %s6051_s27 }
  0x44   : > { %p6054_p7 = pnand %p6052_p5, %p6012_p13  ;;  %p6061_p2 = por %p6060_p0, %p6059_p12 }
  0x46   : > { %p6055_p9 = pneg %p6054_p7 }
  0x48   : > { %p6062_p1 = pnand %p6061_p2, %p6055_p9 }
  0x4a   : > { %6065 = shalt.err (!%p6062_p1)
}
  0x4b   : > { %s6227_s11 = smov 128   ;;  %s6228_s12 = smov 8  }
  0x4c   : > { %5826 = dma.hbm_to_vmem [thread:$0]  (!%p6322_p11), %s6832_s3, 8192, %s6326_s30, [#allocation10], %s6227_s11, %s6227_s11, %s6228_s12  }
  0x4d   : > { %s36_s22 = sadd.s32 1, %s6217_s19  ;;  %s45_s26 = sadd.s32 1, %s6209_s17 }
  0x4e   : > { %p38_p13 = scmp.ge.s32.totalorder %s36_s22, 2  ;;  %p52_p6 = scmp.ne.s32.totalorder %s6209_s17, %s6205_s16 }
  0x4f   : > { %p53_p10 = scmp.eq.s32.totalorder %s6221_s20, 0  ;;  %p5840_p3 = scmp.lt.s32.totalorder %s6221_s20, 2 }
  0x50   : > { %s6856_s22 = smov (%p38_p13, %s36_s22), 0  ;;  %p6834_p7 = scmp.eq.s32.totalorder %s6292_s21, 1 }
  0x51   : > { %6833 = sst [smem:[#allocation17_spill]] %s6856_s22  ;;  %p54_p5 = por %p53_p10, %p52_p6 }
  0x52   : > { %p6390_p9 = por %p6834_p7, %p52_p6  ;;  %s40_s29 = ssub.s32 %s6217_s19, %s6856_s22 }
  0x53   : > { %s6397_s5 = sand.u32 1, %s6209_s17   ;;  %p43_p11 = scmp.eq.s32.totalorder %s40_s29, 0 }
  0x54   : > { %s6835_s28 = scalar_select %p6390_p9, 1, 0 }
  0x55   : > { %s5803_s30 = smul.u32 48, %s6397_s5  ;;  %s5693_s6 = sshll.u32 %s6217_s19, 10 }
  0x56   : > { %s6402_s7 = scalar_select %p43_p11, %s6209_s17, %s45_s26  }
  0x57   : > { %s6837_s0 = sld [smem:[#allocation19_spill]]  ;;  %s214_s27 = scalar_lea.vmem [#allocation3], %s5803_s30 }
  0x58   : > { %6836 = sst [smem:[#allocation18_spill]] %s6402_s7  ;;  %s231_s11 = sshll.u32 %s214_s27, 4  ;;  %s6417_s11 = int_to_ptr.vmem [resolvable:$true] %s231_s11 }
  0x59   : > { %p6413_p12 = pnand %p5840_p3, %p54_p5  ;;  %s211_s13 = scalar_lea.sflag [#allocation4], %s6397_s5 }
  0x5b   : > { %p6068_p2 = pneg %p6413_p12 }
  0x5d   : > { %s6409_s10 = scalar_lea.hbm %s6837_s0, %s5693_s6  ;;  %s6071_s30 = scalar_lea.hbm %s6837_s0, 2048 }
  0x5e   : > { %s6066_s14 = scalar_lea.hbm %s6409_s10, 768  ;;  %p6072_p6 = scmp.lt.u32.totalorder %s6409_s10, %s6837_s0 }
  0x5f   : > { %p6067_p0 = scmp.ne.s32.totalorder %s6409_s10, %s6066_s14  ;;  %p6073_p10 = scmp.lt.u32.totalorder %s6071_s30, %s6066_s14 }
  0x60   : > { %p6075_p5 = scmp.lt.u32.totalorder %s6066_s14, %s6409_s10 }
  0x61   : > { %p6069_p1 = pnand %p6068_p2, %p6067_p0  ;;  %p6074_p3 = por %p6073_p10, %p6072_p6 }
  0x63   : > { %p6070_p13 = pneg %p6069_p1  ;;  %p6076_p7 = por %p6075_p5, %p6074_p3 }
  0x65   : > { %p6077_p11 = pnand %p6076_p7, %p6070_p13 }
  0x67   : > { %6080 = shalt.err (!%p6077_p11)
}
  0x68   : > { %s6081_s27 = scalar_lea.vmem %s6417_s11, 768  ;;  %s6229_s26 = smov [#allocation3]  }
  0x69   : > { %p6082_p0 = scmp.ne.s32.totalorder %s6417_s11, %s6081_s27  ;;  %s6086_s29 = sshll.u32 %s6229_s26, 4  ;;  %s6087_s29 = int_to_ptr.vmem [resolvable:$false] %s6086_s29 }
  0x6a   : > { %s6088_s8 = scalar_lea.vmem %s6087_s29, 1536  ;;  %p6089_p4 = scmp.lt.s32.totalorder %s6417_s11, %s6087_s29 }
  0x6b   : > { %p6084_p1 = pnand %p6082_p0, %p6068_p2  ;;  %p6090_p6 = scmp.lt.s32.totalorder %s6088_s8, %s6081_s27 }
  0x6d   : > { %p6085_p9 = pneg %p6084_p1  ;;  %p6091_p10 = por %p6090_p6, %p6089_p4 }
  0x6f   : > { %p6092_p3 = pnand %p6091_p10, %p6085_p9 }
  0x71   : > { %6095 = shalt.err (!%p6092_p3)
}
  0x72   : > { %s6230_s14 = smov 256   ;;  %s6231_s30 = smov 16  }
  0x73   : > { %5830 = dma.hbm_to_vmem [thread:$0]  (!%p6413_p12), %s6409_s10, 768, %s6417_s11, %s211_s13, %s6230_s14, %s6230_s14, %s6231_s30  }
  0x74   : > { %s241_s9 = sand.u32 1, %s6221_s20   ;;  %s5107_s26 = sshll.u32 %s6397_s5, 4 }
  0x75   : > { %s5012_s8 = scalar_lea.hbm %s6815_s1, %s5693_s6  ;;  %s245_s0 = scalar_lea.vmem [#allocation6], %s5107_s26 }
  0x76   : > { %s257_s2 = sshll.u32 %s245_s0, 4  ;;  %s6454_s3 = scalar_lea.hbm %s5012_s8, 768  ;;  %s258_s2 = int_to_ptr.vmem [resolvable:$true] %s257_s2 }
  0x77   : > { %s242_s22 = scalar_lea.sflag [#allocation7], %s241_s9  ;;  %s6126_s7 = scalar_lea.hbm %s5012_s8, 1024 }
  0x78   : > { %p6097_p4 = scmp.ne.s32.totalorder %s6454_s3, %s6126_s7  ;;  %s6101_s11 = scalar_lea.hbm %s6815_s1, 2048 }
  0x79   : > { %p6102_p5 = scmp.lt.u32.totalorder %s6454_s3, %s6815_s1  ;;  %p6103_p7 = scmp.lt.u32.totalorder %s6101_s11, %s6126_s7 }
  0x7a   : > { %p6099_p9 = pnand %p6097_p4, %p6068_p2  ;;  %p6105_p0 = scmp.lt.u32.totalorder %s6126_s7, %s6454_s3 }
  0x7b   : > { %p6104_p11 = por %p6103_p7, %p6102_p5 }
  0x7c   : > { %p6100_p13 = pneg %p6099_p9 }
  0x7d   : > { %p6106_p1 = por %p6105_p0, %p6104_p11 }
  0x7f   : > { %p6107_p6 = pnand %p6106_p1, %p6100_p13 }
  0x81   : > { %6110 = shalt.err (!%p6107_p6)
}
  0x82   : > { %s6111_s0 = scalar_lea.vmem %s258_s2, 256  ;;  %s6232_s14 = smov [#allocation6]  }
  0x83   : > { %p6112_p10 = scmp.ne.s32.totalorder %s258_s2, %s6111_s0  ;;  %s6116_s30 = sshll.u32 %s6232_s14, 4  ;;  %s6117_s30 = int_to_ptr.vmem [resolvable:$false] %s6116_s30 }
  0x84   : > { %s6118_s9 = scalar_lea.vmem %s6117_s30, 512  ;;  %p6119_p9 = scmp.lt.s32.totalorder %s258_s2, %s6117_s30 }
  0x85   : > { %p6114_p3 = pnand %p6112_p10, %p6068_p2  ;;  %p6120_p8 = scmp.lt.s32.totalorder %s6118_s9, %s6111_s0 }
  0x87   : > { %p6115_p4 = pneg %p6114_p3  ;;  %p6121_p5 = por %p6120_p8, %p6119_p9 }
  0x89   : > { %p6122_p7 = pnand %p6121_p5, %p6115_p4 }
  0x8b   : > { %6125 = shalt.err (!%p6122_p7)
}
  0x8c   : > { %5833 = dma.hbm_to_vmem [thread:$0]  (!%p6413_p12), %s6454_s3, 256, %s258_s2, %s242_s22  }
  0x8d   : > { %p6839_p13 = scmp.ne.s32.totalorder %s6829_s25, 0 }
  0x8e   : > { %s6477_s7 = sand.u32 (!%p6839_p13), 1, %s6205_s16   ;;  %p6840_p8 = scmp.ne.s32.totalorder (!%p6839_p13), %s6827_s23, 0 }
  0x8f   : > { %266 = sbr.rel (%p6839_p13) target bundleno = 1218 (0x4c2), region = 36  ;;  %s269_s27 = scalar_lea.sflag (!%p6839_p13), [#allocation4], %s6477_s7 }
  0x90   : > { %s5804_s26 = smul.u32 (!%p6839_p13), 48, %s6477_s7 }
  0x92   : > { %s6483_s29 = scalar_lea.vmem (!%p6839_p13), [#allocation3], %s5804_s26 }
  0x96   : > { %6180 = dma.done.wait (%p6840_p8), %s269_s27, 768  }
  0x97   : > { %6182 = vsyncadd (%p6840_p8), %s269_s27, 4294966528  ;;  %s277_s2 = sand.u32 1, %s6292_s21   ;;  %s5111_s3 = sshll.u32 %s6477_s7, 4 }
  0x98   : > { %s278_s25 = scalar_lea.sflag [#allocation7], %s277_s2  ;;  %s6491_s22 = scalar_lea.vmem [#allocation6], %s5111_s3 }
  0x99   : > { %6184 = dma.done.wait (%p6840_p8), %s278_s25, 256  }
  0x9a   : > { %6186 = vsyncadd (%p6840_p8), %s278_s25, 4294967040  ;;  %p6841_p12 = scmp.eq.s32.totalorder %s6292_s21, 0 }
  0x9c   : > { %6188 = dma.done.wait (%p6841_p12), [#allocation7], 65536   ;;  %p6842_p2 = pmov %p6841_p12 }
  0x9e   : > { %6190 = vsyncadd (%p6842_p2), [#allocation7], 4294901760  ;;  %p6843_p11 = pmov %p6842_p2 }
  0x9f   : > { %p6844_p0 = pmov %p6842_p2 }
  0xa0   : > { %6192 = dma.done.wait (%p6843_p11), [#allocation10], 8192  }
  0xa1   : > { %6194 = vsyncadd (%p6844_p0), [#allocation10], 4294959104  ;;  %v513_v0 = vld [vmem:[#allocation8] sm:$0xff]  ;;  %v329_v55 = vld [vmem:[%s6483_s29 + $0x8] sm:$0xff]  ;;  %vm352_vm0 = vcmask 1046528   ;;  %vm395_vm1 = vcmask 1045504  }
  0xa2   : > { %v517_v1 = vld [vmem:[#allocation8 + $0x20] sm:$0xff]  ;;  %v6509_v56 = vld [vmem:[%s6483_s29 + $0x18] sm:$0xff]  ;;  %v341_v61 = vld [vmem:[%s6483_s29 + $0x8] sm:$0xfe]  ;;  %vm440_vm3 = vcmask 1044480   ;;  %s318_s21 = scalar_lea.vmem [#allocation11], %s5804_s26 }
  0xa3   : > { %v641_v2 = vld [vmem:[#allocation8 + $0x400] sm:$0xff]  ;;  %v5115_v3 = vcombine.high %v513_v0, %v517_v1  ;;  %v5114_v5 = vcombine.low %v513_v0, %v517_v1  ;;  %v6512_v58 = vpack.c.bf16 %v6509_v56, %v329_v55  ;;  %v357_v62 = vrot.slane %v6509_v56, 1  ;;  %v6523_v1 = vld [vmem:[%s6483_s29 + $0x28] sm:$0xff]  ;;  %s4966_s23 = sshll.u32 %s318_s21, 4  ;;  %s5805_s12 = smul.u32 768, %s6213_s18  ;;  %s6760_s23 = int_to_ptr.vmem [resolvable:$true] %s4966_s23 }
  0xa4   : > { %v645_v4 = vld [vmem:[#allocation8 + $0x420] sm:$0xff]  ;;  %s4950_s11 = scalar_lea.sflag [#allocation5], %s6477_s7  ;;  %s6127_s6 = scalar_lea.vmem %s6760_s23, 768 }
  0xa5   : > { %v521_v6 = vld [vmem:[#allocation8 + $0x40] sm:$0xff]  ;;  %v5243_v8 = vcombine.high %v641_v2, %v645_v4  ;;  %v5242_v9 = vcombine.low %v641_v2, %v645_v4  ;;  %3585 = vmatprep.subr.bf16.mxu1 %v5115_v3  ;;  %v356_v2 = vrot.slane %v341_v61, 1  ;;  %3617 = vmatprep.mubr.bf16.mxu1 %v6512_v58  ;;  %s6765_s10 = scalar_lea.hbm %s6818_s4, %s5805_s12  ;;  %p6128_p1 = scmp.ne.s32.totalorder %s6760_s23, %s6127_s6 }
  0xa6   : > { %v525_v7 = vld [vmem:[#allocation8 + $0x60] sm:$0xff]  ;;  %3586 = vmatpush1.bf16.msra.mxu1 %v5114_v5  ;;  %v361_v5 = vrot.slane %v6523_v1, 1  ;;  %p6845_p6 = scmp.ne.s32.totalorder %s6835_s28, 0  ;;  %s6233_s18 = smov [#allocation11]  }
  0xa7   : > { %v5123_v10 = vcombine.high %v521_v6, %v525_v7  ;;  %v649_v11 = vld [vmem:[#allocation8 + $0x440] sm:$0xff]  ;;  %3636 = vmatprep.subr.bf16.mxu0 %v5243_v8  ;;  %v5122_v18 = vcombine.low %v521_v6, %v525_v7  ;;  %s6131_s13 = sshll.u32 %s6233_s18, 4  ;;  %s6132_s13 = int_to_ptr.vmem [resolvable:$false] %s6131_s13 }
  0xa8   : > { %v653_v12 = vld [vmem:[#allocation8 + $0x460] sm:$0xff]  ;;  %3637 = vmatpush1.bf16.msra.mxu0 %v5242_v9  ;;  %v358_v9 = vsel %vm352_vm0, %v356_v2, %v357_v62  ;;  %374 = vst [vmem:[#allocation2 + $0x98] sm:$0x7f] %v361_v5  ;;  %p6129_p10 = pnand %p6128_p1, %p6845_p6  ;;  %s6133_s0 = scalar_lea.vmem %s6132_s13, 1536 }
  0xa9   : > { %v529_v13 = vld [vmem:[#allocation8 + $0x80] sm:$0xff]  ;;  %v5251_v14 = vcombine.high %v649_v11, %v653_v12  ;;  %3587 = vmatprep.subr.bf16.mxu1 %v5123_v10  ;;  %v5250_v19 = vcombine.low %v649_v11, %v653_v12  ;;  %p6134_p4 = scmp.lt.s32.totalorder %s6760_s23, %s6132_s13  ;;  %p6135_p9 = scmp.lt.s32.totalorder %s6133_s0, %s6127_s6 }
  0xaa   : > { %v533_v15 = vld [vmem:[#allocation8 + $0xa0] sm:$0xff]  ;;  %3588 = vmatpush1.bf16.msra.mxu1 %v5122_v18  ;;  %p6130_p3 = pneg %p6129_p10 }
  0xab   : > { %v657_v16 = vld [vmem:[#allocation8 + $0x480] sm:$0xff]  ;;  %v5131_v20 = vcombine.high %v529_v13, %v533_v15  ;;  %3638 = vmatprep.subr.bf16.mxu0 %v5251_v14  ;;  %v5130_v26 = vcombine.low %v529_v13, %v533_v15  ;;  %v362_v15 = vsel %vm352_vm0, %v357_v62, %v361_v5  ;;  %p6136_p5 = por %p6135_p9, %p6134_p4 }
  0xac   : > { %v661_v17 = vld [vmem:[#allocation8 + $0x4a0] sm:$0xff]  ;;  %3639 = vmatpush1.bf16.msra.mxu0 %v5250_v19  ;;  %v6536_v19 = vpack.c.bf16 %v362_v15, %v358_v9 }
  0xad   : > { %v5259_v21 = vcombine.high %v657_v16, %v661_v17  ;;  %v537_v22 = vld [vmem:[#allocation8 + $0xc0] sm:$0xff]  ;;  %3589 = vmatprep.subr.bf16.mxu1 %v5131_v20  ;;  %v5258_v27 = vcombine.low %v657_v16, %v661_v17  ;;  %p6137_p7 = pnand %p6136_p5, %p6130_p3 }
  0xae   : > { %v541_v23 = vld [vmem:[#allocation8 + $0xe0] sm:$0xff]  ;;  %3590 = vmatpush1.bf16.msra.mxu1 %v5130_v26  ;;  %3668 = vmatprep.mubr.bf16.mxu0 %v6536_v19 }
  0xaf   : > { %v665_v24 = vld [vmem:[#allocation8 + $0x4c0] sm:$0xff]  ;;  %v5139_v28 = vcombine.high %v537_v22, %v541_v23  ;;  %3640 = vmatprep.subr.bf16.mxu0 %v5259_v21  ;;  %v5138_v34 = vcombine.low %v537_v22, %v541_v23 }
  0xb0   : > { %v669_v25 = vld [vmem:[#allocation8 + $0x4e0] sm:$0xff]  ;;  %3641 = vmatpush1.bf16.msra.mxu0 %v5258_v27 }
  0xb1   : > { %v5267_v29 = vcombine.high %v665_v24, %v669_v25  ;;  %v545_v30 = vld [vmem:[#allocation8 + $0x100] sm:$0xff]  ;;  %3591 = vmatprep.subr.bf16.mxu1 %v5139_v28  ;;  %v5266_v35 = vcombine.low %v665_v24, %v669_v25  ;;  %v404_v25 = vrot.slane %v6523_v1, 2 }
  0xb2   : > { %v549_v31 = vld [vmem:[#allocation8 + $0x120] sm:$0xff]  ;;  %3592 = vmatpush1.bf16.msra.mxu1 %v5138_v34 }
  0xb3   : > { %v673_v32 = vld [vmem:[#allocation8 + $0x500] sm:$0xff]  ;;  %v5147_v36 = vcombine.high %v545_v30, %v549_v31  ;;  %3642 = vmatprep.subr.bf16.mxu0 %v5267_v29  ;;  %v5146_v42 = vcombine.low %v545_v30, %v549_v31  ;;  %v400_v31 = vrot.slane %v6509_v56, 2  ;;  %417 = vst [vmem:[#allocation2 + $0xa8] sm:$0x3f] %v404_v25 }
  0xb4   : > { %v677_v33 = vld [vmem:[#allocation8 + $0x520] sm:$0xff]  ;;  %3643 = vmatpush1.bf16.msra.mxu0 %v5266_v35 }
  0xb5   : > { %v5275_v37 = vcombine.high %v673_v32, %v677_v33  ;;  %v553_v38 = vld [vmem:[#allocation8 + $0x140] sm:$0xff]  ;;  %3593 = vmatprep.subr.bf16.mxu1 %v5147_v36  ;;  %v5274_v43 = vcombine.low %v673_v32, %v677_v33 }
  0xb6   : > { %v557_v39 = vld [vmem:[#allocation8 + $0x160] sm:$0xff]  ;;  %3594 = vmatpush1.bf16.msra.mxu1 %v5146_v42  ;;  %v6553_v42 = vsel %vm395_vm1, %v400_v31, %v404_v25 }
  0xb7   : > { %v681_v40 = vld [vmem:[#allocation8 + $0x540] sm:$0xff]  ;;  %v5155_v44 = vcombine.high %v553_v38, %v557_v39  ;;  %3644 = vmatprep.subr.bf16.mxu0 %v5275_v37  ;;  %v5154_v50 = vcombine.low %v553_v38, %v557_v39 }
  0xb8   : > { %v685_v41 = vld [vmem:[#allocation8 + $0x560] sm:$0xff]  ;;  %3645 = vmatpush1.bf16.msra.mxu0 %v5274_v43 }
  0xb9   : > { %v5283_v45 = vcombine.high %v681_v40, %v685_v41  ;;  %v561_v46 = vld [vmem:[#allocation8 + $0x180] sm:$0xff]  ;;  %3595 = vmatprep.subr.bf16.mxu1 %v5155_v44  ;;  %v5282_v52 = vcombine.low %v681_v40, %v685_v41 }
  0xba   : > { %v565_v47 = vld [vmem:[#allocation8 + $0x1a0] sm:$0xff]  ;;  %3596 = vmatpush1.bf16.msra.mxu1 %v5154_v50 }
  0xbb   : > { %v689_v48 = vld [vmem:[#allocation8 + $0x580] sm:$0xff]  ;;  %v5163_v53 = vcombine.high %v561_v46, %v565_v47  ;;  %3646 = vmatprep.subr.bf16.mxu0 %v5283_v45  ;;  %v5162_v4 = vcombine.low %v561_v46, %v565_v47  ;;  %v376_v45 = vlaneseq }
  0xbc   : > { %v693_v49 = vld [vmem:[#allocation8 + $0x5a0] sm:$0xff]  ;;  %3647 = vmatpush1.bf16.msra.mxu0 %v5282_v52 }
  0xbd   : > { %v6505_v51 = vld [vmem:[#allocation8 + $0x1c0] sm:$0xff]  ;;  %v5291_v57 = vcombine.high %v689_v48, %v693_v49  ;;  %3597 = vmatprep.subr.bf16.mxu1 %v5163_v53  ;;  %v5290_v7 = vcombine.low %v689_v48, %v693_v49  ;;  %vm378_vm2 = vcmp.lt.s32.totalorder %v376_v45, 256 }
  0xbe   : > { %v573_v54 = vld [vmem:[#allocation8 + $0x1e0] sm:$0xff]  ;;  %3598 = vmatpush1.bf16.msra.mxu1 %v5162_v4 }
  0xbf   : > { %v6515_v59 = vld [vmem:[%s6483_s29] sm:$0xff]  ;;  %v6518_v60 = vld [vmem:[%s6483_s29 + $0x10] sm:$0xff]  ;;  %v5171_v8 = vcombine.high %v6505_v51, %v573_v54  ;;  %3648 = vmatprep.subr.bf16.mxu0 %v5291_v57  ;;  %v5170_v21 = vcombine.low %v6505_v51, %v573_v54 }
  0xc0   : > { %v697_v63 = vld [vmem:[#allocation8 + $0x5c0] sm:$0xff]  ;;  %v354_v3 = vrot.slane %v6518_v60, 1  ;;  %3649 = vmatpush1.bf16.msra.mxu0 %v5290_v7  ;;  %v397_v32 = vrot.slane %v6518_v60, 2 }
  0xc1   : > { %v701_v0 = vld [vmem:[#allocation8 + $0x5e0] sm:$0xff]  ;;  %3599 = vmatprep.subr.bf16.mxu1 %v5171_v8 }
  0xc2   : > { %v340_v6 = vld [vmem:[%s6483_s29] sm:$0xfe]  ;;  %v5299_v12 = vcombine.high %v697_v63, %v701_v0  ;;  %v5298_v23 = vcombine.low %v697_v63, %v701_v0  ;;  %3600 = vmatpush1.bf16.msra.mxu1 %v5170_v21  ;;  %v375_v63 = vld [vmem:[%s6491_s22] ss:$8 sm:$0x3] }
  0xc3   : > { %v6532_v10 = vld [vmem:[%s6483_s29 + $0x20] sm:$0xff]  ;;  %v353_v11 = vrot.slane %v340_v6, 1  ;;  %381 = vst.msk [vmem:[#allocation2 + $0x97] ss:$8 sm:$0x3] %vm378_vm2, %v375_v63 }
  0xc4   : > { %v577_v13 = vld [vmem:[#allocation8 + $0x200] sm:$0xff]  ;;  %v359_v16 = vrot.slane %v6532_v10, 1  ;;  %3650 = vmatprep.subr.bf16.mxu0 %v5299_v12  ;;  %v402_v36 = vrot.slane %v6532_v10, 2  ;;  %v384_v6 = vld [vmem:[%s6483_s29 + $0x8] sm:$0xfc] }
  0xc5   : > { %v581_v14 = vld [vmem:[#allocation8 + $0x220] sm:$0xff]  ;;  %v6539_v20 = vsel %vm352_vm0, %v353_v11, %v354_v3  ;;  %3651 = vmatpush1.bf16.msra.mxu0 %v5298_v23  ;;  %v399_v11 = vrot.slane %v384_v6, 2  ;;  %v6589_v6 = vpack.c.bf16 %v6523_v1, %v6523_v1 }
  0xc6   : > { %v705_v17 = vld [vmem:[#allocation8 + $0x600] sm:$0xff]  ;;  %v6543_v22 = vsel %vm352_vm0, %v354_v3, %v359_v16  ;;  %373 = vst [vmem:[#allocation2 + $0x90] sm:$0x7f] %v359_v16  ;;  %v5179_v24 = vcombine.high %v577_v13, %v581_v14  ;;  %v5178_v33 = vcombine.low %v577_v13, %v581_v14  ;;  %v403_v43 = vsel %vm395_vm1, %v397_v32, %v402_v36 }
  0xc7   : > { %v709_v18 = vld [vmem:[#allocation8 + $0x620] sm:$0xff]  ;;  %416 = vst [vmem:[#allocation2 + $0xa0] sm:$0x3f] %v402_v36  ;;  %v6564_v16 = vsel %vm395_vm1, %v399_v11, %v400_v31 }
  0xc8   : > { %v5307_v26 = vcombine.high %v705_v17, %v709_v18  ;;  %v585_v27 = vld [vmem:[#allocation8 + $0x240] sm:$0xff]  ;;  %3601 = vmatprep.subr.bf16.mxu1 %v5179_v24  ;;  %v5306_v34 = vcombine.low %v705_v17, %v709_v18 }
  0xc9   : > { %v589_v28 = vld [vmem:[#allocation8 + $0x260] sm:$0xff]  ;;  %3602 = vmatpush1.bf16.msra.mxu1 %v5178_v33 }
  0xca   : > { %v713_v29 = vld [vmem:[#allocation8 + $0x640] sm:$0xff]  ;;  %v5187_v35 = vcombine.high %v585_v27, %v589_v28  ;;  %3652 = vmatprep.subr.bf16.mxu0 %v5307_v26  ;;  %v5186_v44 = vcombine.low %v585_v27, %v589_v28  ;;  %v492_v63 = vld [vmem:[#allocation2 + $0x98] sm:$0xff] }
  0xcb   : > { %v717_v30 = vld [vmem:[#allocation8 + $0x660] sm:$0xff]  ;;  %3653 = vmatpush1.bf16.msra.mxu0 %v5306_v34  ;;  %v6594_v11 = vpack.c.bf16 %v492_v63, %v492_v63 }
  0xcc   : > { %v5315_v37 = vcombine.high %v713_v29, %v717_v30  ;;  %v593_v38 = vld [vmem:[#allocation8 + $0x280] sm:$0xff]  ;;  %3603 = vmatprep.subr.bf16.mxu1 %v5187_v35  ;;  %v5314_v46 = vcombine.low %v713_v29, %v717_v30 }
  0xcd   : > { %v597_v39 = vld [vmem:[#allocation8 + $0x2a0] sm:$0xff]  ;;  %3604 = vmatpush1.bf16.msra.mxu1 %v5186_v44  ;;  %v518_v44 = vld [vmem:[#allocation8 + $0x28] sm:$0xff] }
  0xce   : > { %v721_v40 = vld [vmem:[#allocation8 + $0x680] sm:$0xff]  ;;  %v5195_v47 = vcombine.high %v593_v38, %v597_v39  ;;  %3654 = vmatprep.subr.bf16.mxu0 %v5315_v37  ;;  %v5194_v53 = vcombine.low %v593_v38, %v597_v39 }
  0xcf   : > { %v725_v41 = vld [vmem:[#allocation8 + $0x6a0] sm:$0xff]  ;;  %3655 = vmatpush1.bf16.msra.mxu0 %v5314_v46 }
  0xd0   : > { %v5323_v48 = vcombine.high %v721_v40, %v725_v41  ;;  %v601_v49 = vld [vmem:[#allocation8 + $0x2c0] sm:$0xff]  ;;  %3605 = vmatprep.subr.bf16.mxu1 %v5195_v47  ;;  %v5322_v54 = vcombine.low %v721_v40, %v725_v41 }
  0xd1   : > { %v605_v50 = vld [vmem:[#allocation8 + $0x2e0] sm:$0xff]  ;;  %3606 = vmatpush1.bf16.msra.mxu1 %v5194_v53  ;;  %v6573_v53 = vpack.c.bf16 %v6518_v60, %v6515_v59 }
  0xd2   : > { %v729_v51 = vld [vmem:[#allocation8 + $0x6c0] sm:$0xff]  ;;  %v5203_v55 = vcombine.high %v601_v49, %v605_v50  ;;  %3656 = vmatprep.subr.bf16.mxu0 %v5323_v48  ;;  %v5202_v3 = vcombine.low %v601_v49, %v605_v50 }
  0xd3   : > { %v733_v52 = vld [vmem:[#allocation8 + $0x6e0] sm:$0xff]  ;;  %3657 = vmatpush1.bf16.msra.mxu0 %v5322_v54 }
  0xd4   : > { %v5331_v57 = vcombine.high %v729_v51, %v733_v52  ;;  %v609_v61 = vld [vmem:[#allocation8 + $0x300] sm:$0xff]  ;;  %3607 = vmatprep.subr.bf16.mxu1 %v5203_v55  ;;  %v5330_v4 = vcombine.low %v729_v51, %v733_v52  ;;  %v522_v51 = vld [vmem:[#allocation8 + $0x48] sm:$0xff] }
  0xd5   : > { %v613_v62 = vld [vmem:[#allocation8 + $0x320] sm:$0xff]  ;;  %3608 = vmatpush1.bf16.msra.mxu1 %v5202_v3  ;;  %v526_v52 = vld [vmem:[#allocation8 + $0x68] sm:$0xff] }
  0xd6   : > { %v737_v0 = vld [vmem:[#allocation8 + $0x700] sm:$0xff]  ;;  %v5211_v5 = vcombine.high %v609_v61, %v613_v62  ;;  %3658 = vmatprep.subr.bf16.mxu0 %v5331_v57  ;;  %v5210_v15 = vcombine.low %v609_v61, %v613_v62  ;;  %v445_v57 = vrot.slane %v6509_v56, 3  ;;  %v6580_v62 = vpack.c.bf16 %v6543_v22, %v6539_v20  ;;  %v419_v3 = vld [vmem:[%s6491_s22 + $0x8] sm:$0x3] }
  0xd7   : > { %v741_v2 = vld [vmem:[#allocation8 + $0x720] sm:$0xff]  ;;  %3659 = vmatpush1.bf16.msra.mxu0 %v5330_v4  ;;  %v5125_v59 = vcombine.high %v522_v51, %v526_v52  ;;  %v6585_v56 = vld [vmem:[#allocation8 + $0x88] sm:$0xff]  ;;  %v423_v20 = vrot.slane %v419_v3, 2 }
  0xd8   : > { %v5339_v7 = vcombine.high %v737_v0, %v741_v2  ;;  %v617_v8 = vld [vmem:[#allocation8 + $0x340] sm:$0xff]  ;;  %3609 = vmatprep.subr.bf16.mxu1 %v5211_v5  ;;  %v5338_v18 = vcombine.low %v737_v0, %v741_v2  ;;  %v449_v0 = vrot.slane %v6523_v1, 3  ;;  %v534_v5 = vld [vmem:[#allocation8 + $0xa8] sm:$0xff]  ;;  %v5124_v1 = vcombine.low %v522_v51, %v526_v52 }
  0xd9   : > { %v621_v9 = vld [vmem:[#allocation8 + $0x360] sm:$0xff]  ;;  %3610 = vmatpush1.bf16.msra.mxu1 %v5210_v15  ;;  %427 = vst [vmem:[#allocation2 + $0xa8] sm:$0xc0] %v423_v20  ;;  %v5133_v15 = vcombine.high %v6585_v56, %v534_v5 }
  0xda   : > { %v745_v12 = vld [vmem:[#allocation8 + $0x740] sm:$0xff]  ;;  %v5219_v21 = vcombine.high %v617_v8, %v621_v9  ;;  %3660 = vmatprep.subr.bf16.mxu0 %v5339_v7  ;;  %v5218_v30 = vcombine.low %v617_v8, %v621_v9  ;;  %462 = vst [vmem:[#allocation2 + $0xb8] sm:$0x1f] %v449_v0  ;;  %v442_v7 = vrot.slane %v6518_v60, 3 }
  0xdb   : > { %v749_v13 = vld [vmem:[#allocation8 + $0x760] sm:$0xff]  ;;  %3661 = vmatpush1.bf16.msra.mxu0 %v5338_v18  ;;  %v429_v18 = vld [vmem:[%s6483_s29 + $0x8] sm:$0xf8] }
  0xdc   : > { %v383_v14 = vld [vmem:[%s6483_s29] sm:$0xfc]  ;;  %v5347_v23 = vcombine.high %v745_v12, %v749_v13  ;;  %3611 = vmatprep.subr.bf16.mxu1 %v5219_v21  ;;  %v5346_v31 = vcombine.low %v745_v12, %v749_v13  ;;  %v418_v22 = vld [vmem:[%s6491_s22] sm:$0x3]  ;;  %v450_v13 = vsel %vm440_vm3, %v445_v57, %v449_v0 }
  0xdd   : > { %v396_v17 = vrot.slane %v383_v14, 2  ;;  %v625_v24 = vld [vmem:[#allocation8 + $0x380] sm:$0xff]  ;;  %3612 = vmatpush1.bf16.msra.mxu1 %v5218_v30  ;;  %v422_v12 = vrot.slane %v418_v22, 2  ;;  %v447_v14 = vrot.slane %v6532_v10, 3 }
  0xde   : > { %v629_v25 = vld [vmem:[#allocation8 + $0x3a0] sm:$0xff]  ;;  %3662 = vmatprep.subr.bf16.mxu0 %v5347_v23 }
  0xdf   : > { %v398_v26 = vsel %vm395_vm1, %v396_v17, %v397_v32  ;;  %v753_v27 = vld [vmem:[#allocation8 + $0x780] sm:$0xff]  ;;  %v5227_v33 = vcombine.high %v625_v24, %v629_v25  ;;  %v5226_v39 = vcombine.low %v625_v24, %v629_v25  ;;  %3663 = vmatpush1.bf16.msra.mxu0 %v5346_v31  ;;  %v491_v17 = vld [vmem:[#allocation2 + $0x90] sm:$0xff]  ;;  %426 = vst [vmem:[#allocation2 + $0xa0] sm:$0xc0] %v422_v12  ;;  %v538_v24 = vld [vmem:[#allocation8 + $0xc8] sm:$0xff] }
  0xe0   : > { %v757_v28 = vld [vmem:[#allocation8 + $0x7a0] sm:$0xff]  ;;  %v6569_v29 = vpack.c.bf16 %v403_v43, %v398_v26  ;;  %v514_v43 = vld [vmem:[#allocation8 + $0x8] sm:$0xff]  ;;  %v444_v26 = vrot.slane %v429_v18, 3  ;;  %461 = vst [vmem:[#allocation2 + $0xb0] sm:$0x1f] %v447_v14 }
  0xe1   : > { %v5355_v34 = vcombine.high %v753_v27, %v757_v28  ;;  %v633_v35 = vld [vmem:[#allocation8 + $0x3c0] sm:$0xff]  ;;  %3613 = vmatprep.subr.bf16.mxu1 %v5227_v33  ;;  %v5354_v32 = vcombine.low %v753_v27, %v757_v28  ;;  %v5117_v49 = vcombine.high %v514_v43, %v518_v44  ;;  %v5116_v61 = vcombine.low %v514_v43, %v518_v44  ;;  %v542_v25 = vld [vmem:[#allocation8 + $0xe8] sm:$0xff] }
  0xe2   : > { %v637_v36 = vld [vmem:[#allocation8 + $0x3e0] sm:$0xff]  ;;  %3614 = vmatpush1.bf16.msra.mxu1 %v5226_v39  ;;  %v448_v28 = vsel %vm440_vm3, %v442_v7, %v447_v14  ;;  %v464_v39 = vld [vmem:[%s6491_s22 + $0x8] sm:$0x7]  ;;  %v5140_v51 = vcombine.low %v538_v24, %v542_v25 }
  0xe3   : > { %v761_v37 = vld [vmem:[#allocation8 + $0x7c0] sm:$0xff]  ;;  %v5235_v40 = vcombine.high %v633_v35, %v637_v36  ;;  %3664 = vmatprep.subr.bf16.mxu0 %v5355_v34  ;;  %v5234_v47 = vcombine.low %v633_v35, %v637_v36  ;;  %v6607_v34 = vpack.c.bf16 %v6532_v10, %v6532_v10  ;;  %v5132_v35 = vcombine.low %v6585_v56, %v534_v5  ;;  %v546_v43 = vld [vmem:[#allocation8 + $0x108] sm:$0xff] }
  0xe4   : > { %v765_v38 = vld [vmem:[#allocation8 + $0x7e0] sm:$0xff]  ;;  %3665 = vmatpush1.bf16.msra.mxu0 %v5354_v32  ;;  %v6611_v36 = vpack.c.bf16 %v491_v17, %v491_v17  ;;  %v566_v56 = vld [vmem:[#allocation8 + $0x1a8] sm:$0xff] }
  0xe5   : > { %v5363_v41 = vcombine.high %v761_v37, %v765_v38  ;;  %v769_v45 = vld [vmem:[#allocation8 + $0x800] sm:$0xff]  ;;  %3615 = vmatprep.subr.bf16.mxu1 %v5235_v40  ;;  %v5362_v48 = vcombine.low %v761_v37, %v765_v38  ;;  %v446_v37 = vsel %vm440_vm3, %v444_v26, %v445_v57  ;;  %v5141_v40 = vcombine.high %v538_v24, %v542_v25  ;;  %v570_v12 = vld [vmem:[#allocation8 + $0x1c8] sm:$0xff] }
  0xe6   : > { %v773_v46 = vld [vmem:[#allocation8 + $0x820] sm:$0xff]  ;;  %3616 = vmatpush1.bf16.msra.mxu1 %v5234_v47  ;;  %v6617_v10 = vpack.c.bf16 %v450_v13, %v446_v37  ;;  %v550_v47 = vld [vmem:[#allocation8 + $0x128] sm:$0xff] }
  0xe7   : > { %3666 = vmatprep.subr.bf16.mxu0 %v5363_v41  ;;  %v5371_v50 = vcombine.high %v769_v45, %v773_v46  ;;  %v6575_v54 = vld [vmem:[#allocation8 + $0x840] sm:$0xff]  ;;  %v5370_v2 = vcombine.low %v769_v45, %v773_v46  ;;  %3789 = vmatprep.subr.bf16.mxu1 %v5117_v49  ;;  %v468_v45 = vrot.slane %v464_v39, 3  ;;  %v5148_v63 = vcombine.low %v546_v43, %v550_v47  ;;  %v582_v24 = vld [vmem:[#allocation8 + $0x228] sm:$0xff] }
  0xe8   : > { %v781_v55 = vld [vmem:[#allocation8 + $0x860] sm:$0xff]  ;;  %3667 = vmatpush1.bf16.msra.mxu0 %v5362_v48  ;;  %v6623_v48 = vpack.c.bf16 %v6553_v42, %v6564_v16  ;;  %v558_v16 = vld [vmem:[#allocation8 + $0x168] sm:$0xff] }
  0xe9   : > { %3687 = vmatprep.subr.bf16.mxu0 %v5371_v50  ;;  %v5379_v4 = vcombine.high %v6575_v54, %v781_v55  ;;  %3618 = vmatmul.mubr.bf16.vlgmr.msra.gmra.mrb[0].mxu1 %v6573_v53  ;;  %v785_v8 = vld [vmem:[#allocation8 + $0x880] sm:$0xff]  ;;  %v5378_v60 = vcombine.low %v6575_v54, %v781_v55  ;;  %472 = vst [vmem:[#allocation2 + $0xb8] sm:$0xe0] %v468_v45  ;;  %v598_v45 = vld [vmem:[#allocation8 + $0x2a8] sm:$0xff] }
  0xea   : > { %v789_v9 = vld [vmem:[#allocation8 + $0x8a0] sm:$0xff]  ;;  %3790 = vmatpush1.bf16.msra.mxu1 %v5116_v61  ;;  %3627 = vmatprep.mubr.bf16.mxu1 %v6589_v6  ;;  %v5149_v54 = vcombine.high %v546_v43, %v550_v47  ;;  %v554_v61 = vld [vmem:[#allocation8 + $0x148] sm:$0xff] }
  0xeb   : > { %3669 = vmatmul.mubr.bf16.vlgmr.msra.gmra.mrb[0].mxu0 %v6580_v62  ;;  %3791 = vmatprep.subr.bf16.mxu1 %v5125_v59  ;;  %v428_v21 = vld [vmem:[%s6483_s29] sm:$0xf8]  ;;  %v5387_v23 = vcombine.high %v785_v8, %v789_v9  ;;  %v5386_v30 = vcombine.low %v785_v8, %v789_v9  ;;  %v463_v32 = vld [vmem:[%s6491_s22] sm:$0x7]  ;;  %v5156_v20 = vcombine.low %v554_v61, %v558_v16 }
  0xec   : > { %3688 = vmatpush1.bf16.msra.mxu0 %v5370_v2  ;;  %v441_v27 = vrot.slane %v428_v21, 3  ;;  %v793_v31 = vld [vmem:[#allocation8 + $0x8c0] sm:$0xff]  ;;  %3678 = vmatprep.mubr.bf16.mxu0 %v6594_v11  ;;  %v467_v49 = vrot.slane %v463_v32, 3  ;;  %v5157_v2 = vcombine.high %v554_v61, %v558_v16  ;;  %v578_v21 = vld [vmem:[#allocation8 + $0x208] sm:$0xff] }
  0xed   : > { %3689 = vmatprep.subr.bf16.mxu0 %v5379_v4  ;;  %v797_v33 = vld [vmem:[#allocation8 + $0x8e0] sm:$0xff]  ;;  %v562_v4 = vld [vmem:[#allocation8 + $0x188] sm:$0xff]  ;;  %v5180_v37 = vcombine.low %v578_v21, %v582_v24 }
  0xee   : > { %3792 = vmatpush1.bf16.msra.mxu1 %v5124_v1  ;;  %v443_v38 = vsel %vm440_vm3, %v441_v27, %v442_v7  ;;  %v801_v41 = vld [vmem:[#allocation8 + $0x900] sm:$0xff]  ;;  %v5395_v46 = vcombine.high %v793_v31, %v797_v33  ;;  %471 = vst [vmem:[#allocation2 + $0xb0] sm:$0xe0] %v467_v49  ;;  %v5394_v52 = vcombine.low %v793_v31, %v797_v33  ;;  %v574_v1 = vld [vmem:[#allocation8 + $0x1e8] sm:$0xff] }
  0xef   : > { %3793 = vmatprep.subr.bf16.mxu1 %v5133_v15  ;;  %v6619_v44 = vpack.c.bf16 %v448_v28, %v443_v38  ;;  %v805_v50 = vld [vmem:[#allocation8 + $0x920] sm:$0xff]  ;;  %v5165_v7 = vcombine.high %v562_v4, %v566_v56  ;;  %v5164_v14 = vcombine.low %v562_v4, %v566_v56  ;;  %v5173_v15 = vcombine.high %v570_v12, %v574_v1  ;;  %v586_v31 = vld [vmem:[#allocation8 + $0x248] sm:$0xff] }
  0xf0   : > { %3690 = vmatpush1.bf16.msra.mxu0 %v5378_v60  ;;  %v809_v55 = vld [vmem:[#allocation8 + $0x940] sm:$0xff]  ;;  %v5403_v42 = vcombine.high %v801_v41, %v805_v50  ;;  %v5402_v0 = vcombine.low %v801_v41, %v805_v50  ;;  %v5172_v25 = vcombine.low %v570_v12, %v574_v1  ;;  %v5181_v27 = vcombine.high %v578_v21, %v582_v24  ;;  %v594_v41 = vld [vmem:[#allocation8 + $0x288] sm:$0xff] }
  0xf1   : > { %3691 = vmatprep.subr.bf16.mxu0 %v5387_v23  ;;  %3628 = vmatmul.mubr.bf16.gmra.mrb[4].mxu1 %v6607_v34  ;;  %v813_v57 = vld [vmem:[#allocation8 + $0x960] sm:$0xff]  ;;  %v5197_v49 = vcombine.high %v594_v41, %v598_v45 }
  0xf2   : > { %3794 = vmatpush1.bf16.msra.mxu1 %v5132_v35  ;;  %3821 = vmatprep.mubr.bf16.mxu1 %v6512_v58  ;;  %v817_v59 = vld [vmem:[#allocation8 + $0x980] sm:$0xff]  ;;  %v5411_v3 = vcombine.high %v809_v55, %v813_v57  ;;  %v5410_v22 = vcombine.low %v809_v55, %v813_v57  ;;  %v590_v35 = vld [vmem:[#allocation8 + $0x268] sm:$0xff]  ;;  %v5196_v57 = vcombine.low %v594_v41, %v598_v45 }
  0xf3   : > { %3679 = vmatmul.mubr.bf16.gmra.mrb[4].mxu0 %v6611_v36  ;;  %3795 = vmatprep.subr.bf16.mxu1 %v5141_v40  ;;  %v821_v5 = vld [vmem:[#allocation8 + $0x9a0] sm:$0xff]  ;;  %v5189_v39 = vcombine.high %v586_v31, %v590_v35  ;;  %v606_v55 = vld [vmem:[#allocation8 + $0x2e8] sm:$0xff] }
  0xf4   : > { %3692 = vmatpush1.bf16.msra.mxu0 %v5386_v30  ;;  %3719 = vmatprep.mubr.bf16.mxu0 %v6623_v48  ;;  %v825_v8 = vld [vmem:[#allocation8 + $0x9c0] sm:$0xff]  ;;  %v5419_v13 = vcombine.high %v817_v59, %v821_v5  ;;  %v5418_v60 = vcombine.low %v817_v59, %v821_v5 }
  0xf5   : > { %3693 = vmatprep.subr.bf16.mxu0 %v5395_v46  ;;  %v829_v9 = vld [vmem:[#allocation8 + $0x9e0] sm:$0xff]  ;;  %v5188_v46 = vcombine.low %v586_v31, %v590_v35 }
  0xf6   : > { %3796 = vmatpush1.bf16.msra.mxu1 %v5140_v51  ;;  %v833_v17 = vld [vmem:[#allocation8 + $0xa00] sm:$0xff]  ;;  %v5427_v23 = vcombine.high %v825_v8, %v829_v9  ;;  %v5426_v26 = vcombine.low %v825_v8, %v829_v9 }
  0xf7   : > { %3797 = vmatprep.subr.bf16.mxu1 %v5149_v54  ;;  %v837_v18 = vld [vmem:[#allocation8 + $0xa20] sm:$0xff] }
  0xf8   : > { %3694 = vmatpush1.bf16.msra.mxu0 %v5394_v52  ;;  %v841_v28 = vld [vmem:[#allocation8 + $0xa40] sm:$0xff]  ;;  %v5435_v33 = vcombine.high %v833_v17, %v837_v18  ;;  %v5434_v38 = vcombine.low %v833_v17, %v837_v18  ;;  %v602_v52 = vld [vmem:[#allocation8 + $0x2c8] sm:$0xff] }
  0xf9   : > { %3695 = vmatprep.subr.bf16.mxu0 %v5403_v42  ;;  %v845_v30 = vld [vmem:[#allocation8 + $0xa60] sm:$0xff]  ;;  %v5205_v42 = vcombine.high %v602_v52, %v606_v55 }
  0xfa   : > { %3798 = vmatpush1.bf16.msra.mxu1 %v5148_v63  ;;  %v849_v32 = vld [vmem:[#allocation8 + $0xa80] sm:$0xff]  ;;  %v5443_v43 = vcombine.high %v841_v28, %v845_v30  ;;  %v5442_v47 = vcombine.low %v841_v28, %v845_v30  ;;  %v610_v63 = vld [vmem:[#allocation8 + $0x308] sm:$0xff] }
  0xfb   : > { %3799 = vmatprep.subr.bf16.mxu1 %v5157_v2  ;;  %v853_v40 = vld [vmem:[#allocation8 + $0xaa0] sm:$0xff]  ;;  %v614_v2 = vld [vmem:[#allocation8 + $0x328] sm:$0xff] }
  0xfc   : > { %3696 = vmatpush1.bf16.msra.mxu0 %v5402_v0  ;;  %v857_v50 = vld [vmem:[#allocation8 + $0xac0] sm:$0xff]  ;;  %v5451_v54 = vcombine.high %v849_v32, %v853_v40  ;;  %v5450_v61 = vcombine.low %v849_v32, %v853_v40  ;;  %v5213_v56 = vcombine.high %v610_v63, %v614_v2  ;;  %v5212_v9 = vcombine.low %v610_v63, %v614_v2 }
  0xfd   : > { %3697 = vmatprep.subr.bf16.mxu0 %v5411_v3  ;;  %v861_v51 = vld [vmem:[#allocation8 + $0xae0] sm:$0xff]  ;;  %v5204_v3 = vcombine.low %v602_v52, %v606_v55 }
  0xfe   : > { %3800 = vmatpush1.bf16.msra.mxu1 %v5156_v20  ;;  %v865_v16 = vld [vmem:[#allocation8 + $0xb00] sm:$0xff]  ;;  %v5459_v0 = vcombine.high %v857_v50, %v861_v51  ;;  %v5458_v4 = vcombine.low %v857_v50, %v861_v51  ;;  %v618_v20 = vld [vmem:[#allocation8 + $0x348] sm:$0xff] }
  0xff   : > { %3801 = vmatprep.subr.bf16.mxu1 %v5165_v7  ;;  %v869_v59 = vld [vmem:[#allocation8 + $0xb20] sm:$0xff]  ;;  %v494_v51 = vld [vmem:[#allocation2 + $0xa8] sm:$0xff] }
 0x100   : > { %3698 = vmatpush1.bf16.msra.mxu0 %v5410_v22  ;;  %v5467_v5 = vcombine.high %v865_v16, %v869_v59  ;;  %v622_v22 = vld [vmem:[#allocation8 + $0x368] sm:$0xff]  ;;  %v873_v7 = vld [vmem:[#allocation8 + $0xb40] sm:$0xff]  ;;  %v5466_v12 = vcombine.low %v865_v16, %v869_v59  ;;  %v6629_v16 = vpack.c.bf16 %v494_v51, %v494_v51 }
 0x101   : > { %3699 = vmatprep.subr.bf16.mxu0 %v5419_v13  ;;  %v877_v8 = vld [vmem:[#allocation8 + $0xb60] sm:$0xff]  ;;  %v5221_v13 = vcombine.high %v618_v20, %v622_v22  ;;  %v5220_v18 = vcombine.low %v618_v20, %v622_v22  ;;  %v670_v20 = vld [vmem:[#allocation8 + $0x4e8] sm:$0xff] }
 0x102   : > { %3802 = vmatpush1.bf16.msra.mxu1 %v5164_v14  ;;  %v5475_v1 = vcombine.high %v873_v7, %v877_v8  ;;  %v626_v14 = vld [vmem:[#allocation8 + $0x388] sm:$0xff]  ;;  %v885_v17 = vld [vmem:[#allocation8 + $0xba0] sm:$0xff]  ;;  %v5474_v21 = vcombine.low %v873_v7, %v877_v8 }
 0x103   : > { %3803 = vmatprep.subr.bf16.mxu1 %v5173_v15  ;;  %v881_v15 = vld [vmem:[#allocation8 + $0xb80] sm:$0xff] }
 0x104   : > { %3700 = vmatpush1.bf16.msra.mxu0 %v5418_v60  ;;  %v630_v60 = vld [vmem:[#allocation8 + $0x3a8] sm:$0xff]  ;;  %v5483_v24 = vcombine.high %v881_v15, %v885_v17  ;;  %v893_v28 = vld [vmem:[#allocation8 + $0xbe0] sm:$0xff]  ;;  %v5482_v31 = vcombine.low %v881_v15, %v885_v17 }
 0x105   : > { %3701 = vmatprep.subr.bf16.mxu0 %v5427_v23  ;;  %v5229_v23 = vcombine.high %v626_v14, %v630_v60  ;;  %v5228_v30 = vcombine.low %v626_v14, %v630_v60  ;;  %v901_v32 = vld [vmem:[#allocation8 + $0xc20] sm:$0xff]  ;;  %v674_v14 = vld [vmem:[#allocation8 + $0x508] sm:$0xff] }
 0x106   : > { %3804 = vmatpush1.bf16.msra.mxu1 %v5172_v25  ;;  %v634_v25 = vld [vmem:[#allocation8 + $0x3c8] sm:$0xff]  ;;  %v909_v50 = vld [vmem:[#allocation8 + $0xc60] sm:$0xff] }
 0x107   : > { %3805 = vmatprep.subr.bf16.mxu1 %v5181_v27  ;;  %v889_v27 = vld [vmem:[#allocation8 + $0xbc0] sm:$0xff]  ;;  %v678_v60 = vld [vmem:[#allocation8 + $0x528] sm:$0xff] }
 0x108   : > { %3702 = vmatpush1.bf16.msra.mxu0 %v5426_v26  ;;  %v638_v26 = vld [vmem:[#allocation8 + $0x3e8] sm:$0xff]  ;;  %v5491_v35 = vcombine.high %v889_v27, %v893_v28  ;;  %v5490_v41 = vcombine.low %v889_v27, %v893_v28  ;;  %v913_v63 = vld [vmem:[#allocation8 + $0xc80] sm:$0xff] }
 0x109   : > { %3703 = vmatprep.subr.bf16.mxu0 %v5435_v33  ;;  %v5237_v33 = vcombine.high %v634_v25, %v638_v26  ;;  %v5236_v40 = vcombine.low %v634_v25, %v638_v26  ;;  %v921_v22 = vld [vmem:[#allocation8 + $0xcc0] sm:$0xff]  ;;  %v682_v25 = vld [vmem:[#allocation8 + $0x548] sm:$0xff] }
 0x10a   : > { %3806 = vmatpush1.bf16.msra.mxu1 %v5180_v37  ;;  %v642_v37 = vld [vmem:[#allocation8 + $0x408] sm:$0xff]  ;;  %v925_v7 = vld [vmem:[#allocation8 + $0xce0] sm:$0xff] }
 0x10b   : > { %3807 = vmatprep.subr.bf16.mxu1 %v5189_v39  ;;  %v897_v39 = vld [vmem:[#allocation8 + $0xc00] sm:$0xff]  ;;  %v686_v26 = vld [vmem:[#allocation8 + $0x568] sm:$0xff] }
 0x10c   : > { %3704 = vmatpush1.bf16.msra.mxu0 %v5434_v38  ;;  %v646_v38 = vld [vmem:[#allocation8 + $0x428] sm:$0xff]  ;;  %v5499_v45 = vcombine.high %v897_v39, %v901_v32  ;;  %v929_v15 = vld [vmem:[#allocation8 + $0xd00] sm:$0xff] }
 0x10d   : > { %3705 = vmatprep.subr.bf16.mxu0 %v5443_v43  ;;  %v5245_v43 = vcombine.high %v642_v37, %v646_v38  ;;  %v5244_v52 = vcombine.low %v642_v37, %v646_v38  ;;  %v933_v17 = vld [vmem:[#allocation8 + $0xd20] sm:$0xff]  ;;  %v690_v37 = vld [vmem:[#allocation8 + $0x588] sm:$0xff] }
 0x10e   : > { %3808 = vmatpush1.bf16.msra.mxu1 %v5188_v46  ;;  %v650_v46 = vld [vmem:[#allocation8 + $0x448] sm:$0xff]  ;;  %v937_v27 = vld [vmem:[#allocation8 + $0xd40] sm:$0xff] }
 0x10f   : > { %3809 = vmatprep.subr.bf16.mxu1 %v5197_v49  ;;  %v905_v49 = vld [vmem:[#allocation8 + $0xc40] sm:$0xff]  ;;  %v694_v38 = vld [vmem:[#allocation8 + $0x5a8] sm:$0xff] }
 0x110   : > { %3706 = vmatpush1.bf16.msra.mxu0 %v5442_v47  ;;  %v654_v47 = vld [vmem:[#allocation8 + $0x468] sm:$0xff]  ;;  %v5506_v59 = vcombine.low %v905_v49, %v909_v50  ;;  %v941_v28 = vld [vmem:[#allocation8 + $0xd60] sm:$0xff]  ;;  %v5292_v51 = vcombine.low %v690_v37, %v694_v38 }
 0x111   : > { %3707 = vmatprep.subr.bf16.mxu0 %v5451_v54  ;;  %v5498_v54 = vcombine.low %v897_v39, %v901_v32  ;;  %v5253_v55 = vcombine.high %v650_v46, %v654_v47  ;;  %v5252_v2 = vcombine.low %v650_v46, %v654_v47  ;;  %v945_v39 = vld [vmem:[#allocation8 + $0xd80] sm:$0xff]  ;;  %v698_v46 = vld [vmem:[#allocation8 + $0x5c8] sm:$0xff] }
 0x112   : > { %3810 = vmatpush1.bf16.msra.mxu1 %v5196_v57  ;;  %v5507_v57 = vcombine.high %v905_v49, %v909_v50  ;;  %v949_v32 = vld [vmem:[#allocation8 + $0xda0] sm:$0xff]  ;;  %v702_v47 = vld [vmem:[#allocation8 + $0x5e8] sm:$0xff] }
 0x113   : > { %3811 = vmatprep.subr.bf16.mxu1 %v5205_v42  ;;  %v662_v42 = vld [vmem:[#allocation8 + $0x4a8] sm:$0xff]  ;;  %v953_v49 = vld [vmem:[#allocation8 + $0xdc0] sm:$0xff] }
 0x114   : > { %3708 = vmatpush1.bf16.msra.mxu0 %v5450_v61  ;;  %v658_v61 = vld [vmem:[#allocation8 + $0x488] sm:$0xff]  ;;  %v957_v50 = vld [vmem:[#allocation8 + $0xde0] sm:$0xff] }
 0x115   : > { %3709 = vmatprep.subr.bf16.mxu0 %v5459_v0  ;;  %v917_v0 = vld [vmem:[#allocation8 + $0xca0] sm:$0xff]  ;;  %v5260_v8 = vcombine.low %v658_v61, %v662_v42 }
 0x116   : > { %3812 = vmatpush1.bf16.msra.mxu1 %v5204_v3  ;;  %v5261_v3 = vcombine.high %v658_v61, %v662_v42  ;;  %v710_v61 = vld [vmem:[#allocation8 + $0x628] sm:$0xff]  ;;  %v961_v42 = vld [vmem:[#allocation8 + $0xe00] sm:$0xff] }
 0x117   : > { %3813 = vmatprep.subr.bf16.mxu1 %v5213_v56  ;;  %v5515_v56 = vcombine.high %v913_v63, %v917_v0 }
 0x118   : > { %3710 = vmatpush1.bf16.msra.mxu0 %v5458_v4  ;;  %v493_v4 = vld [vmem:[#allocation2 + $0xa0] sm:$0xff] }
 0x119   : > { %3711 = vmatprep.subr.bf16.mxu0 %v5467_v5  ;;  %v666_v5 = vld [vmem:[#allocation8 + $0x4c8] sm:$0xff] }
 0x11a   : > { %3814 = vmatpush1.bf16.msra.mxu1 %v5212_v9  ;;  %v6635_v9 = vpack.c.bf16 %v493_v4, %v493_v4  ;;  %v714_v4 = vld [vmem:[#allocation8 + $0x648] sm:$0xff] }
 0x11b   : > { %3815 = vmatprep.subr.bf16.mxu1 %v5221_v13  ;;  %v5269_v13 = vcombine.high %v666_v5, %v670_v20 }
 0x11c   : > { %3712 = vmatpush1.bf16.msra.mxu0 %v5466_v12  ;;  %v5514_v12 = vcombine.low %v913_v63, %v917_v0  ;;  %v965_v63 = vld [vmem:[#allocation8 + $0xe20] sm:$0xff]  ;;  %v5300_v0 = vcombine.low %v698_v46, %v702_v47 }
 0x11d   : > { %3713 = vmatprep.subr.bf16.mxu0 %v5475_v1  ;;  %v5523_v1 = vcombine.high %v921_v22, %v925_v7 }
 0x11e   : > { %3816 = vmatpush1.bf16.msra.mxu1 %v5220_v18  ;;  %v5268_v18 = vcombine.low %v666_v5, %v670_v20  ;;  %v969_v5 = vld [vmem:[#allocation8 + $0xe40] sm:$0xff] }
 0x11f   : > { %3817 = vmatprep.subr.bf16.mxu1 %v5229_v23  ;;  %v5277_v23 = vcombine.high %v674_v14, %v678_v60  ;;  %v973_v20 = vld [vmem:[#allocation8 + $0xe60] sm:$0xff] }
 0x120   : > { %3714 = vmatpush1.bf16.msra.mxu0 %v5474_v21  ;;  %v5522_v21 = vcombine.low %v921_v22, %v925_v7  ;;  %v5562_v7 = vcombine.low %v961_v42, %v965_v63 }
 0x121   : > { %3715 = vmatprep.subr.bf16.mxu0 %v5483_v24  ;;  %v5531_v24 = vcombine.high %v929_v15, %v933_v17 }
 0x122   : > { %3818 = vmatpush1.bf16.msra.mxu1 %v5228_v30  ;;  %v5276_v30 = vcombine.low %v674_v14, %v678_v60  ;;  %v977_v14 = vld [vmem:[#allocation8 + $0xe80] sm:$0xff] }
 0x123   : > { %3819 = vmatprep.subr.bf16.mxu1 %v5237_v33  ;;  %v5285_v33 = vcombine.high %v682_v25, %v686_v26  ;;  %v981_v60 = vld [vmem:[#allocation8 + $0xea0] sm:$0xff] }
 0x124   : > { %3716 = vmatpush1.bf16.msra.mxu0 %v5482_v31  ;;  %v5530_v31 = vcombine.low %v929_v15, %v933_v17  ;;  %v5570_v17 = vcombine.low %v969_v5, %v973_v20 }
 0x125   : > { %3717 = vmatprep.subr.bf16.mxu0 %v5491_v35  ;;  %v5539_v35 = vcombine.high %v937_v27, %v941_v28 }
 0x126   : > { %3820 = vmatpush1.bf16.msra.mxu1 %v5236_v40  ;;  %v5284_v40 = vcombine.low %v682_v25, %v686_v26  ;;  %v985_v25 = vld [vmem:[#allocation8 + $0xec0] sm:$0xff] }
 0x127   : > { %3840 = vmatprep.subr.bf16.mxu1 %v5245_v43  ;;  %v5293_v43 = vcombine.high %v690_v37, %v694_v38  ;;  %v989_v26 = vld [vmem:[#allocation8 + $0xee0] sm:$0xff] }
 0x128   : > { %3718 = vmatpush1.bf16.msra.mxu0 %v5490_v41  ;;  %v5538_v41 = vcombine.low %v937_v27, %v941_v28  ;;  %v5578_v28 = vcombine.low %v977_v14, %v981_v60  ;;  %v993_v37 = vld [vmem:[#allocation8 + $0xf00] sm:$0xff] }
 0x129   : > { %3738 = vmatprep.subr.bf16.mxu0 %v5499_v45  ;;  %3822 = vmatmul.mubr.bf16.vlgmr.msra.gmra.mrb[8].mxu1 %v6573_v53  ;;  %v5547_v45 = vcombine.high %v945_v39, %v949_v32  ;;  %v997_v38 = vld [vmem:[#allocation8 + $0xf20] sm:$0xff] }
 0x12a   : > { %3841 = vmatpush1.bf16.msra.mxu1 %v5244_v52  ;;  %3831 = vmatprep.mubr.bf16.mxu1 %v6589_v6  ;;  %v5546_v52 = vcombine.low %v945_v39, %v949_v32  ;;  %v5586_v32 = vcombine.low %v985_v25, %v989_v26 }
 0x12b   : > { %3720 = vmatmul.mubr.bf16.vlgmr.msra.gmra.mrb[0].mxu0 %v6569_v29  ;;  %3842 = vmatprep.subr.bf16.mxu1 %v5253_v55  ;;  %v5555_v55 = vcombine.high %v953_v49, %v957_v50 }
 0x12c   : > { %3739 = vmatpush1.bf16.msra.mxu0 %v5498_v54  ;;  %3729 = vmatprep.mubr.bf16.mxu0 %v6629_v16  ;;  %v5301_v54 = vcombine.high %v698_v46, %v702_v47  ;;  %v1001_v46 = vld [vmem:[#allocation8 + $0xf40] sm:$0xff] }
 0x12d   : > { %3740 = vmatprep.subr.bf16.mxu0 %v5507_v57  ;;  %v706_v57 = vld [vmem:[#allocation8 + $0x608] sm:$0xff]  ;;  %v1005_v47 = vld [vmem:[#allocation8 + $0xf60] sm:$0xff] }
 0x12e   : > { %3843 = vmatpush1.bf16.msra.mxu1 %v5252_v2  ;;  %v5554_v2 = vcombine.low %v953_v49, %v957_v50  ;;  %v5308_v22 = vcombine.low %v706_v57, %v710_v61  ;;  %v5594_v50 = vcombine.low %v993_v37, %v997_v38 }
 0x12f   : > { %3844 = vmatprep.subr.bf16.mxu1 %v5261_v3  ;;  %v5563_v3 = vcombine.high %v961_v42, %v965_v63  ;;  %v5602_v63 = vcombine.low %v1001_v46, %v1005_v47 }
 0x130   : > { %3741 = vmatpush1.bf16.msra.mxu0 %v5506_v59  ;;  %v5309_v59 = vcombine.high %v706_v57, %v710_v61  ;;  %v1009_v57 = vld [vmem:[#allocation8 + $0xf80] sm:$0xff] }
 0x131   : > { %3742 = vmatprep.subr.bf16.mxu0 %v5515_v56  ;;  %3832 = vmatmul.mubr.bf16.gmra.mrb[12].mxu1 %v6607_v34  ;;  %v718_v56 = vld [vmem:[#allocation8 + $0x668] sm:$0xff]  ;;  %v1013_v61 = vld [vmem:[#allocation8 + $0xfa0] sm:$0xff] }
 0x132   : > { %3845 = vmatpush1.bf16.msra.mxu1 %v5260_v8  ;;  %3872 = vmatprep.mubr.bf16.mxu1 %v6536_v19  ;;  %v5317_v8 = vcombine.high %v714_v4, %v718_v56  ;;  %v5316_v15 = vcombine.low %v714_v4, %v718_v56  ;;  %v1017_v4 = vld [vmem:[#allocation8 + $0xfc0] sm:$0xff] }
 0x133   : > { %3730 = vmatmul.mubr.bf16.gmra.mrb[4].mxu0 %v6635_v9  ;;  %3846 = vmatprep.subr.bf16.mxu1 %v5269_v13  ;;  %v722_v13 = vld [vmem:[#allocation8 + $0x688] sm:$0xff]  ;;  %v1021_v56 = vld [vmem:[#allocation8 + $0xfe0] sm:$0xff] }
 0x134   : > { %3743 = vmatpush1.bf16.msra.mxu0 %v5514_v12  ;;  %3770 = vmatprep.mubr.bf16.mxu0 %v6617_v10  ;;  %v5571_v12 = vcombine.high %v969_v5, %v973_v20  ;;  %v5610_v20 = vcombine.low %v1009_v57, %v1013_v61 }
 0x135   : > { %3744 = vmatprep.subr.bf16.mxu0 %v5523_v1  ;;  %v726_v1 = vld [vmem:[#allocation8 + $0x6a8] sm:$0xff] }
 0x136   : > { %3847 = vmatpush1.bf16.msra.mxu1 %v5268_v18  ;;  %v5325_v18 = vcombine.high %v722_v13, %v726_v1  ;;  %v5324_v27 = vcombine.low %v722_v13, %v726_v1  ;;  %v515_v13 = vld [vmem:[#allocation8 + $0x10] sm:$0xff] }
 0x137   : > { %3848 = vmatprep.subr.bf16.mxu1 %v5277_v23  ;;  %v730_v23 = vld [vmem:[#allocation8 + $0x6c8] sm:$0xff]  ;;  %v519_v1 = vld [vmem:[#allocation8 + $0x30] sm:$0xff] }
 0x138   : > { %3745 = vmatpush1.bf16.msra.mxu0 %v5522_v21  ;;  %v5579_v21 = vcombine.high %v977_v14, %v981_v60  ;;  %v5618_v60 = vcombine.low %v1017_v4, %v1021_v56 }
 0x139   : > { %3746 = vmatprep.subr.bf16.mxu0 %v5531_v24  ;;  %v734_v24 = vld [vmem:[#allocation8 + $0x6e8] sm:$0xff] }
 0x13a   : > { %3849 = vmatpush1.bf16.msra.mxu1 %v5276_v30  ;;  %v5333_v30 = vcombine.high %v730_v23, %v734_v24  ;;  %v5332_v39 = vcombine.low %v730_v23, %v734_v24  ;;  %v523_v23 = vld [vmem:[#allocation8 + $0x50] sm:$0xff] }
 0x13b   : > { %3850 = vmatprep.subr.bf16.mxu1 %v5285_v33  ;;  %v738_v33 = vld [vmem:[#allocation8 + $0x708] sm:$0xff]  ;;  %v527_v24 = vld [vmem:[#allocation8 + $0x70] sm:$0xff] }
 0x13c   : > { %3747 = vmatpush1.bf16.msra.mxu0 %v5530_v31  ;;  %v5587_v31 = vcombine.high %v985_v25, %v989_v26  ;;  %v496_v25 = vld [vmem:[#allocation2 + $0xb8] sm:$0xff] }
 0x13d   : > { %3748 = vmatprep.subr.bf16.mxu0 %v5539_v35  ;;  %v742_v35 = vld [vmem:[#allocation8 + $0x728] sm:$0xff] }
 0x13e   : > { %3851 = vmatpush1.bf16.msra.mxu1 %v5284_v40  ;;  %v5341_v40 = vcombine.high %v738_v33, %v742_v35  ;;  %v5340_v49 = vcombine.low %v738_v33, %v742_v35  ;;  %v786_v33 = vld [vmem:[#allocation8 + $0x888] sm:$0xff] }
 0x13f   : > { %3852 = vmatprep.subr.bf16.mxu1 %v5293_v43  ;;  %v746_v43 = vld [vmem:[#allocation8 + $0x748] sm:$0xff] }
 0x140   : > { %3749 = vmatpush1.bf16.msra.mxu0 %v5538_v41  ;;  %v5595_v41 = vcombine.high %v993_v37, %v997_v38  ;;  %v790_v35 = vld [vmem:[#allocation8 + $0x8a8] sm:$0xff]  ;;  %v531_v37 = vld [vmem:[#allocation8 + $0x90] sm:$0xff] }
 0x141   : > { %3750 = vmatprep.subr.bf16.mxu0 %v5547_v45  ;;  %v750_v45 = vld [vmem:[#allocation8 + $0x768] sm:$0xff]  ;;  %v535_v38 = vld [vmem:[#allocation8 + $0xb0] sm:$0xff] }
 0x142   : > { %3853 = vmatpush1.bf16.msra.mxu1 %v5292_v51  ;;  %v5349_v51 = vcombine.high %v746_v43, %v750_v45  ;;  %v5348_v42 = vcombine.low %v746_v43, %v750_v45  ;;  %v5135_v43 = vcombine.high %v531_v37, %v535_v38  ;;  %v794_v45 = vld [vmem:[#allocation8 + $0x8c8] sm:$0xff] }
 0x143   : > { %3854 = vmatprep.subr.bf16.mxu1 %v5301_v54  ;;  %v754_v54 = vld [vmem:[#allocation8 + $0x788] sm:$0xff] }
 0x144   : > { %3751 = vmatpush1.bf16.msra.mxu0 %v5546_v52  ;;  %v5603_v52 = vcombine.high %v1001_v46, %v1005_v47  ;;  %v798_v46 = vld [vmem:[#allocation8 + $0x8e8] sm:$0xff]  ;;  %v539_v47 = vld [vmem:[#allocation8 + $0xd0] sm:$0xff] }
 0x145   : > { %3752 = vmatprep.subr.bf16.mxu0 %v5555_v55  ;;  %v758_v55 = vld [vmem:[#allocation8 + $0x7a8] sm:$0xff] }
 0x146   : > { %3855 = vmatpush1.bf16.msra.mxu1 %v5300_v0  ;;  %v5357_v0 = vcombine.high %v754_v54, %v758_v55  ;;  %v5356_v5 = vcombine.low %v754_v54, %v758_v55  ;;  %v5397_v54 = vcombine.high %v794_v45, %v798_v46 }
 0x147   : > { %3856 = vmatprep.subr.bf16.mxu1 %v5309_v59  ;;  %v762_v59 = vld [vmem:[#allocation8 + $0x7c8] sm:$0xff] }
 0x148   : > { %3753 = vmatpush1.bf16.msra.mxu0 %v5554_v2  ;;  %v5611_v2 = vcombine.high %v1009_v57, %v1013_v61  ;;  %v802_v57 = vld [vmem:[#allocation8 + $0x908] sm:$0xff] }
 0x149   : > { %3754 = vmatprep.subr.bf16.mxu0 %v5563_v3  ;;  %v766_v3 = vld [vmem:[#allocation8 + $0x7e8] sm:$0xff] }
 0x14a   : > { %3857 = vmatpush1.bf16.msra.mxu1 %v5308_v22  ;;  %v5365_v22 = vcombine.high %v762_v59, %v766_v3  ;;  %v5364_v14 = vcombine.low %v762_v59, %v766_v3  ;;  %v806_v61 = vld [vmem:[#allocation8 + $0x928] sm:$0xff] }
 0x14b   : > { %3858 = vmatprep.subr.bf16.mxu1 %v5317_v8  ;;  %v770_v8 = vld [vmem:[#allocation8 + $0x808] sm:$0xff]  ;;  %v5405_v59 = vcombine.high %v802_v57, %v806_v61 }
 0x14c   : > { %3755 = vmatpush1.bf16.msra.mxu0 %v5562_v7  ;;  %v5619_v7 = vcombine.high %v1017_v4, %v1021_v56  ;;  %v810_v4 = vld [vmem:[#allocation8 + $0x948] sm:$0xff] }
 0x14d   : > { %3756 = vmatprep.subr.bf16.mxu0 %v5571_v12  ;;  %v774_v12 = vld [vmem:[#allocation8 + $0x828] sm:$0xff] }
 0x14e   : > { %3859 = vmatpush1.bf16.msra.mxu1 %v5316_v15  ;;  %v5373_v15 = vcombine.high %v770_v8, %v774_v12  ;;  %v5372_v26 = vcombine.low %v770_v8, %v774_v12  ;;  %v814_v56 = vld [vmem:[#allocation8 + $0x968] sm:$0xff] }
 0x14f   : > { %3860 = vmatprep.subr.bf16.mxu1 %v5325_v18  ;;  %v778_v18 = vld [vmem:[#allocation8 + $0x848] sm:$0xff]  ;;  %v5413_v8 = vcombine.high %v810_v4, %v814_v56 }
 0x150   : > { %3757 = vmatpush1.bf16.msra.mxu0 %v5570_v17  ;;  %v5119_v17 = vcombine.high %v515_v13, %v519_v1 }
 0x151   : > { %3758 = vmatprep.subr.bf16.mxu0 %v5579_v21  ;;  %v782_v21 = vld [vmem:[#allocation8 + $0x868] sm:$0xff] }
 0x152   : > { %3861 = vmatpush1.bf16.msra.mxu1 %v5324_v27  ;;  %v5118_v27 = vcombine.low %v515_v13, %v519_v1  ;;  %v818_v13 = vld [vmem:[#allocation8 + $0x988] sm:$0xff] }
 0x153   : > { %3862 = vmatprep.subr.bf16.mxu1 %v5333_v30  ;;  %v5127_v30 = vcombine.high %v523_v23, %v527_v24  ;;  %v822_v1 = vld [vmem:[#allocation8 + $0x9a8] sm:$0xff] }
 0x154   : > { %3759 = vmatpush1.bf16.msra.mxu0 %v5578_v28  ;;  %v5381_v28 = vcombine.high %v778_v18, %v782_v21 }
 0x155   : > { %3760 = vmatprep.subr.bf16.mxu0 %v5587_v31  ;;  %v6641_v31 = vpack.c.bf16 %v496_v25, %v496_v25  ;;  %v571_v25 = vld [vmem:[#allocation8 + $0x1d0] sm:$0xff] }
 0x156   : > { %3863 = vmatpush1.bf16.msra.mxu1 %v5332_v39  ;;  %v5380_v39 = vcombine.low %v778_v18, %v782_v21  ;;  %v5421_v18 = vcombine.high %v818_v13, %v822_v1 }
 0x157   : > { %3864 = vmatprep.subr.bf16.mxu1 %v5341_v40  ;;  %v495_v40 = vld [vmem:[#allocation2 + $0xb0] sm:$0xff] }
 0x158   : > { %3761 = vmatpush1.bf16.msra.mxu0 %v5586_v32  ;;  %v5126_v32 = vcombine.low %v523_v23, %v527_v24  ;;  %v826_v23 = vld [vmem:[#allocation8 + $0x9c8] sm:$0xff] }
 0x159   : > { %3762 = vmatprep.subr.bf16.mxu0 %v5595_v41  ;;  %v5389_v41 = vcombine.high %v786_v33, %v790_v35  ;;  %v830_v24 = vld [vmem:[#allocation8 + $0x9e8] sm:$0xff] }
 0x15a   : > { %3865 = vmatpush1.bf16.msra.mxu1 %v5340_v49  ;;  %v543_v49 = vld [vmem:[#allocation8 + $0xf0] sm:$0xff] }
 0x15b   : > { %3866 = vmatprep.subr.bf16.mxu1 %v5349_v51  ;;  %v5388_v51 = vcombine.low %v786_v33, %v790_v35  ;;  %v5143_v55 = vcombine.high %v539_v47, %v543_v49  ;;  %v834_v35 = vld [vmem:[#allocation8 + $0xa08] sm:$0xff] }
 0x15c   : > { %3763 = vmatpush1.bf16.msra.mxu0 %v5594_v50  ;;  %v6647_v50 = vpack.c.bf16 %v495_v40, %v495_v40 }
 0x15d   : > { %3764 = vmatprep.subr.bf16.mxu0 %v5603_v52  ;;  %v5134_v52 = vcombine.low %v531_v37, %v535_v38  ;;  %v838_v37 = vld [vmem:[#allocation8 + $0xa28] sm:$0xff]  ;;  %v579_v38 = vld [vmem:[#allocation8 + $0x210] sm:$0xff] }
 0x15e   : > { %3867 = vmatpush1.bf16.msra.mxu1 %v5348_v42  ;;  %v547_v42 = vld [vmem:[#allocation8 + $0x110] sm:$0xff] }
 0x15f   : > { %3868 = vmatprep.subr.bf16.mxu1 %v5357_v0  ;;  %v5396_v0 = vcombine.low %v794_v45, %v798_v46  ;;  %v842_v45 = vld [vmem:[#allocation8 + $0xa48] sm:$0xff] }
 0x160   : > { %3765 = vmatpush1.bf16.msra.mxu0 %v5602_v63  ;;  %v551_v63 = vld [vmem:[#allocation8 + $0x130] sm:$0xff]  ;;  %v846_v46 = vld [vmem:[#allocation8 + $0xa68] sm:$0xff] }
 0x161   : > { %3766 = vmatprep.subr.bf16.mxu0 %v5611_v2  ;;  %v5142_v2 = vcombine.low %v539_v47, %v543_v49  ;;  %v5151_v3 = vcombine.high %v547_v42, %v551_v63  ;;  %v587_v47 = vld [vmem:[#allocation8 + $0x250] sm:$0xff] }
 0x162   : > { %3869 = vmatpush1.bf16.msra.mxu1 %v5356_v5  ;;  %v555_v5 = vld [vmem:[#allocation8 + $0x150] sm:$0xff] }
 0x163   : > { %3870 = vmatprep.subr.bf16.mxu1 %v5365_v22  ;;  %v5404_v22 = vcombine.low %v802_v57, %v806_v61  ;;  %v591_v49 = vld [vmem:[#allocation8 + $0x270] sm:$0xff]  ;;  %v850_v57 = vld [vmem:[#allocation8 + $0xa88] sm:$0xff] }
 0x164   : > { %3767 = vmatpush1.bf16.msra.mxu0 %v5610_v20  ;;  %v559_v20 = vld [vmem:[#allocation8 + $0x170] sm:$0xff]  ;;  %v854_v61 = vld [vmem:[#allocation8 + $0xaa8] sm:$0xff] }
 0x165   : > { %3768 = vmatprep.subr.bf16.mxu0 %v5619_v7  ;;  %v5150_v7 = vcombine.low %v547_v42, %v551_v63  ;;  %v5159_v12 = vcombine.high %v555_v5, %v559_v20  ;;  %v595_v42 = vld [vmem:[#allocation8 + $0x290] sm:$0xff] }
 0x166   : > { %3871 = vmatpush1.bf16.msra.mxu1 %v5364_v14  ;;  %v563_v14 = vld [vmem:[#allocation8 + $0x190] sm:$0xff] }
 0x167   : > { %3891 = vmatprep.subr.bf16.mxu1 %v5373_v15  ;;  %v5412_v15 = vcombine.low %v810_v4, %v814_v56  ;;  %v599_v63 = vld [vmem:[#allocation8 + $0x2b0] sm:$0xff]  ;;  %v858_v4 = vld [vmem:[#allocation8 + $0xac8] sm:$0xff] }
 0x168   : > { %3769 = vmatpush1.bf16.msra.mxu0 %v5618_v60  ;;  %v567_v60 = vld [vmem:[#allocation8 + $0x1b0] sm:$0xff]  ;;  %v862_v56 = vld [vmem:[#allocation8 + $0xae8] sm:$0xff] }
 0x169   : > { %3993 = vmatprep.subr.bf16.mxu0 %v5119_v17  ;;  %3873 = vmatmul.mubr.bf16.vlgmr.msra.gmra.mrb[8].mxu1 %v6580_v62  ;;  %v5158_v17 = vcombine.low %v555_v5, %v559_v20  ;;  %v5167_v21 = vcombine.high %v563_v14, %v567_v60  ;;  %v603_v5 = vld [vmem:[#allocation8 + $0x2d0] sm:$0xff] }
 0x16a   : > { %3892 = vmatpush1.bf16.msra.mxu1 %v5372_v26  ;;  %3882 = vmatprep.mubr.bf16.mxu1 %v6594_v11  ;;  %v575_v26 = vld [vmem:[#allocation8 + $0x1f0] sm:$0xff] }
 0x16b   : > { %3771 = vmatmul.mubr.bf16.vlgmr.msra.gmra.mrb[0].mxu0 %v6619_v44  ;;  %3893 = vmatprep.subr.bf16.mxu1 %v5381_v28  ;;  %v5166_v28 = vcombine.low %v563_v14, %v567_v60  ;;  %v5175_v33 = vcombine.high %v571_v25, %v575_v26  ;;  %v5174_v40 = vcombine.low %v571_v25, %v575_v26  ;;  %v607_v20 = vld [vmem:[#allocation8 + $0x2f0] sm:$0xff] }
 0x16c   : > { %3994 = vmatpush1.bf16.msra.mxu0 %v5118_v27  ;;  %3780 = vmatprep.mubr.bf16.mxu0 %v6641_v31  ;;  %v5420_v27 = vcombine.low %v818_v13, %v822_v1  ;;  %v866_v13 = vld [vmem:[#allocation8 + $0xb08] sm:$0xff]  ;;  %v611_v14 = vld [vmem:[#allocation8 + $0x310] sm:$0xff] }
 0x16d   : > { %3995 = vmatprep.subr.bf16.mxu0 %v5127_v30  ;;  %v5429_v30 = vcombine.high %v826_v23, %v830_v24  ;;  %v870_v1 = vld [vmem:[#allocation8 + $0xb28] sm:$0xff]  ;;  %v615_v60 = vld [vmem:[#allocation8 + $0x330] sm:$0xff] }
 0x16e   : > { %3894 = vmatpush1.bf16.msra.mxu1 %v5380_v39  ;;  %v583_v39 = vld [vmem:[#allocation8 + $0x230] sm:$0xff] }
 0x16f   : > { %3895 = vmatprep.subr.bf16.mxu1 %v5389_v41  ;;  %v5437_v41 = vcombine.high %v834_v35, %v838_v37  ;;  %v619_v25 = vld [vmem:[#allocation8 + $0x350] sm:$0xff] }
 0x170   : > { %3996 = vmatpush1.bf16.msra.mxu0 %v5126_v32  ;;  %v5428_v32 = vcombine.low %v826_v23, %v830_v24  ;;  %v874_v23 = vld [vmem:[#allocation8 + $0xb48] sm:$0xff]  ;;  %v623_v26 = vld [vmem:[#allocation8 + $0x370] sm:$0xff] }
 0x171   : > { %3997 = vmatprep.subr.bf16.mxu0 %v5135_v43  ;;  %3883 = vmatmul.mubr.bf16.gmra.mrb[12].mxu1 %v6611_v36  ;;  %v5183_v43 = vcombine.high %v579_v38, %v583_v39  ;;  %v878_v24 = vld [vmem:[#allocation8 + $0xb68] sm:$0xff] }
 0x172   : > { %3896 = vmatpush1.bf16.msra.mxu1 %v5388_v51  ;;  %3923 = vmatprep.mubr.bf16.mxu1 %v6623_v48  ;;  %v5436_v51 = vcombine.low %v834_v35, %v838_v37  ;;  %v882_v35 = vld [vmem:[#allocation8 + $0xb88] sm:$0xff] }
 0x173   : > { %3781 = vmatmul.mubr.bf16.gmra.mrb[4].mxu0 %v6647_v50  ;;  %3897 = vmatprep.subr.bf16.mxu1 %v5397_v54  ;;  %v5445_v54 = vcombine.high %v842_v45, %v846_v46  ;;  %v886_v37 = vld [vmem:[#allocation8 + $0xba8] sm:$0xff] }
 0x174   : > { %3998 = vmatpush1.bf16.msra.mxu0 %v5134_v52  ;;  %4025 = vmatprep.mubr.bf16.mxu0 %v6512_v58  ;;  %v5182_v52 = vcombine.low %v579_v38, %v583_v39  ;;  %v627_v38 = vld [vmem:[#allocation8 + $0x390] sm:$0xff] }
 0x175   : > { %3999 = vmatprep.subr.bf16.mxu0 %v5143_v55  ;;  %v5191_v55 = vcombine.high %v587_v47, %v591_v49  ;;  %v631_v39 = vld [vmem:[#allocation8 + $0x3b0] sm:$0xff] }
 0x176   : > { %3898 = vmatpush1.bf16.msra.mxu1 %v5396_v0  ;;  %v5444_v0 = vcombine.low %v842_v45, %v846_v46  ;;  %v890_v45 = vld [vmem:[#allocation8 + $0xbc8] sm:$0xff] }
 0x177   : > { %3899 = vmatprep.subr.bf16.mxu1 %v5405_v59  ;;  %v5453_v59 = vcombine.high %v850_v57, %v854_v61  ;;  %v894_v46 = vld [vmem:[#allocation8 + $0xbe8] sm:$0xff] }
 0x178   : > { %4000 = vmatpush1.bf16.msra.mxu0 %v5142_v2  ;;  %v5190_v2 = vcombine.low %v587_v47, %v591_v49  ;;  %v635_v47 = vld [vmem:[#allocation8 + $0x3d0] sm:$0xff] }
 0x179   : > { %4001 = vmatprep.subr.bf16.mxu0 %v5151_v3  ;;  %v5199_v3 = vcombine.high %v595_v42, %v599_v63  ;;  %v639_v49 = vld [vmem:[#allocation8 + $0x3f0] sm:$0xff] }
 0x17a   : > { %3900 = vmatpush1.bf16.msra.mxu1 %v5404_v22  ;;  %v5452_v22 = vcombine.low %v850_v57, %v854_v61  ;;  %v898_v57 = vld [vmem:[#allocation8 + $0xc08] sm:$0xff] }
 0x17b   : > { %3901 = vmatprep.subr.bf16.mxu1 %v5413_v8  ;;  %v5461_v8 = vcombine.high %v858_v4, %v862_v56  ;;  %v902_v61 = vld [vmem:[#allocation8 + $0xc28] sm:$0xff] }
 0x17c   : > { %4002 = vmatpush1.bf16.msra.mxu0 %v5150_v7  ;;  %v5198_v7 = vcombine.low %v595_v42, %v599_v63  ;;  %v643_v42 = vld [vmem:[#allocation8 + $0x410] sm:$0xff] }
 0x17d   : > { %4003 = vmatprep.subr.bf16.mxu0 %v5159_v12  ;;  %v5207_v12 = vcombine.high %v603_v5, %v607_v20  ;;  %v647_v63 = vld [vmem:[#allocation8 + $0x430] sm:$0xff] }
 0x17e   : > { %3902 = vmatpush1.bf16.msra.mxu1 %v5412_v15  ;;  %v5460_v15 = vcombine.low %v858_v4, %v862_v56  ;;  %v906_v4 = vld [vmem:[#allocation8 + $0xc48] sm:$0xff] }
 0x17f   : > { %3903 = vmatprep.subr.bf16.mxu1 %v5421_v18  ;;  %v5469_v18 = vcombine.high %v866_v13, %v870_v1  ;;  %v910_v56 = vld [vmem:[#allocation8 + $0xc68] sm:$0xff] }
 0x180   : > { %4004 = vmatpush1.bf16.msra.mxu0 %v5158_v17  ;;  %v5206_v17 = vcombine.low %v603_v5, %v607_v20  ;;  %v651_v5 = vld [vmem:[#allocation8 + $0x450] sm:$0xff] }
 0x181   : > { %4005 = vmatprep.subr.bf16.mxu0 %v5167_v21  ;;  %v5215_v21 = vcombine.high %v611_v14, %v615_v60  ;;  %v655_v20 = vld [vmem:[#allocation8 + $0x470] sm:$0xff] }
 0x182   : > { %3904 = vmatpush1.bf16.msra.mxu1 %v5420_v27  ;;  %v5468_v27 = vcombine.low %v866_v13, %v870_v1  ;;  %v914_v13 = vld [vmem:[#allocation8 + $0xc88] sm:$0xff] }
 0x183   : > { %3905 = vmatprep.subr.bf16.mxu1 %v5429_v30  ;;  %v5477_v30 = vcombine.high %v874_v23, %v878_v24  ;;  %v918_v1 = vld [vmem:[#allocation8 + $0xca8] sm:$0xff] }
 0x184   : > { %4006 = vmatpush1.bf16.msra.mxu0 %v5166_v28  ;;  %v5214_v28 = vcombine.low %v611_v14, %v615_v60  ;;  %v659_v14 = vld [vmem:[#allocation8 + $0x490] sm:$0xff] }
 0x185   : > { %4007 = vmatprep.subr.bf16.mxu0 %v5175_v33  ;;  %v5223_v33 = vcombine.high %v619_v25, %v623_v26  ;;  %v663_v60 = vld [vmem:[#allocation8 + $0x4b0] sm:$0xff] }
 0x186   : > { %3906 = vmatpush1.bf16.msra.mxu1 %v5428_v32  ;;  %v5476_v32 = vcombine.low %v874_v23, %v878_v24  ;;  %v922_v23 = vld [vmem:[#allocation8 + $0xcc8] sm:$0xff] }
 0x187   : > { %3907 = vmatprep.subr.bf16.mxu1 %v5437_v41  ;;  %v5485_v41 = vcombine.high %v882_v35, %v886_v37  ;;  %v926_v24 = vld [vmem:[#allocation8 + $0xce8] sm:$0xff] }
 0x188   : > { %4008 = vmatpush1.bf16.msra.mxu0 %v5174_v40  ;;  %v5222_v40 = vcombine.low %v619_v25, %v623_v26  ;;  %v667_v25 = vld [vmem:[#allocation8 + $0x4d0] sm:$0xff] }
 0x189   : > { %4009 = vmatprep.subr.bf16.mxu0 %v5183_v43  ;;  %v5231_v43 = vcombine.high %v627_v38, %v631_v39  ;;  %v671_v26 = vld [vmem:[#allocation8 + $0x4f0] sm:$0xff] }
 0x18a   : > { %3908 = vmatpush1.bf16.msra.mxu1 %v5436_v51  ;;  %v5484_v51 = vcombine.low %v882_v35, %v886_v37  ;;  %v930_v35 = vld [vmem:[#allocation8 + $0xd08] sm:$0xff] }
 0x18b   : > { %3909 = vmatprep.subr.bf16.mxu1 %v5445_v54  ;;  %v5493_v54 = vcombine.high %v890_v45, %v894_v46  ;;  %v934_v37 = vld [vmem:[#allocation8 + $0xd28] sm:$0xff] }
 0x18c   : > { %4010 = vmatpush1.bf16.msra.mxu0 %v5182_v52  ;;  %v5230_v52 = vcombine.low %v627_v38, %v631_v39  ;;  %v675_v38 = vld [vmem:[#allocation8 + $0x510] sm:$0xff] }
 0x18d   : > { %4011 = vmatprep.subr.bf16.mxu0 %v5191_v55  ;;  %v5239_v55 = vcombine.high %v635_v47, %v639_v49  ;;  %v679_v39 = vld [vmem:[#allocation8 + $0x530] sm:$0xff] }
 0x18e   : > { %3910 = vmatpush1.bf16.msra.mxu1 %v5444_v0  ;;  %v5492_v0 = vcombine.low %v890_v45, %v894_v46  ;;  %v938_v45 = vld [vmem:[#allocation8 + $0xd48] sm:$0xff] }
 0x18f   : > { %3911 = vmatprep.subr.bf16.mxu1 %v5453_v59  ;;  %v5501_v59 = vcombine.high %v898_v57, %v902_v61  ;;  %v942_v46 = vld [vmem:[#allocation8 + $0xd68] sm:$0xff] }
 0x190   : > { %4012 = vmatpush1.bf16.msra.mxu0 %v5190_v2  ;;  %v5238_v2 = vcombine.low %v635_v47, %v639_v49  ;;  %v683_v47 = vld [vmem:[#allocation8 + $0x550] sm:$0xff] }
 0x191   : > { %4013 = vmatprep.subr.bf16.mxu0 %v5199_v3  ;;  %v5247_v3 = vcombine.high %v643_v42, %v647_v63  ;;  %v687_v49 = vld [vmem:[#allocation8 + $0x570] sm:$0xff] }
 0x192   : > { %3912 = vmatpush1.bf16.msra.mxu1 %v5452_v22  ;;  %v5500_v22 = vcombine.low %v898_v57, %v902_v61  ;;  %v946_v57 = vld [vmem:[#allocation8 + $0xd88] sm:$0xff] }
 0x193   : > { %3913 = vmatprep.subr.bf16.mxu1 %v5461_v8  ;;  %v5509_v8 = vcombine.high %v906_v4, %v910_v56  ;;  %v950_v61 = vld [vmem:[#allocation8 + $0xda8] sm:$0xff] }
 0x194   : > { %4014 = vmatpush1.bf16.msra.mxu0 %v5198_v7  ;;  %v5246_v7 = vcombine.low %v643_v42, %v647_v63  ;;  %v691_v42 = vld [vmem:[#allocation8 + $0x590] sm:$0xff] }
 0x195   : > { %4015 = vmatprep.subr.bf16.mxu0 %v5207_v12  ;;  %v5255_v12 = vcombine.high %v651_v5, %v655_v20  ;;  %v695_v63 = vld [vmem:[#allocation8 + $0x5b0] sm:$0xff] }
 0x196   : > { %3914 = vmatpush1.bf16.msra.mxu1 %v5460_v15  ;;  %v5508_v15 = vcombine.low %v906_v4, %v910_v56  ;;  %v5295_v4 = vcombine.high %v691_v42, %v695_v63  ;;  %v954_v56 = vld [vmem:[#allocation8 + $0xdc8] sm:$0xff] }
 0x197   : > { %3915 = vmatprep.subr.bf16.mxu1 %v5469_v18  ;;  %v5517_v18 = vcombine.high %v914_v13, %v918_v1 }
 0x198   : > { %4016 = vmatpush1.bf16.msra.mxu0 %v5206_v17  ;;  %v5254_v17 = vcombine.low %v651_v5, %v655_v20  ;;  %v958_v5 = vld [vmem:[#allocation8 + $0xde8] sm:$0xff] }
 0x199   : > { %4017 = vmatprep.subr.bf16.mxu0 %v5215_v21  ;;  %v5263_v21 = vcombine.high %v659_v14, %v663_v60 }
 0x19a   : > { %3916 = vmatpush1.bf16.msra.mxu1 %v5468_v27  ;;  %v5516_v27 = vcombine.low %v914_v13, %v918_v1  ;;  %v5294_v1 = vcombine.low %v691_v42, %v695_v63  ;;  %v731_v42 = vld [vmem:[#allocation8 + $0x6d0] sm:$0xff] }
 0x19b   : > { %3917 = vmatprep.subr.bf16.mxu1 %v5477_v30  ;;  %v5525_v30 = vcombine.high %v922_v23, %v926_v24  ;;  %v735_v63 = vld [vmem:[#allocation8 + $0x6f0] sm:$0xff] }
 0x19c   : > { %4018 = vmatpush1.bf16.msra.mxu0 %v5214_v28  ;;  %v5262_v28 = vcombine.low %v659_v14, %v663_v60  ;;  %v5557_v14 = vcombine.high %v954_v56, %v958_v5 }
 0x19d   : > { %4019 = vmatprep.subr.bf16.mxu0 %v5223_v33  ;;  %v5271_v33 = vcombine.high %v667_v25, %v671_v26 }
 0x19e   : > { %3918 = vmatpush1.bf16.msra.mxu1 %v5476_v32  ;;  %v5524_v32 = vcombine.low %v922_v23, %v926_v24  ;;  %v5556_v23 = vcombine.low %v954_v56, %v958_v5  ;;  %v994_v56 = vld [vmem:[#allocation8 + $0xf08] sm:$0xff] }
 0x19f   : > { %3919 = vmatprep.subr.bf16.mxu1 %v5485_v41  ;;  %v5533_v41 = vcombine.high %v930_v35, %v934_v37  ;;  %v998_v5 = vld [vmem:[#allocation8 + $0xf28] sm:$0xff] }
 0x1a0   : > { %4020 = vmatpush1.bf16.msra.mxu0 %v5222_v40  ;;  %v5270_v40 = vcombine.low %v667_v25, %v671_v26 }
 0x1a1   : > { %4021 = vmatprep.subr.bf16.mxu0 %v5231_v43  ;;  %v5279_v43 = vcombine.high %v675_v38, %v679_v39 }
 0x1a2   : > { %3920 = vmatpush1.bf16.msra.mxu1 %v5484_v51  ;;  %v5532_v51 = vcombine.low %v930_v35, %v934_v37  ;;  %v719_v35 = vld [vmem:[#allocation8 + $0x670] sm:$0xff] }
 0x1a3   : > { %3921 = vmatprep.subr.bf16.mxu1 %v5493_v54  ;;  %v5541_v54 = vcombine.high %v938_v45, %v942_v46 }
 0x1a4   : > { %4022 = vmatpush1.bf16.msra.mxu0 %v5230_v52  ;;  %v5278_v52 = vcombine.low %v675_v38, %v679_v39 }
 0x1a5   : > { %4023 = vmatprep.subr.bf16.mxu0 %v5239_v55  ;;  %v5287_v55 = vcombine.high %v683_v47, %v687_v49 }
 0x1a6   : > { %3922 = vmatpush1.bf16.msra.mxu1 %v5492_v0  ;;  %v5540_v0 = vcombine.low %v938_v45, %v942_v46  ;;  %v978_v45 = vld [vmem:[#allocation8 + $0xe88] sm:$0xff] }
 0x1a7   : > { %3942 = vmatprep.subr.bf16.mxu1 %v5501_v59  ;;  %v5549_v59 = vcombine.high %v946_v57, %v950_v61  ;;  %v982_v46 = vld [vmem:[#allocation8 + $0xea8] sm:$0xff] }
 0x1a8   : > { %4024 = vmatpush1.bf16.msra.mxu0 %v5238_v2  ;;  %v5286_v2 = vcombine.low %v683_v47, %v687_v49  ;;  %v723_v47 = vld [vmem:[#allocation8 + $0x690] sm:$0xff] }
 0x1a9   : > { %4044 = vmatprep.subr.bf16.mxu0 %v5247_v3  ;;  %3924 = vmatmul.mubr.bf16.vlgmr.msra.gmra.mrb[8].mxu1 %v6569_v29  ;;  %v727_v49 = vld [vmem:[#allocation8 + $0x6b0] sm:$0xff] }
 0x1aa   : > { %3943 = vmatpush1.bf16.msra.mxu1 %v5500_v22  ;;  %3933 = vmatprep.mubr.bf16.mxu1 %v6629_v16  ;;  %v699_v22 = vld [vmem:[#allocation8 + $0x5d0] sm:$0xff] }
 0x1ab   : > { %4026 = vmatmul.mubr.bf16.vlgmr.msra.gmra.mrb[8].mxu0 %v6573_v53  ;;  %3944 = vmatprep.subr.bf16.mxu1 %v5509_v8 }
 0x1ac   : > { %4045 = vmatpush1.bf16.msra.mxu0 %v5246_v7  ;;  %4035 = vmatprep.mubr.bf16.mxu0 %v6589_v6  ;;  %v703_v7 = vld [vmem:[#allocation8 + $0x5f0] sm:$0xff] }
 0x1ad   : > { %4046 = vmatprep.subr.bf16.mxu0 %v5255_v12  ;;  %v5548_v12 = vcombine.low %v946_v57, %v950_v61  ;;  %v5303_v60 = vcombine.high %v699_v22, %v703_v7  ;;  %v5302_v24 = vcombine.low %v699_v22, %v703_v7  ;;  %v986_v57 = vld [vmem:[#allocation8 + $0xec8] sm:$0xff]  ;;  %v739_v22 = vld [vmem:[#allocation8 + $0x710] sm:$0xff] }
 0x1ae   : > { %3945 = vmatpush1.bf16.msra.mxu1 %v5508_v15  ;;  %v962_v15 = vld [vmem:[#allocation8 + $0xe08] sm:$0xff]  ;;  %v743_v7 = vld [vmem:[#allocation8 + $0x730] sm:$0xff] }
 0x1af   : > { %3946 = vmatprep.subr.bf16.mxu1 %v5517_v18  ;;  %v707_v18 = vld [vmem:[#allocation8 + $0x610] sm:$0xff]  ;;  %v990_v61 = vld [vmem:[#allocation8 + $0xee8] sm:$0xff] }
 0x1b0   : > { %4047 = vmatpush1.bf16.msra.mxu0 %v5254_v17  ;;  %v966_v17 = vld [vmem:[#allocation8 + $0xe28] sm:$0xff] }
 0x1b1   : > { %4048 = vmatprep.subr.bf16.mxu0 %v5263_v21  ;;  %3934 = vmatmul.mubr.bf16.gmra.mrb[12].mxu1 %v6635_v9  ;;  %v711_v21 = vld [vmem:[#allocation8 + $0x630] sm:$0xff]  ;;  %v5565_v25 = vcombine.high %v962_v15, %v966_v17  ;;  %v5564_v38 = vcombine.low %v962_v15, %v966_v17  ;;  %v1002_v15 = vld [vmem:[#allocation8 + $0xf48] sm:$0xff] }
 0x1b2   : > { %3947 = vmatpush1.bf16.msra.mxu1 %v5516_v27  ;;  %3974 = vmatprep.mubr.bf16.mxu1 %v6617_v10  ;;  %v5311_v26 = vcombine.high %v707_v18, %v711_v21  ;;  %v970_v27 = vld [vmem:[#allocation8 + $0xe48] sm:$0xff] }
 0x1b3   : > { %4036 = vmatmul.mubr.bf16.gmra.mrb[12].mxu0 %v6607_v34  ;;  %3948 = vmatprep.subr.bf16.mxu1 %v5525_v30  ;;  %v1006_v17 = vld [vmem:[#allocation8 + $0xf68] sm:$0xff] }
 0x1b4   : > { %4049 = vmatpush1.bf16.msra.mxu0 %v5262_v28  ;;  %4076 = vmatprep.mubr.bf16.mxu0 %v6536_v19  ;;  %v974_v28 = vld [vmem:[#allocation8 + $0xe68] sm:$0xff] }
 0x1b5   : > { %4050 = vmatprep.subr.bf16.mxu0 %v5271_v33  ;;  %v715_v33 = vld [vmem:[#allocation8 + $0x650] sm:$0xff] }
 0x1b6   : > { %3949 = vmatpush1.bf16.msra.mxu1 %v5524_v32  ;;  %v5310_v32 = vcombine.low %v707_v18, %v711_v21  ;;  %v747_v18 = vld [vmem:[#allocation8 + $0x750] sm:$0xff] }
 0x1b7   : > { %3950 = vmatprep.subr.bf16.mxu1 %v5533_v41  ;;  %v751_v21 = vld [vmem:[#allocation8 + $0x770] sm:$0xff] }
 0x1b8   : > { %4051 = vmatpush1.bf16.msra.mxu0 %v5270_v40  ;;  %v5573_v40 = vcombine.high %v970_v27, %v974_v28 }
 0x1b9   : > { %4052 = vmatprep.subr.bf16.mxu0 %v5279_v43  ;;  %v5319_v43 = vcombine.high %v715_v33, %v719_v35 }
 0x1ba   : > { %3951 = vmatpush1.bf16.msra.mxu1 %v5532_v51  ;;  %v5572_v51 = vcombine.low %v970_v27, %v974_v28  ;;  %v1010_v27 = vld [vmem:[#allocation8 + $0xf88] sm:$0xff] }
 0x1bb   : > { %3952 = vmatprep.subr.bf16.mxu1 %v5541_v54  ;;  %v5581_v54 = vcombine.high %v978_v45, %v982_v46  ;;  %v1014_v28 = vld [vmem:[#allocation8 + $0xfa8] sm:$0xff] }
 0x1bc   : > { %4053 = vmatpush1.bf16.msra.mxu0 %v5278_v52  ;;  %v6661_v3 = vpop.f32.mrb[0].mxu1  ;;  %v5318_v52 = vcombine.low %v715_v33, %v719_v35  ;;  %v755_v33 = vld [vmem:[#allocation8 + $0x790] sm:$0xff] }
 0x1bd   : > { %4054 = vmatprep.subr.bf16.mxu0 %v5287_v55  ;;  %v6663_v20 = vpop.f32.mrb[1].mxu1  ;;  %v5327_v55 = vcombine.high %v723_v47, %v727_v49  ;;  %v759_v35 = vld [vmem:[#allocation8 + $0x7b0] sm:$0xff] }
 0x1be   : > { %v6665_v8 = vpop.f32.mrb[2].mxu1  ;;  %3953 = vmatpush1.bf16.msra.mxu1 %v5540_v0  ;;  %v5580_v0 = vcombine.low %v978_v45, %v982_v46  ;;  %v763_v45 = vld [vmem:[#allocation8 + $0x7d0] sm:$0xff] }
 0x1bf   : > { %v6667_v13 = vpop.f32.mrb[3].mxu1  ;;  %3954 = vmatprep.subr.bf16.mxu1 %v5549_v59  ;;  %v5589_v59 = vcombine.high %v986_v57, %v990_v61  ;;  %v767_v46 = vld [vmem:[#allocation8 + $0x7f0] sm:$0xff] }
 0x1c0   : > { %4055 = vmatpush1.bf16.msra.mxu0 %v5286_v2  ;;  %v5326_v2 = vcombine.low %v723_v47, %v727_v49  ;;  %v5612_v47 = vcombine.low %v1010_v27, %v1014_v28  ;;  %v5358_v49 = vcombine.low %v755_v33, %v759_v35 }
 0x1c1   : > { %4056 = vmatprep.subr.bf16.mxu0 %v5295_v4  ;;  %v5335_v4 = vcombine.high %v731_v42, %v735_v63 }
 0x1c2   : > { %3955 = vmatpush1.bf16.msra.mxu1 %v5548_v12  ;;  %v5588_v12 = vcombine.low %v986_v57, %v990_v61  ;;  %v771_v57 = vld [vmem:[#allocation8 + $0x810] sm:$0xff] }
 0x1c3   : > { %3956 = vmatprep.subr.bf16.mxu1 %v5557_v14  ;;  %v5597_v14 = vcombine.high %v994_v56, %v998_v5  ;;  %v775_v61 = vld [vmem:[#allocation8 + $0x830] sm:$0xff] }
 0x1c4   : > { %4057 = vmatpush1.bf16.msra.mxu0 %v5294_v1  ;;  %v6669_v30 = vpop.f32.mrb[4].mxu1  ;;  %v5334_v1 = vcombine.low %v731_v42, %v735_v63  ;;  %v5366_v63 = vcombine.low %v763_v45, %v767_v46 }
 0x1c5   : > { %4058 = vmatprep.subr.bf16.mxu0 %v5303_v60  ;;  %v6671_v37 = vpop.f32.mrb[5].mxu1  ;;  %v5343_v60 = vcombine.high %v739_v22, %v743_v7 }
 0x1c6   : > { %3957 = vmatpush1.bf16.msra.mxu1 %v5556_v23  ;;  %v3633_v39 = vpop.f32.mrb[6].mxu1  ;;  %v5596_v23 = vcombine.low %v994_v56, %v998_v5  ;;  %v779_v56 = vld [vmem:[#allocation8 + $0x850] sm:$0xff] }
 0x1c7   : > { %3958 = vmatprep.subr.bf16.mxu1 %v5565_v25  ;;  %v3634_v41 = vpop.f32.mrb[7].mxu1  ;;  %v5605_v25 = vcombine.high %v1002_v15, %v1006_v17  ;;  %v5350_v39 = vcombine.low %v747_v18, %v751_v21  ;;  %v783_v5 = vld [vmem:[#allocation8 + $0x870] sm:$0xff] }
 0x1c8   : > { %4059 = vmatpush1.bf16.msra.mxu0 %v5302_v24  ;;  %v5342_v24 = vcombine.low %v739_v22, %v743_v7  ;;  %v1018_v41 = vld [vmem:[#allocation8 + $0xfc8] sm:$0xff]  ;;  %v5374_v7 = vcombine.low %v771_v57, %v775_v61 }
 0x1c9   : > { %4060 = vmatprep.subr.bf16.mxu0 %v5311_v26  ;;  %v5351_v26 = vcombine.high %v747_v18, %v751_v21  ;;  %v5382_v21 = vcombine.low %v779_v56, %v783_v5 }
 0x1ca   : > { %3959 = vmatpush1.bf16.msra.mxu1 %v5564_v38  ;;  %v5604_v38 = vcombine.low %v1002_v15, %v1006_v17  ;;  %v787_v15 = vld [vmem:[#allocation8 + $0x890] sm:$0xff] }
 0x1cb   : > { %3960 = vmatprep.subr.bf16.mxu1 %v5573_v40  ;;  %v5359_v40 = vcombine.high %v755_v33, %v759_v35  ;;  %v791_v17 = vld [vmem:[#allocation8 + $0x8b0] sm:$0xff] }
 0x1cc   : > { %4061 = vmatpush1.bf16.msra.mxu0 %v5310_v32  ;;  %v5613_v32 = vcombine.high %v1010_v27, %v1014_v28  ;;  %v795_v27 = vld [vmem:[#allocation8 + $0x8d0] sm:$0xff]  ;;  %v5390_v35 = vcombine.low %v787_v15, %v791_v17 }
 0x1cd   : > { %4062 = vmatprep.subr.bf16.mxu0 %v5319_v43  ;;  %v1022_v43 = vld [vmem:[#allocation8 + $0xfe8] sm:$0xff]  ;;  %v799_v28 = vld [vmem:[#allocation8 + $0x8f0] sm:$0xff] }
 0x1ce   : > { %3961 = vmatpush1.bf16.msra.mxu1 %v5572_v51  ;;  %v5621_v51 = vcombine.high %v1018_v41, %v1022_v43  ;;  %v5620_v42 = vcombine.low %v1018_v41, %v1022_v43  ;;  %v803_v41 = vld [vmem:[#allocation8 + $0x910] sm:$0xff] }
 0x1cf   : > { %3962 = vmatprep.subr.bf16.mxu1 %v5581_v54  ;;  %v516_v54 = vld [vmem:[#allocation8 + $0x18] sm:$0xff]  ;;  %v807_v43 = vld [vmem:[#allocation8 + $0x930] sm:$0xff] }
 0x1d0   : > { %4063 = vmatpush1.bf16.msra.mxu0 %v5318_v52  ;;  %v5367_v52 = vcombine.high %v763_v45, %v767_v46  ;;  %v5398_v46 = vcombine.low %v795_v27, %v799_v28 }
 0x1d1   : > { %4064 = vmatprep.subr.bf16.mxu0 %v5327_v55  ;;  %v520_v55 = vld [vmem:[#allocation8 + $0x38] sm:$0xff] }
 0x1d2   : > { %3963 = vmatpush1.bf16.msra.mxu1 %v5580_v0  ;;  %v5121_v0 = vcombine.high %v516_v54, %v520_v55  ;;  %v5120_v22 = vcombine.low %v516_v54, %v520_v55  ;;  %v811_v54 = vld [vmem:[#allocation8 + $0x950] sm:$0xff] }
 0x1d3   : > { %3964 = vmatprep.subr.bf16.mxu1 %v5589_v59  ;;  %v524_v59 = vld [vmem:[#allocation8 + $0x58] sm:$0xff]  ;;  %v815_v55 = vld [vmem:[#allocation8 + $0x970] sm:$0xff] }
 0x1d4   : > { %4065 = vmatpush1.bf16.msra.mxu0 %v5326_v2  ;;  %v5375_v2 = vcombine.high %v771_v57, %v775_v61  ;;  %v5406_v61 = vcombine.low %v803_v41, %v807_v43 }
 0x1d5   : > { %4066 = vmatprep.subr.bf16.mxu0 %v5335_v4  ;;  %v528_v4 = vld [vmem:[#allocation8 + $0x78] sm:$0xff] }
 0x1d6   : > { %3965 = vmatpush1.bf16.msra.mxu1 %v5588_v12  ;;  %v5129_v12 = vcombine.high %v524_v59, %v528_v4  ;;  %v5128_v18 = vcombine.low %v524_v59, %v528_v4  ;;  %v819_v59 = vld [vmem:[#allocation8 + $0x990] sm:$0xff] }
 0x1d7   : > { %3966 = vmatprep.subr.bf16.mxu1 %v5597_v14  ;;  %v532_v14 = vld [vmem:[#allocation8 + $0x98] sm:$0xff]  ;;  %v823_v4 = vld [vmem:[#allocation8 + $0x9b0] sm:$0xff] }
 0x1d8   : > { %4067 = vmatpush1.bf16.msra.mxu0 %v5334_v1  ;;  %v5383_v1 = vcombine.high %v779_v56, %v783_v5  ;;  %v5414_v5 = vcombine.low %v811_v54, %v815_v55 }
 0x1d9   : > { %4068 = vmatprep.subr.bf16.mxu0 %v5343_v60  ;;  %v536_v60 = vld [vmem:[#allocation8 + $0xb8] sm:$0xff] }
 0x1da   : > { %3967 = vmatpush1.bf16.msra.mxu1 %v5596_v23  ;;  %v5137_v23 = vcombine.high %v532_v14, %v536_v60  ;;  %v5136_v33 = vcombine.low %v532_v14, %v536_v60  ;;  %v831_v14 = vld [vmem:[#allocation8 + $0x9f0] sm:$0xff] }
 0x1db   : > { %3968 = vmatprep.subr.bf16.mxu1 %v5605_v25  ;;  %v540_v25 = vld [vmem:[#allocation8 + $0xd8] sm:$0xff] }
 0x1dc   : > { %4069 = vmatpush1.bf16.msra.mxu0 %v5342_v24  ;;  %v5391_v24 = vcombine.high %v787_v15, %v791_v17  ;;  %v5422_v15 = vcombine.low %v819_v59, %v823_v4 }
 0x1dd   : > { %4070 = vmatprep.subr.bf16.mxu0 %v5351_v26  ;;  %v544_v26 = vld [vmem:[#allocation8 + $0xf8] sm:$0xff] }
 0x1de   : > { %3969 = vmatpush1.bf16.msra.mxu1 %v5604_v38  ;;  %v5145_v38 = vcombine.high %v540_v25, %v544_v26  ;;  %v5144_v45 = vcombine.low %v540_v25, %v544_v26  ;;  %v839_v25 = vld [vmem:[#allocation8 + $0xa30] sm:$0xff] }
 0x1df   : > { %3970 = vmatprep.subr.bf16.mxu1 %v5613_v32  ;;  %v548_v32 = vld [vmem:[#allocation8 + $0x118] sm:$0xff] }
 0x1e0   : > { %4071 = vmatpush1.bf16.msra.mxu0 %v5350_v39  ;;  %v5399_v39 = vcombine.high %v795_v27, %v799_v28 }
 0x1e1   : > { %4072 = vmatprep.subr.bf16.mxu0 %v5359_v40  ;;  %v552_v40 = vld [vmem:[#allocation8 + $0x138] sm:$0xff] }
 0x1e2   : > { %3971 = vmatpush1.bf16.msra.mxu1 %v5612_v47  ;;  %v5153_v47 = vcombine.high %v548_v32, %v552_v40  ;;  %v5152_v57 = vcombine.low %v548_v32, %v552_v40  ;;  %v847_v32 = vld [vmem:[#allocation8 + $0xa70] sm:$0xff] }
 0x1e3   : > { %3972 = vmatprep.subr.bf16.mxu1 %v5621_v51  ;;  %v556_v51 = vld [vmem:[#allocation8 + $0x158] sm:$0xff] }
 0x1e4   : > { %4073 = vmatpush1.bf16.msra.mxu0 %v5358_v49  ;;  %v5407_v49 = vcombine.high %v803_v41, %v807_v43 }
 0x1e5   : > { %4074 = vmatprep.subr.bf16.mxu0 %v5367_v52  ;;  %v560_v52 = vld [vmem:[#allocation8 + $0x178] sm:$0xff] }
 0x1e6   : > { %3973 = vmatpush1.bf16.msra.mxu1 %v5620_v42  ;;  %v5161_v42 = vcombine.high %v556_v51, %v560_v52  ;;  %v5160_v56 = vcombine.low %v556_v51, %v560_v52  ;;  %v855_v51 = vld [vmem:[#allocation8 + $0xab0] sm:$0xff] }
 0x1e7   : > { %4197 = vmatprep.subr.bf16.mxu1 %v5121_v0  ;;  %v564_v0 = vld [vmem:[#allocation8 + $0x198] sm:$0xff] }
 0x1e8   : > { %4075 = vmatpush1.bf16.msra.mxu0 %v5366_v63  ;;  %v5415_v63 = vcombine.high %v811_v54, %v815_v55 }
 0x1e9   : > { %4095 = vmatprep.subr.bf16.mxu0 %v5375_v2  ;;  %3975 = vmatmul.mubr.bf16.vlgmr.msra.gmra.mrb[8].mxu1 %v6619_v44  ;;  %v568_v2 = vld [vmem:[#allocation8 + $0x1b8] sm:$0xff] }
 0x1ea   : > { %4198 = vmatpush1.bf16.msra.mxu1 %v5120_v22  ;;  %3984 = vmatprep.mubr.bf16.mxu1 %v6641_v31  ;;  %v5169_v22 = vcombine.high %v564_v0, %v568_v2  ;;  %v5168_v60 = vcombine.low %v564_v0, %v568_v2  ;;  %v863_v0 = vld [vmem:[#allocation8 + $0xaf0] sm:$0xff] }
 0x1eb   : > { %4077 = vmatmul.mubr.bf16.vlgmr.msra.gmra.mrb[8].mxu0 %v6580_v62  ;;  %4199 = vmatprep.subr.bf16.mxu1 %v5129_v12  ;;  %v576_v12 = vld [vmem:[#allocation8 + $0x1f8] sm:$0xff] }
 0x1ec   : > { %4096 = vmatpush1.bf16.msra.mxu0 %v5374_v7  ;;  %4086 = vmatprep.mubr.bf16.mxu0 %v6594_v11  ;;  %v572_v7 = vld [vmem:[#allocation8 + $0x1d8] sm:$0xff] }
 0x1ed   : > { %4097 = vmatprep.subr.bf16.mxu0 %v5383_v1  ;;  %v827_v1 = vld [vmem:[#allocation8 + $0x9d0] sm:$0xff]  ;;  %v5177_v17 = vcombine.high %v572_v7, %v576_v12  ;;  %v5176_v26 = vcombine.low %v572_v7, %v576_v12 }
 0x1ee   : > { %4200 = vmatpush1.bf16.msra.mxu1 %v5128_v18  ;;  %v5431_v18 = vcombine.high %v827_v1, %v831_v14  ;;  %v5430_v27 = vcombine.low %v827_v1, %v831_v14  ;;  %v871_v7 = vld [vmem:[#allocation8 + $0xb30] sm:$0xff] }
 0x1ef   : > { %4201 = vmatprep.subr.bf16.mxu1 %v5137_v23  ;;  %v584_v23 = vld [vmem:[#allocation8 + $0x238] sm:$0xff] }
 0x1f0   : > { %4098 = vmatpush1.bf16.msra.mxu0 %v5382_v21  ;;  %v580_v21 = vld [vmem:[#allocation8 + $0x218] sm:$0xff] }
 0x1f1   : > { %4099 = vmatprep.subr.bf16.mxu0 %v5391_v24  ;;  %3985 = vmatmul.mubr.bf16.gmra.mrb[12].mxu1 %v6647_v50  ;;  %v835_v24 = vld [vmem:[#allocation8 + $0xa10] sm:$0xff]  ;;  %v5185_v28 = vcombine.high %v580_v21, %v584_v23  ;;  %v5184_v40 = vcombine.low %v580_v21, %v584_v23 }
 0x1f2   : > { %4202 = vmatpush1.bf16.msra.mxu1 %v5136_v33  ;;  %4229 = vmatprep.mubr.bf16.mxu1 %v6512_v58  ;;  %v5423_v58 = vcombine.high %v819_v59, %v823_v4  ;;  %v5439_v33 = vcombine.high %v835_v24, %v839_v25  ;;  %v5438_v41 = vcombine.low %v835_v24, %v839_v25  ;;  %v879_v21 = vld [vmem:[#allocation8 + $0xb70] sm:$0xff] }
 0x1f3   : > { %4087 = vmatmul.mubr.bf16.gmra.mrb[12].mxu0 %v6611_v36  ;;  %4203 = vmatprep.subr.bf16.mxu1 %v5145_v38  ;;  %v592_v38 = vld [vmem:[#allocation8 + $0x278] sm:$0xff] }
 0x1f4   : > { %4100 = vmatpush1.bf16.msra.mxu0 %v5390_v35  ;;  %4127 = vmatprep.mubr.bf16.mxu0 %v6623_v48  ;;  %v588_v35 = vld [vmem:[#allocation8 + $0x258] sm:$0xff] }
 0x1f5   : > { %4101 = vmatprep.subr.bf16.mxu0 %v5399_v39  ;;  %v843_v39 = vld [vmem:[#allocation8 + $0xa50] sm:$0xff]  ;;  %v5193_v43 = vcombine.high %v588_v35, %v592_v38  ;;  %v5192_v52 = vcombine.low %v588_v35, %v592_v38 }
 0x1f6   : > { %4204 = vmatpush1.bf16.msra.mxu1 %v5144_v45  ;;  %v5447_v45 = vcombine.high %v843_v39, %v847_v32  ;;  %v5446_v54 = vcombine.low %v843_v39, %v847_v32  ;;  %v887_v35 = vld [vmem:[#allocation8 + $0xbb0] sm:$0xff] }
 0x1f7   : > { %4205 = vmatprep.subr.bf16.mxu1 %v5153_v47  ;;  %v600_v47 = vld [vmem:[#allocation8 + $0x2b8] sm:$0xff] }
 0x1f8   : > { %4102 = vmatpush1.bf16.msra.mxu0 %v5398_v46  ;;  %v596_v46 = vld [vmem:[#allocation8 + $0x298] sm:$0xff] }
 0x1f9   : > { %4103 = vmatprep.subr.bf16.mxu0 %v5407_v49  ;;  %v851_v49 = vld [vmem:[#allocation8 + $0xa90] sm:$0xff]  ;;  %v5201_v55 = vcombine.high %v596_v46, %v600_v47  ;;  %v5200_v2 = vcombine.low %v596_v46, %v600_v47 }
 0x1fa   : > { %4206 = vmatpush1.bf16.msra.mxu1 %v5152_v57  ;;  %v5455_v57 = vcombine.high %v851_v49, %v855_v51  ;;  %v5454_v59 = vcombine.low %v851_v49, %v855_v51  ;;  %v895_v46 = vld [vmem:[#allocation8 + $0xbf0] sm:$0xff] }
 0x1fb   : > { %4207 = vmatprep.subr.bf16.mxu1 %v5161_v42  ;;  %v608_v42 = vld [vmem:[#allocation8 + $0x2f8] sm:$0xff] }
 0x1fc   : > { %4104 = vmatpush1.bf16.msra.mxu0 %v5406_v61  ;;  %v604_v61 = vld [vmem:[#allocation8 + $0x2d8] sm:$0xff] }
 0x1fd   : > { %4105 = vmatprep.subr.bf16.mxu0 %v5415_v63  ;;  %v859_v63 = vld [vmem:[#allocation8 + $0xad0] sm:$0xff]  ;;  %v5209_v4 = vcombine.high %v604_v61, %v608_v42  ;;  %v5208_v12 = vcombine.low %v604_v61, %v608_v42 }
 0x1fe   : > { %4208 = vmatpush1.bf16.msra.mxu1 %v5160_v56  ;;  %v5463_v56 = vcombine.high %v859_v63, %v863_v0  ;;  %v5462_v1 = vcombine.low %v859_v63, %v863_v0  ;;  %v903_v61 = vld [vmem:[#allocation8 + $0xc30] sm:$0xff] }
 0x1ff   : > { %4209 = vmatprep.subr.bf16.mxu1 %v5169_v22  ;;  %v616_v22 = vld [vmem:[#allocation8 + $0x338] sm:$0xff] }
 0x200   : > { %4106 = vmatpush1.bf16.msra.mxu0 %v5414_v5  ;;  %v612_v5 = vld [vmem:[#allocation8 + $0x318] sm:$0xff] }
 0x201   : > { %4107 = vmatprep.subr.bf16.mxu0 %v5423_v58  ;;  %v867_v58 = vld [vmem:[#allocation8 + $0xb10] sm:$0xff]  ;;  %v5217_v14 = vcombine.high %v612_v5, %v616_v22  ;;  %v5216_v23 = vcombine.low %v612_v5, %v616_v22 }
 0x202   : > { %4210 = vmatpush1.bf16.msra.mxu1 %v5168_v60  ;;  %v5471_v60 = vcombine.high %v867_v58, %v871_v7  ;;  %v5470_v24 = vcombine.low %v867_v58, %v871_v7  ;;  %v911_v5 = vld [vmem:[#allocation8 + $0xc70] sm:$0xff] }
 0x203   : > { %4211 = vmatprep.subr.bf16.mxu1 %v5177_v17  ;;  %v624_v17 = vld [vmem:[#allocation8 + $0x378] sm:$0xff] }
 0x204   : > { %4108 = vmatpush1.bf16.msra.mxu0 %v5422_v15  ;;  %v620_v15 = vld [vmem:[#allocation8 + $0x358] sm:$0xff] }
 0x205   : > { %4109 = vmatprep.subr.bf16.mxu0 %v5431_v18  ;;  %v875_v18 = vld [vmem:[#allocation8 + $0xb50] sm:$0xff]  ;;  %v5225_v25 = vcombine.high %v620_v15, %v624_v17  ;;  %v5224_v38 = vcombine.low %v620_v15, %v624_v17 }
 0x206   : > { %4212 = vmatpush1.bf16.msra.mxu1 %v5176_v26  ;;  %v5479_v26 = vcombine.high %v875_v18, %v879_v21  ;;  %v5478_v39 = vcombine.low %v875_v18, %v879_v21  ;;  %v919_v15 = vld [vmem:[#allocation8 + $0xcb0] sm:$0xff] }
 0x207   : > { %4213 = vmatprep.subr.bf16.mxu1 %v5185_v28  ;;  %v632_v28 = vld [vmem:[#allocation8 + $0x3b8] sm:$0xff] }
 0x208   : > { %4110 = vmatpush1.bf16.msra.mxu0 %v5430_v27  ;;  %v628_v27 = vld [vmem:[#allocation8 + $0x398] sm:$0xff] }
 0x209   : > { %4111 = vmatprep.subr.bf16.mxu0 %v5439_v33  ;;  %v883_v33 = vld [vmem:[#allocation8 + $0xb90] sm:$0xff]  ;;  %v5233_v32 = vcombine.high %v628_v27, %v632_v28  ;;  %v5232_v47 = vcombine.low %v628_v27, %v632_v28 }
 0x20a   : > { %4214 = vmatpush1.bf16.msra.mxu1 %v5184_v40  ;;  %v5487_v40 = vcombine.high %v883_v33, %v887_v35  ;;  %v5486_v49 = vcombine.low %v883_v33, %v887_v35  ;;  %v927_v27 = vld [vmem:[#allocation8 + $0xcf0] sm:$0xff] }
 0x20b   : > { %4215 = vmatprep.subr.bf16.mxu1 %v5193_v43  ;;  %v640_v43 = vld [vmem:[#allocation8 + $0x3f8] sm:$0xff] }
 0x20c   : > { %4112 = vmatpush1.bf16.msra.mxu0 %v5438_v41  ;;  %v636_v41 = vld [vmem:[#allocation8 + $0x3d8] sm:$0xff] }
 0x20d   : > { %4113 = vmatprep.subr.bf16.mxu0 %v5447_v45  ;;  %v891_v45 = vld [vmem:[#allocation8 + $0xbd0] sm:$0xff]  ;;  %v5241_v51 = vcombine.high %v636_v41, %v640_v43  ;;  %v5240_v42 = vcombine.low %v636_v41, %v640_v43 }
 0x20e   : > { %4216 = vmatpush1.bf16.msra.mxu1 %v5192_v52  ;;  %v5495_v52 = vcombine.high %v891_v45, %v895_v46  ;;  %v5494_v63 = vcombine.low %v891_v45, %v895_v46  ;;  %v684_v46 = vld [vmem:[#allocation8 + $0x558] sm:$0xff] }
 0x20f   : > { %4217 = vmatprep.subr.bf16.mxu1 %v5201_v55  ;;  %v648_v55 = vld [vmem:[#allocation8 + $0x438] sm:$0xff] }
 0x210   : > { %4114 = vmatpush1.bf16.msra.mxu0 %v5446_v54  ;;  %v644_v54 = vld [vmem:[#allocation8 + $0x418] sm:$0xff] }
 0x211   : > { %4115 = vmatprep.subr.bf16.mxu0 %v5455_v57  ;;  %v899_v57 = vld [vmem:[#allocation8 + $0xc10] sm:$0xff]  ;;  %v5249_v0 = vcombine.high %v644_v54, %v648_v55  ;;  %v5248_v22 = vcombine.low %v644_v54, %v648_v55 }
 0x212   : > { %4218 = vmatpush1.bf16.msra.mxu1 %v5200_v2  ;;  %v5503_v2 = vcombine.high %v899_v57, %v903_v61  ;;  %v5502_v58 = vcombine.low %v899_v57, %v903_v61  ;;  %v692_v57 = vld [vmem:[#allocation8 + $0x598] sm:$0xff] }
 0x213   : > { %4219 = vmatprep.subr.bf16.mxu1 %v5209_v4  ;;  %v656_v4 = vld [vmem:[#allocation8 + $0x478] sm:$0xff] }
 0x214   : > { %4116 = vmatpush1.bf16.msra.mxu0 %v5454_v59  ;;  %v652_v59 = vld [vmem:[#allocation8 + $0x458] sm:$0xff] }
 0x215   : > { %4117 = vmatprep.subr.bf16.mxu0 %v5463_v56  ;;  %v907_v56 = vld [vmem:[#allocation8 + $0xc50] sm:$0xff]  ;;  %v5257_v7 = vcombine.high %v652_v59, %v656_v4  ;;  %v5256_v17 = vcombine.low %v652_v59, %v656_v4  ;;  %v696_v61 = vld [vmem:[#allocation8 + $0x5b8] sm:$0xff] }
 0x216   : > { %4220 = vmatpush1.bf16.msra.mxu1 %v5208_v12  ;;  %v5511_v12 = vcombine.high %v907_v56, %v911_v5  ;;  %v5510_v18 = vcombine.low %v907_v56, %v911_v5  ;;  %v5297_v59 = vcombine.high %v692_v57, %v696_v61  ;;  %v700_v4 = vld [vmem:[#allocation8 + $0x5d8] sm:$0xff] }
 0x217   : > { %4221 = vmatprep.subr.bf16.mxu1 %v5217_v14  ;;  %v664_v14 = vld [vmem:[#allocation8 + $0x4b8] sm:$0xff] }
 0x218   : > { %4118 = vmatpush1.bf16.msra.mxu0 %v5462_v1  ;;  %v660_v1 = vld [vmem:[#allocation8 + $0x498] sm:$0xff] }
 0x219   : > { %4119 = vmatprep.subr.bf16.mxu0 %v5471_v60  ;;  %v915_v60 = vld [vmem:[#allocation8 + $0xc90] sm:$0xff]  ;;  %v5265_v21 = vcombine.high %v660_v1, %v664_v14  ;;  %v704_v56 = vld [vmem:[#allocation8 + $0x5f8] sm:$0xff] }
 0x21a   : > { %4222 = vmatpush1.bf16.msra.mxu1 %v5216_v23  ;;  %v5519_v23 = vcombine.high %v915_v60, %v919_v15  ;;  %v5518_v28 = vcombine.low %v915_v60, %v919_v15 }
 0x21b   : > { %4223 = vmatprep.subr.bf16.mxu1 %v5225_v25  ;;  %v672_v25 = vld [vmem:[#allocation8 + $0x4f8] sm:$0xff] }
 0x21c   : > { %4120 = vmatpush1.bf16.msra.mxu0 %v5470_v24  ;;  %v668_v24 = vld [vmem:[#allocation8 + $0x4d8] sm:$0xff] }
 0x21d   : > { %4121 = vmatprep.subr.bf16.mxu0 %v5479_v26  ;;  %v923_v26 = vld [vmem:[#allocation8 + $0xcd0] sm:$0xff]  ;;  %v5273_v33 = vcombine.high %v668_v24, %v672_v25  ;;  %v5272_v41 = vcombine.low %v668_v24, %v672_v25  ;;  %v708_v24 = vld [vmem:[#allocation8 + $0x618] sm:$0xff] }
 0x21e   : > { %4224 = vmatpush1.bf16.msra.mxu1 %v5224_v38  ;;  %v5527_v35 = vcombine.high %v923_v26, %v927_v27  ;;  %v676_v38 = vld [vmem:[#allocation8 + $0x518] sm:$0xff] }
 0x21f   : > { %4225 = vmatprep.subr.bf16.mxu1 %v5233_v32  ;;  %v931_v32 = vld [vmem:[#allocation8 + $0xd10] sm:$0xff] }
 0x220   : > { %4122 = vmatpush1.bf16.msra.mxu0 %v5478_v39  ;;  %v680_v39 = vld [vmem:[#allocation8 + $0x538] sm:$0xff] }
 0x221   : > { %4123 = vmatprep.subr.bf16.mxu0 %v5487_v40  ;;  %v935_v40 = vld [vmem:[#allocation8 + $0xd30] sm:$0xff]  ;;  %v5281_v43 = vcombine.high %v676_v38, %v680_v39 }
 0x222   : > { %4226 = vmatpush1.bf16.msra.mxu1 %v5232_v47  ;;  %v5535_v45 = vcombine.high %v931_v32, %v935_v40  ;;  %v688_v47 = vld [vmem:[#allocation8 + $0x578] sm:$0xff] }
 0x223   : > { %4227 = vmatprep.subr.bf16.mxu1 %v5241_v51  ;;  %v943_v51 = vld [vmem:[#allocation8 + $0xd70] sm:$0xff]  ;;  %v5289_v54 = vcombine.high %v684_v46, %v688_v47 }
 0x224   : > { %4124 = vmatpush1.bf16.msra.mxu0 %v5486_v49  ;;  %v939_v49 = vld [vmem:[#allocation8 + $0xd50] sm:$0xff] }
 0x225   : > { %4125 = vmatprep.subr.bf16.mxu0 %v5495_v52  ;;  %v5534_v52 = vcombine.low %v931_v32, %v935_v40  ;;  %v5543_v55 = vcombine.high %v939_v49, %v943_v51  ;;  %v975_v32 = vld [vmem:[#allocation8 + $0xe70] sm:$0xff] }
 0x226   : > { %4228 = vmatpush1.bf16.msra.mxu1 %v5240_v42  ;;  %v947_v42 = vld [vmem:[#allocation8 + $0xd90] sm:$0xff] }
 0x227   : > { %4248 = vmatprep.subr.bf16.mxu1 %v5249_v0  ;;  %v5288_v0 = vcombine.low %v684_v46, %v688_v47 }
 0x228   : > { %4126 = vmatpush1.bf16.msra.mxu0 %v5494_v63  ;;  %v951_v63 = vld [vmem:[#allocation8 + $0xdb0] sm:$0xff] }
 0x229   : > { %4146 = vmatprep.subr.bf16.mxu0 %v5503_v2  ;;  %4230 = vmatmul.mubr.bf16.vlgmr.msra.gmra.mrb[16].mxu1 %v6573_v53  ;;  %v5264_v53 = vcombine.low %v660_v1, %v664_v14  ;;  %v5542_v2 = vcombine.low %v939_v49, %v943_v51  ;;  %v5296_v1 = vcombine.low %v692_v57, %v696_v61  ;;  %v724_v51 = vld [vmem:[#allocation8 + $0x698] sm:$0xff] }
 0x22a   : > { %4249 = vmatpush1.bf16.msra.mxu1 %v5248_v22  ;;  %4239 = vmatprep.mubr.bf16.mxu1 %v6589_v6  ;;  %v5526_v6 = vcombine.low %v923_v26, %v927_v27  ;;  %v955_v22 = vld [vmem:[#allocation8 + $0xdd0] sm:$0xff]  ;;  %v5550_v15 = vcombine.low %v947_v42, %v951_v63  ;;  %v732_v61 = vld [vmem:[#allocation8 + $0x6d8] sm:$0xff] }
 0x22b   : > { %4128 = vmatmul.mubr.bf16.vlgmr.msra.gmra.mrb[8].mxu0 %v6569_v29  ;;  %4250 = vmatprep.subr.bf16.mxu1 %v5257_v7  ;;  %v963_v26 = vld [vmem:[#allocation8 + $0xe10] sm:$0xff] }
 0x22c   : > { %4147 = vmatpush1.bf16.msra.mxu0 %v5502_v58  ;;  %4137 = vmatprep.mubr.bf16.mxu0 %v6629_v16  ;;  %v959_v58 = vld [vmem:[#allocation8 + $0xdf0] sm:$0xff] }
 0x22d   : > { %4148 = vmatprep.subr.bf16.mxu0 %v5511_v12  ;;  %v967_v27 = vld [vmem:[#allocation8 + $0xe30] sm:$0xff] }
 0x22e   : > { %4251 = vmatpush1.bf16.msra.mxu1 %v5256_v17  ;;  %v5305_v17 = vcombine.high %v700_v4, %v704_v56 }
 0x22f   : > { %4252 = vmatprep.subr.bf16.mxu1 %v5265_v21 }
 0x230   : > { %4149 = vmatpush1.bf16.msra.mxu0 %v5510_v18 }
 0x231   : > { %4150 = vmatprep.subr.bf16.mxu0 %v5519_v23  ;;  %4240 = vmatmul.mubr.bf16.gmra.mrb[20].mxu1 %v6607_v34  ;;  %v5280_v34 = vcombine.low %v676_v38, %v680_v39  ;;  %v5559_v23 = vcombine.high %v955_v22, %v959_v58  ;;  %v971_v39 = vld [vmem:[#allocation8 + $0xe50] sm:$0xff] }
 0x232   : > { %4253 = vmatpush1.bf16.msra.mxu1 %v5264_v53  ;;  %4280 = vmatprep.mubr.bf16.mxu1 %v6536_v19  ;;  %v5551_v19 = vcombine.high %v947_v42, %v951_v63  ;;  %v5558_v53 = vcombine.low %v955_v22, %v959_v58  ;;  %v5575_v49 = vcombine.high %v971_v39, %v975_v32  ;;  %v736_v42 = vld [vmem:[#allocation8 + $0x6f8] sm:$0xff]  ;;  %v987_v63 = vld [vmem:[#allocation8 + $0xed0] sm:$0xff] }
 0x233   : > { %4138 = vmatmul.mubr.bf16.gmra.mrb[12].mxu0 %v6635_v9  ;;  %4254 = vmatprep.subr.bf16.mxu1 %v5273_v33  ;;  %v5567_v33 = vcombine.high %v963_v26, %v967_v27  ;;  %v995_v22 = vld [vmem:[#allocation8 + $0xf10] sm:$0xff] }
 0x234   : > { %4151 = vmatpush1.bf16.msra.mxu0 %v5518_v28  ;;  %4178 = vmatprep.mubr.bf16.mxu0 %v6617_v10  ;;  %v999_v58 = vld [vmem:[#allocation8 + $0xf30] sm:$0xff] }
 0x235   : > { %4152 = vmatprep.subr.bf16.mxu0 %v5527_v35  ;;  %v720_v35 = vld [vmem:[#allocation8 + $0x678] sm:$0xff] }
 0x236   : > { %4255 = vmatpush1.bf16.msra.mxu1 %v5272_v41 }
 0x237   : > { %4256 = vmatprep.subr.bf16.mxu1 %v5281_v43 }
 0x238   : > { %4153 = vmatpush1.bf16.msra.mxu0 %v5526_v6 }
 0x239   : > { %4154 = vmatprep.subr.bf16.mxu0 %v5535_v45  ;;  %v5566_v45 = vcombine.low %v963_v26, %v967_v27  ;;  %v5598_v26 = vcombine.low %v995_v22, %v999_v58 }
 0x23a   : > { %4257 = vmatpush1.bf16.msra.mxu1 %v5280_v34  ;;  %v728_v34 = vld [vmem:[#allocation8 + $0x6b8] sm:$0xff] }
 0x23b   : > { %4258 = vmatprep.subr.bf16.mxu1 %v5289_v54  ;;  %v983_v54 = vld [vmem:[#allocation8 + $0xeb0] sm:$0xff]  ;;  %v5329_v57 = vcombine.high %v724_v51, %v728_v34 }
 0x23c   : > { %4155 = vmatpush1.bf16.msra.mxu0 %v5534_v52  ;;  %v979_v52 = vld [vmem:[#allocation8 + $0xe90] sm:$0xff] }
 0x23d   : > { %4156 = vmatprep.subr.bf16.mxu0 %v5543_v55  ;;  %v5574_v55 = vcombine.low %v971_v39, %v975_v32 }
 0x23e   : > { %v3772_v5 = vpop.f32.mrb[0].mxu0  ;;  %4259 = vmatpush1.bf16.msra.mxu1 %v5288_v0  ;;  %v991_v0 = vld [vmem:[#allocation8 + $0xef0] sm:$0xff] }
 0x23f   : > { %v6690_v7 = vadd.f32 %v3772_v5, %v6661_v3  ;;  %v3774_v12 = vpop.f32.mrb[1].mxu0  ;;  %4260 = vmatprep.subr.bf16.mxu1 %v5297_v59  ;;  %v712_v3 = vld [vmem:[#allocation8 + $0x638] sm:$0xff]  ;;  %v5582_v59 = vcombine.low %v979_v52, %v983_v54 }
 0x240   : > { %v6693_v14 = vadd.f32 %v3774_v12, %v6663_v20  ;;  %v3776_v60 = vpop.f32.mrb[2].mxu0  ;;  %4157 = vmatpush1.bf16.msra.mxu0 %v5542_v2  ;;  %v5304_v20 = vcombine.low %v700_v4, %v704_v56  ;;  %v5313_v28 = vcombine.high %v708_v24, %v712_v3  ;;  %v5312_v41 = vcombine.low %v708_v24, %v712_v3  ;;  %v740_v56 = vld [vmem:[#allocation8 + $0x718] sm:$0xff]  ;;  %v1007_v24 = vld [vmem:[#allocation8 + $0xf70] sm:$0xff] }
 0x241   : > { %v6696_v18 = vadd.f32 %v3776_v60, %v6665_v8  ;;  %v3778_v21 = vpop.f32.mrb[3].mxu0  ;;  %4158 = vmatprep.subr.bf16.mxu0 %v5551_v19  ;;  %v716_v8 = vld [vmem:[#allocation8 + $0x658] sm:$0xff]  ;;  %v5328_v2 = vcombine.low %v724_v51, %v728_v34  ;;  %v5337_v19 = vcombine.high %v732_v61, %v736_v42  ;;  %v5591_v4 = vcombine.high %v987_v63, %v991_v0 }
 0x242   : > { %v6699_v25 = vadd.f32 %v3778_v21, %v6667_v13  ;;  %4261 = vmatpush1.bf16.msra.mxu1 %v5296_v1  ;;  %v5321_v46 = vcombine.high %v716_v8, %v720_v35  ;;  %v744_v5 = vld [vmem:[#allocation8 + $0x738] sm:$0xff]  ;;  %v5336_v12 = vcombine.low %v732_v61, %v736_v42  ;;  %v5590_v1 = vcombine.low %v987_v63, %v991_v0 }
 0x243   : > { %4262 = vmatprep.subr.bf16.mxu1 %v5305_v17  ;;  %v5345_v60 = vcombine.high %v740_v56, %v744_v5  ;;  %v748_v17 = vld [vmem:[#allocation8 + $0x758] sm:$0xff]  ;;  %v5344_v3 = vcombine.low %v740_v56, %v744_v5 }
 0x244   : > { %4159 = vmatpush1.bf16.msra.mxu0 %v5550_v15  ;;  %v5599_v15 = vcombine.high %v995_v22, %v999_v58  ;;  %v752_v21 = vld [vmem:[#allocation8 + $0x778] sm:$0xff] }
 0x245   : > { %4160 = vmatprep.subr.bf16.mxu0 %v5559_v23  ;;  %v1003_v23 = vld [vmem:[#allocation8 + $0xf50] sm:$0xff]  ;;  %v5353_v27 = vcombine.high %v748_v17, %v752_v21  ;;  %v772_v34 = vld [vmem:[#allocation8 + $0x818] sm:$0xff] }
 0x246   : > { %v3782_v38 = vpop.f32.mrb[4].mxu0  ;;  %4263 = vmatpush1.bf16.msra.mxu1 %v5304_v20  ;;  %v5607_v20 = vcombine.high %v1003_v23, %v1007_v24  ;;  %v788_v63 = vld [vmem:[#allocation8 + $0x898] sm:$0xff] }
 0x247   : > { %v6702_v40 = vadd.f32 %v3782_v38, %v6669_v30  ;;  %v3784_v13 = vpop.f32.mrb[5].mxu0  ;;  %4264 = vmatprep.subr.bf16.mxu1 %v5313_v28  ;;  %v5320_v30 = vcombine.low %v716_v8, %v720_v35  ;;  %v760_v28 = vld [vmem:[#allocation8 + $0x7b8] sm:$0xff]  ;;  %v1015_v8 = vld [vmem:[#allocation8 + $0xfb0] sm:$0xff]  ;;  %v5352_v35 = vcombine.low %v748_v17, %v752_v21  ;;  %v5606_v38 = vcombine.low %v1003_v23, %v1007_v24 }
 0x248   : > { %v6705_v6 = vadd.f32 %v3784_v13, %v6671_v37  ;;  %v3786_v43 = vpop.f32.mrb[6].mxu0  ;;  %4161 = vmatpush1.bf16.msra.mxu0 %v5558_v53  ;;  %v5583_v37 = vcombine.high %v979_v52, %v983_v54  ;;  %v756_v53 = vld [vmem:[#allocation8 + $0x798] sm:$0xff] }
 0x249   : > { %v3787_v47 = vpop.f32.mrb[7].mxu0  ;;  %4162 = vmatprep.subr.bf16.mxu0 %v5567_v33  ;;  %v1011_v33 = vld [vmem:[#allocation8 + $0xf90] sm:$0xff]  ;;  %v5361_v39 = vcombine.high %v756_v53, %v760_v28  ;;  %v764_v13 = vld [vmem:[#allocation8 + $0x7d8] sm:$0xff] }
 0x24a   : > { %4265 = vmatpush1.bf16.msra.mxu1 %v5312_v41  ;;  %v5615_v32 = vcombine.high %v1011_v33, %v1015_v8  ;;  %v768_v41 = vld [vmem:[#allocation8 + $0x7f8] sm:$0xff]  ;;  %v1019_v43 = vld [vmem:[#allocation8 + $0xfd0] sm:$0xff]  ;;  %v5614_v47 = vcombine.low %v1011_v33, %v1015_v8 }
 0x24b   : > { %4266 = vmatprep.subr.bf16.mxu1 %v5321_v46  ;;  %v5360_v46 = vcombine.low %v756_v53, %v760_v28  ;;  %v776_v52 = vld [vmem:[#allocation8 + $0x838] sm:$0xff]  ;;  %v5368_v54 = vcombine.low %v764_v13, %v768_v41 }
 0x24c   : > { %4163 = vmatpush1.bf16.msra.mxu0 %v5566_v45  ;;  %v1023_v45 = vld [vmem:[#allocation8 + $0xff0] sm:$0xff]  ;;  %v5376_v61 = vcombine.low %v772_v34, %v776_v52  ;;  %v792_v0 = vld [vmem:[#allocation8 + $0x8b8] sm:$0xff] }
 0x24d   : > { %4164 = vmatprep.subr.bf16.mxu0 %v5575_v49  ;;  %v5369_v49 = vcombine.high %v764_v13, %v768_v41  ;;  %v5623_v51 = vcombine.high %v1019_v43, %v1023_v45  ;;  %v5392_v56 = vcombine.low %v788_v63, %v792_v0  ;;  %v804_v22 = vld [vmem:[#allocation8 + $0x918] sm:$0xff]  ;;  %v5914_v41 = vld [vmem:[#allocation9 + $0x40] ss:$8 sps:$4 sm:$0xff]  }
 0x24e   : > { %4267 = vmatpush1.bf16.msra.mxu1 %v5320_v30  ;;  %v5622_v30 = vcombine.low %v1019_v43, %v1023_v45  ;;  %v808_v58 = vld [vmem:[#allocation8 + $0x938] sm:$0xff] }
 0x24f   : > { %4268 = vmatprep.subr.bf16.mxu1 %v5329_v57  ;;  %v780_v57 = vld [vmem:[#allocation8 + $0x858] sm:$0xff]  ;;  %v5408_v23 = vcombine.low %v804_v22, %v808_v58 }
 0x250   : > { %4165 = vmatpush1.bf16.msra.mxu0 %v5574_v55  ;;  %v5377_v55 = vcombine.high %v772_v34, %v776_v52  ;;  %v816_v17 = vld [vmem:[#allocation8 + $0x978] sm:$0xff]  ;;  %v5922_v52 = vld [vmem:[#allocation9 + $0x64] ss:$8 sps:$4 sm:$0xff]  }
 0x251   : > { %4166 = vmatprep.subr.bf16.mxu0 %v5583_v37  ;;  %v784_v37 = vld [vmem:[#allocation8 + $0x878] sm:$0xff] }
 0x252   : > { %4269 = vmatpush1.bf16.msra.mxu1 %v5328_v2  ;;  %v5385_v42 = vcombine.high %v780_v57, %v784_v37  ;;  %v5384_v2 = vcombine.low %v780_v57, %v784_v37  ;;  %v5905_v21 = vld [vmem:[#allocation9 + $0x10] ss:$8 sps:$4 sm:$0xff]   ;;  %v5913_v53 = vld [vmem:[#allocation9 + $0x34] ss:$8 sps:$4 sm:$0xff]   ;;  %v5920_v57 = vld [vmem:[#allocation9 + $0x60] ss:$8 sps:$4 sm:$0xff]  }
 0x253   : > { %4270 = vmatprep.subr.bf16.mxu1 %v5337_v19  ;;  %v796_v19 = vld [vmem:[#allocation8 + $0x8d8] sm:$0xff] }
 0x254   : > { %4167 = vmatpush1.bf16.msra.mxu0 %v5582_v59  ;;  %v5393_v59 = vcombine.high %v788_v63, %v792_v0  ;;  %v828_v28 = vld [vmem:[#allocation8 + $0x9d8] sm:$0xff] }
 0x255   : > { %4168 = vmatprep.subr.bf16.mxu0 %v5591_v4  ;;  %v800_v4 = vld [vmem:[#allocation8 + $0x8f8] sm:$0xff] }
 0x256   : > { %4271 = vmatpush1.bf16.msra.mxu1 %v5336_v12  ;;  %v5401_v5 = vcombine.high %v796_v19, %v800_v4  ;;  %v5904_v12 = vld [vmem:[#allocation9 + $0x4] ss:$8 sps:$4 sm:$0xff]   ;;  %v832_v33 = vld [vmem:[#allocation8 + $0x9f8] sm:$0xff] }
 0x257   : > { %4272 = vmatprep.subr.bf16.mxu1 %v5345_v60  ;;  %v5907_v60 = vld [vmem:[#allocation9 + $0x14] ss:$8 sps:$4 sm:$0xff]   ;;  %v5911_v8 = vld [vmem:[#allocation9 + $0x30] ss:$8 sps:$4 sm:$0xff]   ;;  %v5432_v43 = vcombine.low %v828_v28, %v832_v33 }
 0x258   : > { %4169 = vmatpush1.bf16.msra.mxu0 %v5590_v1  ;;  %v5400_v1 = vcombine.low %v796_v19, %v800_v4  ;;  %v840_v13 = vld [vmem:[#allocation8 + $0xa38] sm:$0xff]  ;;  %v5928_v19 = vld [vmem:[#allocation9 + $0x84] ss:$8 sps:$4 sm:$0xff]  }
 0x259   : > { %4170 = vmatprep.subr.bf16.mxu0 %v5599_v15  ;;  %v5409_v15 = vcombine.high %v804_v22, %v808_v58  ;;  %v5919_v45 = vld [vmem:[#allocation9 + $0x54] ss:$8 sps:$4 sm:$0xff]   ;;  %v5926_v22 = vld [vmem:[#allocation9 + $0x80] ss:$8 sps:$4 sm:$0xff]  }
 0x25a   : > { %4273 = vmatpush1.bf16.msra.mxu1 %v5344_v3  ;;  %v820_v3 = vld [vmem:[#allocation8 + $0x998] sm:$0xff] }
 0x25b   : > { %4274 = vmatprep.subr.bf16.mxu1 %v5353_v27  ;;  %v5908_v27 = vld [vmem:[#allocation9 + $0x20] ss:$8 sps:$4 sm:$0xff]   ;;  %v860_v63 = vld [vmem:[#allocation8 + $0xad8] sm:$0xff] }
 0x25c   : > { %4171 = vmatpush1.bf16.msra.mxu0 %v5598_v26  ;;  %v824_v26 = vld [vmem:[#allocation8 + $0x9b8] sm:$0xff] }
 0x25d   : > { %4172 = vmatprep.subr.bf16.mxu0 %v5607_v20  ;;  %v864_v0 = vld [vmem:[#allocation8 + $0xaf8] sm:$0xff] }
 0x25e   : > { %4275 = vmatpush1.bf16.msra.mxu1 %v5352_v35  ;;  %v5424_v35 = vcombine.low %v820_v3, %v824_v26  ;;  %v5465_v4 = vcombine.high %v860_v63, %v864_v0  ;;  %v5464_v58 = vcombine.low %v860_v63, %v864_v0  ;;  %v940_v0 = vld [vmem:[#allocation8 + $0xd58] sm:$0xff] }
 0x25f   : > { %4276 = vmatprep.subr.bf16.mxu1 %v5361_v39  ;;  %v5433_v39 = vcombine.high %v828_v28, %v832_v33  ;;  %v5940_v33 = vld [vmem:[#allocation9 + $0xc4] ss:$8 sps:$4 sm:$0xff]  }
 0x260   : > { %4173 = vmatpush1.bf16.msra.mxu0 %v5606_v38  ;;  %v5916_v38 = vld [vmem:[#allocation9 + $0x44] ss:$8 sps:$4 sm:$0xff]  }
 0x261   : > { %4174 = vmatprep.subr.bf16.mxu0 %v5615_v32  ;;  %v836_v32 = vld [vmem:[#allocation8 + $0xa18] sm:$0xff] }
 0x262   : > { %4277 = vmatpush1.bf16.msra.mxu1 %v5360_v46  ;;  %v5441_v46 = vcombine.high %v836_v32, %v840_v13  ;;  %v5440_v34 = vcombine.low %v836_v32, %v840_v13  ;;  %v5943_v13 = vld [vmem:[#allocation9 + $0xd4] ss:$8 sps:$4 sm:$0xff]  }
 0x263   : > { %4278 = vmatprep.subr.bf16.mxu1 %v5369_v49  ;;  %v848_v49 = vld [vmem:[#allocation8 + $0xa78] sm:$0xff] }
 0x264   : > { %4175 = vmatpush1.bf16.msra.mxu0 %v5614_v47  ;;  %v844_v47 = vld [vmem:[#allocation8 + $0xa58] sm:$0xff] }
 0x265   : > { %4176 = vmatprep.subr.bf16.mxu0 %v5623_v51  ;;  %v5917_v51 = vld [vmem:[#allocation9 + $0x50] ss:$8 sps:$4 sm:$0xff]   ;;  %v5448_v37 = vcombine.low %v844_v47, %v848_v49 }
 0x266   : > { %4279 = vmatpush1.bf16.msra.mxu1 %v5368_v54  ;;  %v5449_v54 = vcombine.high %v844_v47, %v848_v49 }
 0x267   : > { %4299 = vmatprep.subr.bf16.mxu1 %v5377_v55  ;;  %v856_v55 = vld [vmem:[#allocation8 + $0xab8] sm:$0xff] }
 0x268   : > { %4177 = vmatpush1.bf16.msra.mxu0 %v5622_v30  ;;  %v852_v30 = vld [vmem:[#allocation8 + $0xa98] sm:$0xff] }
 0x269   : > { %4281 = vmatmul.mubr.bf16.vlgmr.msra.gmra.mrb[16].mxu1 %v6580_v62  ;;  %v5902_v62 = vld [vmem:[#allocation9] ss:$8 sps:$4 sm:$0xff]   ;;  %4829 = vmatprep.subr.bf16.mxu0 %v5904_v12 }
 0x26a   : > { %4300 = vmatpush1.bf16.msra.mxu1 %v5376_v61  ;;  %4290 = vmatprep.mubr.bf16.mxu1 %v6594_v11  ;;  %v812_v11 = vld [vmem:[#allocation8 + $0x958] sm:$0xff] }
 0x26b   : > { %4179 = vmatmul.mubr.bf16.vlgmr.msra.gmra.mrb[8].mxu0 %v6619_v44  ;;  %4301 = vmatprep.subr.bf16.mxu1 %v5385_v42  ;;  %v5417_v24 = vcombine.high %v812_v11, %v816_v17  ;;  %v5416_v20 = vcombine.low %v812_v11, %v816_v17  ;;  %v5925_v61 = vld [vmem:[#allocation9 + $0x74] ss:$8 sps:$4 sm:$0xff]   ;;  %v5457_v42 = vcombine.high %v852_v30, %v856_v55  ;;  %v5934_v17 = vld [vmem:[#allocation9 + $0xa4] ss:$8 sps:$4 sm:$0xff]  }
 0x26c   : > { %4188 = vmatprep.mubr.bf16.mxu0 %v6641_v31  ;;  %4830 = vmatpush1.bf16.msra.mxu0 %v5902_v62  ;;  %v5931_v62 = vld [vmem:[#allocation9 + $0x94] ss:$8 sps:$4 sm:$0xff]  }
 0x26d   : > { %4831 = vmatprep.subr.bf16.mxu0 %v5907_v60  ;;  %v880_v60 = vld [vmem:[#allocation8 + $0xb78] sm:$0xff] }
 0x26e   : > { %4302 = vmatpush1.bf16.msra.mxu1 %v5384_v2  ;;  %v5923_v2 = vld [vmem:[#allocation9 + $0x70] ss:$8 sps:$4 sm:$0xff]  }
 0x26f   : > { %4303 = vmatprep.subr.bf16.mxu1 %v5393_v59  ;;  %v5456_v59 = vcombine.low %v852_v30, %v856_v55  ;;  %v924_v30 = vld [vmem:[#allocation8 + $0xcd8] sm:$0xff] }
 0x270   : > { %4832 = vmatpush1.bf16.msra.mxu0 %v5905_v21  ;;  %v928_v55 = vld [vmem:[#allocation8 + $0xcf8] sm:$0xff] }
 0x271   : > { %4291 = vmatmul.mubr.bf16.gmra.mrb[20].mxu1 %v6611_v36  ;;  %v5910_v36 = vld [vmem:[#allocation9 + $0x24] ss:$8 sps:$4 sm:$0xff]   ;;  %v5528_v63 = vcombine.low %v924_v30, %v928_v55 }
 0x272   : > { %4304 = vmatpush1.bf16.msra.mxu1 %v5392_v56  ;;  %4331 = vmatprep.mubr.bf16.mxu1 %v6623_v48  ;;  %v5425_v48 = vcombine.high %v820_v3, %v824_v26  ;;  %v868_v56 = vld [vmem:[#allocation8 + $0xb18] sm:$0xff] }
 0x273   : > { %4189 = vmatmul.mubr.bf16.gmra.mrb[12].mxu0 %v6647_v50  ;;  %4305 = vmatprep.subr.bf16.mxu1 %v5401_v5  ;;  %v872_v5 = vld [vmem:[#allocation8 + $0xb38] sm:$0xff] }
 0x274   : > { %4833 = vmatprep.subr.bf16.mxu0 %v5910_v36  ;;  %v5473_v12 = vcombine.high %v868_v56, %v872_v5  ;;  %v5472_v11 = vcombine.low %v868_v56, %v872_v5  ;;  %v888_v36 = vld [vmem:[#allocation8 + $0xbb8] sm:$0xff] }
 0x275   : > { %4834 = vmatpush1.bf16.msra.mxu0 %v5908_v27  ;;  %v5937_v26 = vld [vmem:[#allocation9 + $0xb4] ss:$8 sps:$4 sm:$0xff]  }
 0x276   : > { %4306 = vmatpush1.bf16.msra.mxu1 %v5400_v1  ;;  %4835 = vmatprep.subr.bf16.mxu0 %v5913_v53  ;;  %v876_v1 = vld [vmem:[#allocation8 + $0xb58] sm:$0xff] }
 0x277   : > { %4307 = vmatprep.subr.bf16.mxu1 %v5409_v15  ;;  %v5929_v15 = vld [vmem:[#allocation9 + $0x90] ss:$8 sps:$4 sm:$0xff]   ;;  %v5481_v21 = vcombine.high %v876_v1, %v880_v60  ;;  %v5480_v3 = vcombine.low %v876_v1, %v880_v60  ;;  %v5946_v1 = vld [vmem:[#allocation9 + $0xe4] ss:$8 sps:$4 sm:$0xff]  }
 0x278   : > { %v896_v53 = vld [vmem:[#allocation8 + $0xbf8] sm:$0xff] }
 0x279   : > { %4836 = vmatpush1.bf16.msra.mxu0 %v5911_v8 }
 0x27a   : > { %4308 = vmatpush1.bf16.msra.mxu1 %v5408_v23  ;;  %4837 = vmatprep.subr.bf16.mxu0 %v5916_v38  ;;  %v884_v23 = vld [vmem:[#allocation8 + $0xb98] sm:$0xff] }
 0x27b   : > { %4309 = vmatprep.subr.bf16.mxu1 %v5417_v24  ;;  %v5932_v24 = vld [vmem:[#allocation9 + $0xa0] ss:$8 sps:$4 sm:$0xff]   ;;  %v5489_v27 = vcombine.high %v884_v23, %v888_v36  ;;  %v5488_v28 = vcombine.low %v884_v23, %v888_v36  ;;  %v904_v38 = vld [vmem:[#allocation8 + $0xc38] sm:$0xff] }
 0x27c   : > { %v5949_v36 = vld [vmem:[#allocation9 + $0xf4] ss:$8 sps:$4 sm:$0xff]  }
 0x27d   : > { %4838 = vmatpush1.bf16.msra.mxu0 %v5914_v41 }
 0x27e   : > { %4310 = vmatpush1.bf16.msra.mxu1 %v5416_v20  ;;  %4839 = vmatprep.subr.bf16.mxu0 %v5919_v45  ;;  %v892_v20 = vld [vmem:[#allocation8 + $0xbd8] sm:$0xff] }
 0x27f   : > { %4311 = vmatprep.subr.bf16.mxu1 %v5425_v48  ;;  %v5935_v48 = vld [vmem:[#allocation9 + $0xb0] ss:$8 sps:$4 sm:$0xff]   ;;  %v5497_v8 = vcombine.high %v892_v20, %v896_v53  ;;  %v5496_v32 = vcombine.low %v892_v20, %v896_v53 }
 0x280   : > { %v912_v45 = vld [vmem:[#allocation8 + $0xc78] sm:$0xff] }
 0x281   : > { %4840 = vmatpush1.bf16.msra.mxu0 %v5917_v51  ;;  %v916_v51 = vld [vmem:[#allocation8 + $0xc98] sm:$0xff] }
 0x282   : > { %4312 = vmatpush1.bf16.msra.mxu1 %v5424_v35  ;;  %4841 = vmatprep.subr.bf16.mxu0 %v5922_v52  ;;  %v900_v35 = vld [vmem:[#allocation8 + $0xc18] sm:$0xff] }
 0x283   : > { %4313 = vmatprep.subr.bf16.mxu1 %v5433_v39  ;;  %v5938_v39 = vld [vmem:[#allocation9 + $0xc0] ss:$8 sps:$4 sm:$0xff]   ;;  %v5505_v41 = vcombine.high %v900_v35, %v904_v38  ;;  %v5504_v47 = vcombine.low %v900_v35, %v904_v38  ;;  %v976_v20 = vld [vmem:[#allocation8 + $0xe78] sm:$0xff] }
 0x284   : > { %v980_v35 = vld [vmem:[#allocation8 + $0xe98] sm:$0xff] }
 0x285   : > { %4842 = vmatpush1.bf16.msra.mxu0 %v5920_v57  ;;  %v984_v38 = vld [vmem:[#allocation8 + $0xeb8] sm:$0xff] }
 0x286   : > { %4314 = vmatpush1.bf16.msra.mxu1 %v5432_v43  ;;  %4843 = vmatprep.subr.bf16.mxu0 %v5925_v61  ;;  %v908_v43 = vld [vmem:[#allocation8 + $0xc58] sm:$0xff] }
 0x287   : > { %4315 = vmatprep.subr.bf16.mxu1 %v5441_v46  ;;  %v5941_v46 = vld [vmem:[#allocation9 + $0xd0] ss:$8 sps:$4 sm:$0xff]   ;;  %v5513_v49 = vcombine.high %v908_v43, %v912_v45  ;;  %v5512_v52 = vcombine.low %v908_v43, %v912_v45  ;;  %v5584_v43 = vcombine.low %v980_v35, %v984_v38 }
 0x288   : > { %v932_v61 = vld [vmem:[#allocation8 + $0xd18] sm:$0xff] }
 0x289   : > { %4844 = vmatpush1.bf16.msra.mxu0 %v5923_v2 }
 0x28a   : > { %4316 = vmatpush1.bf16.msra.mxu1 %v5440_v34  ;;  %4845 = vmatprep.subr.bf16.mxu0 %v5928_v19  ;;  %v920_v34 = vld [vmem:[#allocation8 + $0xcb8] sm:$0xff] }
 0x28b   : > { %4317 = vmatprep.subr.bf16.mxu1 %v5449_v54  ;;  %v5521_v54 = vcombine.high %v916_v51, %v920_v34  ;;  %v5520_v57 = vcombine.low %v916_v51, %v920_v34  ;;  %v948_v19 = vld [vmem:[#allocation8 + $0xd98] sm:$0xff] }
 0x28d   : > { %4846 = vmatpush1.bf16.msra.mxu0 %v5926_v22 }
 0x28e   : > { %4318 = vmatpush1.bf16.msra.mxu1 %v5448_v37  ;;  %4847 = vmatprep.subr.bf16.mxu0 %v5931_v62  ;;  %v5529_v37 = vcombine.high %v924_v30, %v928_v55 }
 0x28f   : > { %4319 = vmatprep.subr.bf16.mxu1 %v5457_v42  ;;  %v936_v42 = vld [vmem:[#allocation8 + $0xd38] sm:$0xff] }
 0x290   : > { %v5536_v2 = vcombine.low %v932_v61, %v936_v42 }
 0x291   : > { %4848 = vmatpush1.bf16.msra.mxu0 %v5929_v15 }
 0x292   : > { %4320 = vmatpush1.bf16.msra.mxu1 %v5456_v59  ;;  %4849 = vmatprep.subr.bf16.mxu0 %v5934_v17  ;;  %v964_v17 = vld [vmem:[#allocation8 + $0xe18] sm:$0xff] }
 0x293   : > { %4321 = vmatprep.subr.bf16.mxu1 %v5465_v4  ;;  %v952_v4 = vld [vmem:[#allocation8 + $0xdb8] sm:$0xff] }
 0x294   : > { %v5553_v5 = vcombine.high %v948_v19, %v952_v4 }
 0x295   : > { %4850 = vmatpush1.bf16.msra.mxu0 %v5932_v24 }
 0x296   : > { %4322 = vmatpush1.bf16.msra.mxu1 %v5464_v58  ;;  %4851 = vmatprep.subr.bf16.mxu0 %v5937_v26  ;;  %v960_v58 = vld [vmem:[#allocation8 + $0xdf8] sm:$0xff] }
 0x297   : > { %4323 = vmatprep.subr.bf16.mxu1 %v5473_v12  ;;  %v5552_v12 = vcombine.low %v948_v19, %v952_v4  ;;  %v4401_v19 = vmul.f32 %v6690_v7, %v6690_v7 }
 0x299   : > { %4852 = vmatpush1.bf16.msra.mxu0 %v5935_v48 }
 0x29a   : > { %4324 = vmatpush1.bf16.msra.mxu1 %v5472_v11  ;;  %4853 = vmatprep.subr.bf16.mxu0 %v5940_v33  ;;  %v5944_v11 = vld [vmem:[#allocation9 + $0xe0] ss:$8 sps:$4 sm:$0xff]  }
 0x29b   : > { %4325 = vmatprep.subr.bf16.mxu1 %v5481_v21  ;;  %v968_v21 = vld [vmem:[#allocation8 + $0xe38] sm:$0xff] }
 0x29c   : > { %v5569_v24 = vcombine.high %v964_v17, %v968_v21 }
 0x29d   : > { %4854 = vmatpush1.bf16.msra.mxu0 %v5938_v39 }
 0x29e   : > { %4326 = vmatpush1.bf16.msra.mxu1 %v5480_v3  ;;  %4855 = vmatprep.subr.bf16.mxu0 %v5943_v13  ;;  %v5947_v3 = vld [vmem:[#allocation9 + $0xf0] ss:$8 sps:$4 sm:$0xff]  }
 0x29f   : > { %4327 = vmatprep.subr.bf16.mxu1 %v5489_v27  ;;  %v972_v27 = vld [vmem:[#allocation8 + $0xe58] sm:$0xff] }
 0x2a0   : > { %v5576_v39 = vcombine.low %v972_v27, %v976_v20  ;;  %v988_v13 = vld [vmem:[#allocation8 + $0xed8] sm:$0xff] }
 0x2a1   : > { %4856 = vmatpush1.bf16.msra.mxu0 %v5941_v46  ;;  %v996_v46 = vld [vmem:[#allocation8 + $0xf18] sm:$0xff] }
 0x2a2   : > { %4328 = vmatpush1.bf16.msra.mxu1 %v5488_v28  ;;  %4857 = vmatprep.subr.bf16.mxu0 %v5946_v1  ;;  %v5568_v28 = vcombine.low %v964_v17, %v968_v21 }
 0x2a3   : > { %4329 = vmatprep.subr.bf16.mxu1 %v5497_v8  ;;  %v5577_v8 = vcombine.high %v972_v27, %v976_v20  ;;  %v4410_v20 = vmul.f32 %v6705_v6, %v6705_v6  ;;  %v5959_v6 = vld [vmem:[#allocation9 + $0x130] ss:$8 sps:$4 sm:$0xff]  }
 0x2a5   : > { %4858 = vmatpush1.bf16.msra.mxu0 %v5944_v11 }
 0x2a6   : > { %4330 = vmatpush1.bf16.msra.mxu1 %v5496_v32  ;;  %4859 = vmatprep.subr.bf16.mxu0 %v5949_v36  ;;  %v5585_v32 = vcombine.high %v980_v35, %v984_v38  ;;  %v5953_v35 = vld [vmem:[#allocation9 + $0x110] ss:$8 sps:$4 sm:$0xff]   ;;  %v5958_v38 = vld [vmem:[#allocation9 + $0x124] ss:$8 sps:$4 sm:$0xff]  }
 0x2a7   : > { %4350 = vmatprep.subr.bf16.mxu1 %v5505_v41  ;;  %v992_v41 = vld [vmem:[#allocation8 + $0xef8] sm:$0xff] }
 0x2a8   : > { %v5593_v45 = vcombine.high %v988_v13, %v992_v41  ;;  %v5592_v51 = vcombine.low %v988_v13, %v992_v41  ;;  %v5961_v13 = vld [vmem:[#allocation9 + $0x134] ss:$8 sps:$4 sm:$0xff]   ;;  %v5964_v41 = vld [vmem:[#allocation9 + $0x144] ss:$8 sps:$4 sm:$0xff]  }
 0x2a9   : > { %4332 = vmatmul.mubr.bf16.vlgmr.msra.gmra.mrb[16].mxu1 %v6569_v29  ;;  %v5537_v29 = vcombine.high %v932_v61, %v936_v42  ;;  %4860 = vmatpush1.bf16.msra.mxu0 %v5947_v3 }
 0x2aa   : > { %4351 = vmatpush1.bf16.msra.mxu1 %v5504_v47  ;;  %4341 = vmatprep.mubr.bf16.mxu1 %v6629_v16  ;;  %v944_v16 = vld [vmem:[#allocation8 + $0xd78] sm:$0xff] }
 0x2ab   : > { %4352 = vmatprep.subr.bf16.mxu1 %v5513_v49  ;;  %v5545_v59 = vcombine.high %v940_v0, %v944_v16  ;;  %v5544_v56 = vcombine.low %v940_v0, %v944_v16  ;;  %v1000_v47 = vld [vmem:[#allocation8 + $0xf38] sm:$0xff]  ;;  %v5952_v49 = vld [vmem:[#allocation9 + $0x104] ss:$8 sps:$4 sm:$0xff]  }
 0x2ac   : > { %4880 = vmatprep.subr.bf16.mxu0 %v5952_v49  ;;  %v5601_v34 = vcombine.high %v996_v46, %v1000_v47  ;;  %v5600_v30 = vcombine.low %v996_v46, %v1000_v47  ;;  %v5965_v46 = vld [vmem:[#allocation9 + $0x150] ss:$8 sps:$4 sm:$0xff]   ;;  %v5970_v47 = vld [vmem:[#allocation9 + $0x164] ss:$8 sps:$4 sm:$0xff]   ;;  %v5968_v49 = vld [vmem:[#allocation9 + $0x160] ss:$8 sps:$4 sm:$0xff]  }
 0x2ae   : > { %4353 = vmatpush1.bf16.msra.mxu1 %v5512_v52  ;;  %v1004_v52 = vld [vmem:[#allocation8 + $0xf58] sm:$0xff] }
 0x2af   : > { %4354 = vmatprep.subr.bf16.mxu1 %v5521_v54  ;;  %v1008_v54 = vld [vmem:[#allocation8 + $0xf78] sm:$0xff] }
 0x2b0   : > { %v5609_v55 = vcombine.high %v1004_v52, %v1008_v54  ;;  %v5608_v61 = vcombine.low %v1004_v52, %v1008_v54  ;;  %v5976_v52 = vld [vmem:[#allocation9 + $0x184] ss:$8 sps:$4 sm:$0xff]   ;;  %v5974_v54 = vld [vmem:[#allocation9 + $0x180] ss:$8 sps:$4 sm:$0xff]  }
 0x2b1   : > { %4342 = vmatmul.mubr.bf16.gmra.mrb[20].mxu1 %v6635_v9  ;;  %v956_v9 = vld [vmem:[#allocation8 + $0xdd8] sm:$0xff] }
 0x2b2   : > { %4355 = vmatpush1.bf16.msra.mxu1 %v5520_v57  ;;  %4382 = vmatprep.mubr.bf16.mxu1 %v6617_v10  ;;  %v5561_v15 = vcombine.high %v956_v9, %v960_v58  ;;  %v5560_v23 = vcombine.low %v956_v9, %v960_v58  ;;  %v1012_v57 = vld [vmem:[#allocation8 + $0xf98] sm:$0xff] }
 0x2b3   : > { %4356 = vmatprep.subr.bf16.mxu1 %v5529_v37  ;;  %v1016_v37 = vld [vmem:[#allocation8 + $0xfb8] sm:$0xff] }
 0x2b4   : > { %v5617_v42 = vcombine.high %v1012_v57, %v1016_v37  ;;  %v5616_v0 = vcombine.low %v1012_v57, %v1016_v37  ;;  %v5982_v57 = vld [vmem:[#allocation9 + $0x1a4] ss:$8 sps:$4 sm:$0xff]   ;;  %v5980_v37 = vld [vmem:[#allocation9 + $0x1a0] ss:$8 sps:$4 sm:$0xff]  }
 0x2b6   : > { %4357 = vmatpush1.bf16.msra.mxu1 %v5528_v63  ;;  %v1020_v63 = vld [vmem:[#allocation8 + $0xfd8] sm:$0xff] }
 0x2b7   : > { %4358 = vmatprep.subr.bf16.mxu1 %v5537_v29  ;;  %v1024_v29 = vld [vmem:[#allocation8 + $0xff8] sm:$0xff] }
 0x2b8   : > { %v5625_v16 = vcombine.high %v1020_v63, %v1024_v29 }
 0x2ba   : > { %4359 = vmatpush1.bf16.msra.mxu1 %v5536_v2  ;;  %v5624_v2 = vcombine.low %v1020_v63, %v1024_v29  ;;  %v5988_v63 = vld [vmem:[#allocation9 + $0x1c4] ss:$8 sps:$4 sm:$0xff]   ;;  %v5986_v29 = vld [vmem:[#allocation9 + $0x1c0] ss:$8 sps:$4 sm:$0xff]  }
 0x2bb   : > { %4360 = vmatprep.subr.bf16.mxu1 %v5545_v59 }
 0x2bc   : > { %v6718_v22 = vpop.f32.mrb[8].mxu1 }
 0x2bd   : > { %v6720_v62 = vpop.f32.mrb[9].mxu1 }
 0x2be   : > { %v6722_v10 = vpop.f32.mrb[10].mxu1  ;;  %4361 = vmatpush1.bf16.msra.mxu1 %v5544_v56 }
 0x2bf   : > { %v6724_v60 = vpop.f32.mrb[11].mxu1  ;;  %4362 = vmatprep.subr.bf16.mxu1 %v5553_v5  ;;  %v4402_v5 = vmul.f32 %v6693_v14, %v6693_v14  ;;  %v4409_v14 = vmul.f32 %v6702_v40, %v6702_v40  ;;  %v5956_v40 = vld [vmem:[#allocation9 + $0x120] ss:$8 sps:$4 sm:$0xff]  }
 0x2c2   : > { %4363 = vmatpush1.bf16.msra.mxu1 %v5552_v12  ;;  %v4405_v12 = vmul.f32 %v6696_v18, %v6696_v18  ;;  %v5955_v18 = vld [vmem:[#allocation9 + $0x114] ss:$8 sps:$4 sm:$0xff]  }
 0x2c3   : > { %4364 = vmatprep.subr.bf16.mxu1 %v5561_v15 }
 0x2c4   : > { %v6726_v26 = vpop.f32.mrb[12].mxu1 }
 0x2c5   : > { %v6728_v53 = vpop.f32.mrb[13].mxu1 }
 0x2c6   : > { %v3990_v48 = vpop.f32.mrb[14].mxu1  ;;  %4365 = vmatpush1.bf16.msra.mxu1 %v5560_v23 }
 0x2c7   : > { %v3991_v33 = vpop.f32.mrb[15].mxu1  ;;  %4366 = vmatprep.subr.bf16.mxu1 %v5569_v24  ;;  %v5950_v24 = vld [vmem:[#allocation9 + $0x100] ss:$8 sps:$4 sm:$0xff]  }
 0x2ca   : > { %4367 = vmatpush1.bf16.msra.mxu1 %v5568_v28 }
 0x2cb   : > { %4368 = vmatprep.subr.bf16.mxu1 %v5577_v8 }
 0x2ce   : > { %4369 = vmatpush1.bf16.msra.mxu1 %v5576_v39 }
 0x2cf   : > { %4370 = vmatprep.subr.bf16.mxu1 %v5585_v32 }
 0x2d2   : > { %4371 = vmatpush1.bf16.msra.mxu1 %v5584_v43  ;;  %v5962_v43 = vld [vmem:[#allocation9 + $0x140] ss:$8 sps:$4 sm:$0xff]  }
 0x2d3   : > { %4372 = vmatprep.subr.bf16.mxu1 %v5593_v45  ;;  %v5967_v45 = vld [vmem:[#allocation9 + $0x154] ss:$8 sps:$4 sm:$0xff]  }
 0x2d6   : > { %4373 = vmatpush1.bf16.msra.mxu1 %v5592_v51  ;;  %v5973_v51 = vld [vmem:[#allocation9 + $0x174] ss:$8 sps:$4 sm:$0xff]  }
 0x2d7   : > { %4374 = vmatprep.subr.bf16.mxu1 %v5601_v34  ;;  %v5971_v34 = vld [vmem:[#allocation9 + $0x170] ss:$8 sps:$4 sm:$0xff]  }
 0x2da   : > { %4375 = vmatpush1.bf16.msra.mxu1 %v5600_v30  ;;  %v5979_v30 = vld [vmem:[#allocation9 + $0x194] ss:$8 sps:$4 sm:$0xff]  }
 0x2db   : > { %4376 = vmatprep.subr.bf16.mxu1 %v5609_v55  ;;  %v5977_v55 = vld [vmem:[#allocation9 + $0x190] ss:$8 sps:$4 sm:$0xff]  }
 0x2de   : > { %4377 = vmatpush1.bf16.msra.mxu1 %v5608_v61  ;;  %v5985_v61 = vld [vmem:[#allocation9 + $0x1b4] ss:$8 sps:$4 sm:$0xff]  }
 0x2df   : > { %4378 = vmatprep.subr.bf16.mxu1 %v5617_v42  ;;  %v5983_v42 = vld [vmem:[#allocation9 + $0x1b0] ss:$8 sps:$4 sm:$0xff]  }
 0x2e2   : > { %4379 = vmatpush1.bf16.msra.mxu1 %v5616_v0  ;;  %v5991_v0 = vld [vmem:[#allocation9 + $0x1d4] ss:$8 sps:$4 sm:$0xff]  }
 0x2e3   : > { %4380 = vmatprep.subr.bf16.mxu1 %v5625_v16  ;;  %v5989_v16 = vld [vmem:[#allocation9 + $0x1d0] ss:$8 sps:$4 sm:$0xff]  }
 0x2e6   : > { %4381 = vmatpush1.bf16.msra.mxu1 %v5624_v2  ;;  %v5994_v2 = vld [vmem:[#allocation9 + $0x1e4] ss:$8 sps:$4 sm:$0xff]  }
 0x2e9   : > { %4383 = vmatmul.mubr.bf16.vlgmr.msra.gmra.mrb[16].mxu1 %v6619_v44 }
 0x2ea   : > { %4392 = vmatprep.mubr.bf16.mxu1 %v6641_v31  ;;  %v4406_v31 = vmul.f32 %v6699_v25, %v6699_v25 }
 0x2f1   : > { %4393 = vmatmul.mubr.bf16.gmra.mrb[20].mxu1 %v6647_v50 }
 0x33e   : > { %v4180_v59 = vpop.f32.mrb[8].mxu0 }
 0x33f   : > { %v4413_v4 = vmul.f32 %v4180_v59, %v4180_v59  ;;  %v4182_v56 = vpop.f32.mrb[9].mxu0  ;;  %v5992_v59 = vld [vmem:[#allocation9 + $0x1e0] ss:$8 sps:$4 sm:$0xff]  }
 0x340   : > { %v4414_v9 = vmul.f32 %v4182_v56, %v4182_v56  ;;  %v4184_v58 = vpop.f32.mrb[10].mxu0 }
 0x341   : > { %v4425_v1 = vadd.f32 %v4413_v4, %v4401_v19  ;;  %v4417_v44 = vmul.f32 %v4184_v58, %v4184_v58  ;;  %v4186_v15 = vpop.f32.mrb[11].mxu0  ;;  %v5997_v19 = vld [vmem:[#allocation9 + $0x1f4] ss:$8 sps:$4 sm:$0xff]   ;;  %v5995_v4 = vld [vmem:[#allocation9 + $0x1f0] ss:$8 sps:$4 sm:$0xff]  }
 0x342   : > { %v4426_v50 = vadd.f32 %v4414_v9, %v4402_v5  ;;  %v4418_v11 = vmul.f32 %v4186_v15, %v4186_v15  ;;  %v4403_v5 = vmul.f32 %v6718_v22, %v6718_v22  ;;  %v4407_v15 = vmul.f32 %v6722_v10, %v6722_v10 }
 0x343   : > { %v4429_v17 = vadd.f32 %v4417_v44, %v4405_v12  ;;  %v4404_v12 = vmul.f32 %v6720_v62, %v6720_v62  ;;  %v4411_v62 = vmul.f32 %v6726_v26, %v6726_v26  ;;  %v4412_v10 = vmul.f32 %v6728_v53, %v6728_v53 }
 0x344   : > { %v4430_v7 = vadd.f32 %v4418_v11, %v4406_v31 }
 0x345   : > { %v4437_v21 = vpack.c.bf16 %v4429_v17, %v4425_v1  ;;  %v4408_v17 = vmul.f32 %v6724_v60, %v6724_v60 }
 0x346   : > { %v4190_v23 = vpop.f32.mrb[12].mxu0  ;;  %v4438_v36 = vpack.c.bf16 %v4430_v7, %v4426_v50 }
 0x347   : > { %v4421_v3 = vmul.f32 %v4190_v23, %v4190_v23  ;;  %v4192_v27 = vpop.f32.mrb[13].mxu0 }
 0x348   : > { %v4422_v48 = vmul.f32 %v4192_v27, %v4192_v27  ;;  %v4194_v28 = vpop.f32.mrb[14].mxu0  ;;  %4861 = vmatprep.mubr.bf16.mxu0 %v4438_v36 }
 0x349   : > { %v4433_v25 = vadd.f32 %v4421_v3, %v4409_v14  ;;  %v4195_v33 = vpop.f32.mrb[15].mxu0  ;;  %4862 = vmatmul.mubr.bf16.vlgmr.msra.gmra.mrb[16].mxu0 %v4437_v21 }
 0x34a   : > { %v4434_v8 = vadd.f32 %v4422_v48, %v4410_v20  ;;  %4881 = vmatpush1.bf16.msra.mxu0 %v5950_v24 }
 0x34b   : > { %4882 = vmatprep.subr.bf16.mxu0 %v5955_v18  ;;  %v4441_v32 = vpack.c.bf16 %v4433_v25, %v4433_v25 }
 0x34c   : > { %v4442_v39 = vpack.c.bf16 %v4434_v8, %v4434_v8 }
 0x34e   : > { %4871 = vmatprep.mubr.bf16.mxu0 %v4442_v39  ;;  %4883 = vmatpush1.bf16.msra.mxu0 %v5953_v35 }
 0x34f   : > { %4884 = vmatprep.subr.bf16.mxu0 %v5958_v38 }
 0x351   : > { %4872 = vmatmul.mubr.bf16.gmra.mrb[20].mxu0 %v4441_v32 }
 0x352   : > { %4885 = vmatpush1.bf16.msra.mxu0 %v5956_v40 }
 0x353   : > { %4886 = vmatprep.subr.bf16.mxu0 %v5961_v13 }
 0x356   : > { %4887 = vmatpush1.bf16.msra.mxu0 %v5959_v6 }
 0x357   : > { %4888 = vmatprep.subr.bf16.mxu0 %v5964_v41 }
 0x35a   : > { %4889 = vmatpush1.bf16.msra.mxu0 %v5962_v43 }
 0x35b   : > { %4890 = vmatprep.subr.bf16.mxu0 %v5967_v45 }
 0x35e   : > { %4891 = vmatpush1.bf16.msra.mxu0 %v5965_v46 }
 0x35f   : > { %4892 = vmatprep.subr.bf16.mxu0 %v5970_v47 }
 0x362   : > { %4893 = vmatpush1.bf16.msra.mxu0 %v5968_v49 }
 0x363   : > { %4894 = vmatprep.subr.bf16.mxu0 %v5973_v51 }
 0x366   : > { %4895 = vmatpush1.bf16.msra.mxu0 %v5971_v34 }
 0x367   : > { %4896 = vmatprep.subr.bf16.mxu0 %v5976_v52 }
 0x36a   : > { %4897 = vmatpush1.bf16.msra.mxu0 %v5974_v54 }
 0x36b   : > { %4898 = vmatprep.subr.bf16.mxu0 %v5979_v30 }
 0x36e   : > { %4899 = vmatpush1.bf16.msra.mxu0 %v5977_v55 }
 0x36f   : > { %4900 = vmatprep.subr.bf16.mxu0 %v5982_v57 }
 0x372   : > { %4901 = vmatpush1.bf16.msra.mxu0 %v5980_v37 }
 0x373   : > { %4902 = vmatprep.subr.bf16.mxu0 %v5985_v61 }
 0x376   : > { %4903 = vmatpush1.bf16.msra.mxu0 %v5983_v42 }
 0x377   : > { %4904 = vmatprep.subr.bf16.mxu0 %v5988_v63 }
 0x37a   : > { %4905 = vmatpush1.bf16.msra.mxu0 %v5986_v29 }
 0x37b   : > { %4906 = vmatprep.subr.bf16.mxu0 %v5991_v0 }
 0x37e   : > { %4907 = vmatpush1.bf16.msra.mxu0 %v5989_v16 }
 0x37f   : > { %4908 = vmatprep.subr.bf16.mxu0 %v5994_v2 }
 0x382   : > { %4909 = vmatpush1.bf16.msra.mxu0 %v5992_v59 }
 0x383   : > { %4910 = vmatprep.subr.bf16.mxu0 %v5997_v19 }
 0x386   : > { %4911 = vmatpush1.bf16.msra.mxu0 %v5995_v4 }
 0x3bc   : > { %v4384_v56 = vpop.f32.mrb[16].mxu1 }
 0x3bd   : > { %v4415_v9 = vmul.f32 %v4384_v56, %v4384_v56  ;;  %v4386_v58 = vpop.f32.mrb[17].mxu1 }
 0x3be   : > { %v4416_v1 = vmul.f32 %v4386_v58, %v4386_v58  ;;  %v4388_v44 = vpop.f32.mrb[18].mxu1 }
 0x3bf   : > { %v4427_v31 = vadd.f32 %v4415_v9, %v4403_v5  ;;  %v4419_v50 = vmul.f32 %v4388_v44, %v4388_v44  ;;  %v4390_v11 = vpop.f32.mrb[19].mxu1 }
 0x3c0   : > { %v4428_v7 = vadd.f32 %v4416_v1, %v4404_v12  ;;  %v4420_v21 = vmul.f32 %v4390_v11, %v4390_v11 }
 0x3c1   : > { %v4431_v23 = vadd.f32 %v4419_v50, %v4407_v15 }
 0x3c2   : > { %v4432_v22 = vadd.f32 %v4420_v21, %v4408_v17 }
 0x3c3   : > { %v4439_v36 = vpack.c.bf16 %v4431_v23, %v4427_v31 }
 0x3c4   : > { %v4394_v24 = vpop.f32.mrb[20].mxu1  ;;  %v4440_v14 = vpack.c.bf16 %v4432_v22, %v4428_v7 }
 0x3c5   : > { %v4423_v3 = vmul.f32 %v4394_v24, %v4394_v24  ;;  %v4396_v27 = vpop.f32.mrb[21].mxu1 }
 0x3c6   : > { %v4424_v18 = vmul.f32 %v4396_v27, %v4396_v27  ;;  %v4398_v20 = vpop.f32.mrb[22].mxu1  ;;  %4912 = vmatprep.mubr.bf16.mxu0 %v4440_v14 }
 0x3c7   : > { %v4435_v48 = vadd.f32 %v4423_v3, %v4411_v62  ;;  %v4399_v60 = vpop.f32.mrb[23].mxu1  ;;  %4913 = vmatmul.mubr.bf16.vlgmr.msra.gmra.mrb[16].mxu0 %v4439_v36 }
 0x3c8   : > { %v4436_v28 = vadd.f32 %v4424_v18, %v4412_v10 }
 0x3c9   : > { %v4443_v33 = vpack.c.bf16 %v4435_v48, %v4435_v48 }
 0x3ca   : > { %v4444_v25 = vpack.c.bf16 %v4436_v28, %v4436_v28 }
 0x3cc   : > { %4922 = vmatprep.mubr.bf16.mxu0 %v4444_v25 }
 0x3cf   : > { %4923 = vmatmul.mubr.bf16.gmra.mrb[20].mxu0 %v4443_v33 }
 0x49a   : > { %v4914_v8 = vpop.f32.mrb[16].mxu0 }
 0x49b   : > { %v5701_v35 = vadd.f32 1e-08, %v4914_v8  ;;  %v4916_v38 = vpop.f32.mrb[17].mxu0 }
 0x49c   : > { %v5702_v26 = vadd.f32 1e-08, %v4916_v38  ;;  %v4918_v39 = vpop.f32.mrb[18].mxu0 }
 0x49d   : > { %5998 = vlog2.f32 %v5701_v35  ;;  %v5703_v40 = vadd.f32 1e-08, %v4918_v39  ;;  %v4920_v32 = vpop.f32.mrb[19].mxu0 }
 0x49e   : > { %6000 = vlog2.f32 %v5702_v26  ;;  %v5704_v53 = vadd.f32 1e-08, %v4920_v32 }
 0x49f   : > { %6002 = vlog2.f32 %v5703_v40 }
 0x4a0   : > { %6004 = vlog2.f32 %v5704_v53 }
 0x4a2   : > { %v4924_v13 = vpop.f32.mrb[20].mxu0 }
 0x4a3   : > { %v5705_v6 = vadd.f32 1e-08, %v4924_v13  ;;  %v4926_v41 = vpop.f32.mrb[21].mxu0 }
 0x4a4   : > { %v5706_v43 = vadd.f32 1e-08, %v4926_v41  ;;  %v4928_v45 = vpop.f32.mrb[22].mxu0 }
 0x4a5   : > { %6006 = vlog2.f32 %v5705_v6  ;;  %v4929_v46 = vpop.f32.mrb[23].mxu0 }
 0x4a6   : > { %6008 = vlog2.f32 %v5706_v43 }
 0x4a7   : > { %v5999_v47 = vpop.eup %5998 }
 0x4a8   : > { %v6001_v49 = vpop.eup %6000  ;;  %v4932_v51 = vmul.f32 0.6931472, %v5999_v47 }
 0x4a9   : > { %v6003_v34 = vpop.eup %6002  ;;  %v4934_v52 = vmul.f32 0.6931472, %v6001_v49 }
 0x4aa   : > { %v6005_v54 = vpop.eup %6004  ;;  %4943 = vst [vmem:[%s318_s21] sm:$0xff] %v4932_v51  ;;  %v4936_v30 = vmul.f32 0.6931472, %v6003_v34 }
 0x4ab   : > { %4944 = vst [vmem:[%s318_s21 + $0x8] sm:$0xff] %v4934_v52  ;;  %v4938_v55 = vmul.f32 0.6931472, %v6005_v54 }
 0x4ac   : > { %4945 = vst [vmem:[%s318_s21 + $0x10] sm:$0xff] %v4936_v30 }
 0x4ad   : > { %4946 = vst [vmem:[%s318_s21 + $0x18] sm:$0xff] %v4938_v55 }
 0x4af   : > { %v6007_v57 = vpop.eup %6006 }
 0x4b0   : > { %v6009_v37 = vpop.eup %6008  ;;  %v4940_v61 = vmul.f32 0.6931472, %v6007_v57 }
 0x4b1   : > { %v4942_v42 = vmul.f32 0.6931472, %v6009_v37 }
 0x4b2   : > { %4947 = vst [vmem:[%s318_s21 + $0x20] sm:$0xff] %v4940_v61 }
 0x4b3   : > { %4948 = vst [vmem:[%s318_s21 + $0x28] sm:$0xff] %v4942_v42 }
 0x4b4   : > { %6140 = shalt.err (!%p6137_p7)
}
 0x4b5   : > { %s6141_s14 = scalar_lea.hbm %s6765_s10, 768  ;;  %s6145_s26 = scalar_lea.hbm %s6818_s4, 1536 }
 0x4b6   : > { %p6142_p13 = scmp.ne.s32.totalorder %s6765_s10, %s6141_s14  ;;  %p6146_p2 = scmp.lt.u32.totalorder %s6765_s10, %s6818_s4 }
 0x4b7   : > { %p6147_p11 = scmp.lt.u32.totalorder %s6145_s26, %s6141_s14  ;;  %p6149_p1 = scmp.lt.u32.totalorder %s6141_s14, %s6765_s10 }
 0x4b8   : > { %p6143_p8 = pnand %p6142_p13, %p6845_p6 }
 0x4b9   : > { %p6148_p0 = por %p6147_p11, %p6146_p2 }
 0x4ba   : > { %p6144_p12 = pneg %p6143_p8 }
 0x4bb   : > { %p6150_p10 = por %p6149_p1, %p6148_p0 }
 0x4bd   : > { %p6151_p3 = pnand %p6150_p10, %p6144_p12 }
 0x4bf   : > { %6154 = shalt.err (!%p6151_p3)
}
 0x4c0   : > { %s6234_s2 = smov 256   ;;  %s6235_s3 = smov 16  }
 0x4c1   : > { %5818 = dma.vmem_to_hbm [thread:$0]  (%p6845_p6), %s6760_s23, 768, %s6765_s10, %s4950_s11, %s6234_s2, %s6234_s2, %s6235_s3  }
 0x4c2 PF: > { %s4981_s25 = sand.u32 1, %s6201_s15   ;;  %p6846_p4 = scmp.ne.s32.totalorder %s6828_s24, 0 }
 0x4c3   : > { %p6847_p9 = scmp.ge.s32.totalorder %s6221_s20, 2  ;;  %s4982_s22 = scalar_lea.sflag [#allocation5], %s4981_s25 }
 0x4c5   : > { %p5835_p5 = pnand %p6847_p9, %p6846_p4 }
 0x4c7   : > { %6196 = dma.done.wait (!%p5835_p5), %s4982_s22, 768  }
 0x4c8   : > { %6198 = vsyncadd (!%p5835_p5), %s4982_s22, 4294966528  ;;  %s24_s20 = sadd.s32 1, %s6221_s20   ;;  %s6848_s21 = sld [smem:[#allocation18_spill]] }
 0x4c9   : > { %p21_p7 = scmp.ge.s32.totalorder %s24_s20, 4   ;;  %s6849_s28 = sld [smem:[#allocation17_spill]] }
 0x4ca   : > { %s6850_s15 = smov %s6205_s16  ;;  %s6851_s16 = smov %s6209_s17 }
 0x4cb   : > { %s6853_s18 = smov %s6217_s19  ;;  %23 = sbr.rel (!%p21_p7) target bundleno = 13 (0xd), region = 103 }
 0x4ce   : > { %s6852_s17 = smov %s6848_s21 }
 0x4cf   : > { %s6854_s19 = smov %s6849_s28 }
 0x4d2   :  { %4987 = vsyncpa [#allocation4], 1 }
 0x4d3   :  { %4989 = vsyncpa [#allocation4 + $0x1], 1 }
 0x4d4   :  { %4990 = vsyncpa [#allocation7], 1 }
 0x4d5   :  { %4992 = vsyncpa [#allocation7 + $0x1], 1 }
 0x4d6   :  { %4993 = vsyncpa [#allocation10], 1 }
 0x4d7   :  { %4994 = vsyncpa [#allocation5], 1 }
 0x4d8   :  { %4996 = vsyncpa [#allocation5 + $0x1], 1 }

</bundles_post_ra>
